<compile_context>
chip_gen: v5e
topology: v5e:2x2
jax: 0.10.0
libtpu: 0.0.40
codegen_flags: <defaults>
</compile_context>

<pallas_src>
import functools

import jax
import jax.numpy as jnp
from jax import lax
from jax.experimental import pallas as pl
from jax.experimental.pallas import tpu as pltpu

EPS = 1e-5  # nn.InstanceNorm2d default eps


# ----------------------------------------------------------------------------
# Fused kernel: [conv3x3+IN+ReLU] -> [conv3x3+IN] -> residual add, per sample.
# Layout inside the kernel: (H, W, C) with channels on lanes, W on sublanes.
# ----------------------------------------------------------------------------
def _resblock_kernel(H, W, C, x_ref, w1_ref, w2_ref, out_ref, pad_ref, col_ref):
    HW = H * W
    inv_hw = 1.0 / float(HW)
    mm_dtype = col_ref.dtype          # matmul operand dtype (== input dtype)

    # Load the per-sample activation once; it is reused for conv1 and the
    # residual add (f32 for the VPU / IN math).
    xf = x_ref[0].astype(jnp.float32)                     # (H, W, C)

    def conv_in(v, w_ref, relu):
        """conv3x3(reflect-pad) + InstanceNorm (+ReLU). v: (H, W, C) f32."""
        # ---- reflect pad (width 1) into the f32 halo scratch -------------
        pad_ref[1:H + 1, 1:W + 1, :] = v
        pad_ref[0:1, 1:W + 1, :] = v[1:2]                  # top    = row 1
        pad_ref[H + 1:H + 2, 1:W + 1, :] = v[H - 2:H - 1]  # bottom = row H-2
        # Column reflect (also fixes the corners, matching np.pad 'reflect'):
        pad_ref[:, 0:1, :] = pad_ref[:, 2:3, :]            # left  = col 1
        pad_ref[:, W + 1:W + 2, :] = pad_ref[:, W - 1:W, :]  # right = col W-2

        # ---- im2col: fold the 9 taps into the contraction dim (K = 9*C) --
        for t in range(9):
            dh, dw = divmod(t, 3)
            col_ref[:, t * C:(t + 1) * C] = (
                pad_ref[dh:dh + H, dw:dw + W, :]
                .reshape(HW, C)
                .astype(mm_dtype))

        # ---- single MXU matmul, f32 accumulation --------------------------
        acc = jnp.dot(col_ref[...], w_ref[...],
                      preferred_element_type=jnp.float32)   # (HW, C) f32

        # ---- InstanceNorm2d (affine=False), one-pass stats ----------------
        # NOTE: the conv bias is intentionally omitted; it is removed exactly
        # by the mean subtraction below.
        s = jnp.sum(acc, axis=0, keepdims=True)             # (1, C)
        ss = jnp.sum(acc * acc, axis=0, keepdims=True)      # (1, C)
        mean = s * inv_hw
        var = ss * inv_hw - mean * mean                     # biased variance
        y = (acc - mean) * lax.rsqrt(var + EPS)
        if relu:
            y = jnp.maximum(y, 0.0)
        return y                                            # (HW, C) f32

    y1 = conv_in(xf, w1_ref, relu=True)                     # block 1 (ReLU)
    y2 = conv_in(y1.reshape(H, W, C), w2_ref, relu=False)   # block 2 (no act)

    # Residual add + lane-dense (H*W, C) store.
    out_ref[0] = (y2 + xf.reshape(HW, C)).astype(out_ref.dtype)


# ----------------------------------------------------------------------------
# ResidualBlock forward (NCHW in / NCHW out)
# ----------------------------------------------------------------------------
def residual_block_forward(x_nchw, params):
    N, C, H, W = x_nchw.shape
    x = jnp.transpose(x_nchw, (0, 2, 3, 1))                 # NCHW -> NHWC
    dt = x.dtype

    # Weights flattened to (9*C, C); row index = (kh*3 + kw)*C + cin matches
    # the im2col column order.  Cast to the matmul dtype (bf16 on v6e/v7x when
    # bf16 activations are passed in).  Biases are not passed: they cancel
    # under InstanceNorm(affine=False).
    w1 = params["w1"].reshape(9 * C, C).astype(dt)
    w2 = params["w2"].reshape(9 * C, C).astype(dt)

    kernel = functools.partial(_resblock_kernel, H, W, C)

    out_flat = pl.pallas_call(
        kernel,
        out_shape=jax.ShapeDtypeStruct((N, H * W, C), dt),
        grid_spec=pltpu.PrefetchScalarGridSpec(
            num_scalar_prefetch=0,
            grid=(N,),
            in_specs=[
                pl.BlockSpec((1, H, W, C), lambda n: (n, 0, 0, 0)),
                # Constant index_map -> the pipeliner DMAs the weights once.
                pl.BlockSpec((9 * C, C), lambda n: (0, 0)),
                pl.BlockSpec((9 * C, C), lambda n: (0, 0)),
            ],
            out_specs=pl.BlockSpec((1, H * W, C), lambda n: (n, 0, 0)),
            scratch_shapes=[
                # f32 halo buffer (robust unaligned sublane access), reused by
                # both convs.
                pltpu.VMEM((H + 2, W + 2, C), jnp.float32),
                # im2col buffer in the matmul dtype, reused by both convs.
                pltpu.VMEM((H * W, 9 * C), dt),
            ],
        ),
        compiler_params=pltpu.CompilerParams(
            dimension_semantics=("parallel",),      # batch across TCs (v7x)
            vmem_limit_bytes=48 * 1024 * 1024,      # headroom on all of v5e/v6e/v7x
        ),
    )(x, w1, w2)

    out = out_flat.reshape(N, H, W, C)
    return jnp.transpose(out, (0, 3, 1, 2))                 # NHWC -> NCHW


# ----------------------------------------------------------------------------
# Deterministic parameter init (shapes of nn.Conv2d(C, C, 3, bias=True)).
# Weights stored in HWIO layout.  Biases are kept (PyTorch parity / used by the
# reference) but the kernel does not need them.
# ----------------------------------------------------------------------------
def init_params(key, channels):
    k1, k2, k3, k4 = jax.random.split(key, 4)
    fan_in = channels * 9
    bound = 1.0 / (fan_in ** 0.5)
    shape_w = (3, 3, channels, channels)
    return {
        "w1": jax.random.uniform(k1, shape_w, jnp.float32, -bound, bound),
        "b1": jax.random.uniform(k2, (channels,), jnp.float32, -bound, bound),
        "w2": jax.random.uniform(k3, shape_w, jnp.float32, -bound, bound),
        "b2": jax.random.uniform(k4, (channels,), jnp.float32, -bound, bound),
    }


# ----------------------------------------------------------------------------
# Pure-JAX reference (correctness check only).  It DOES add the conv bias,
# which verifies that dropping it in the kernel is mathematically exact.
# ----------------------------------------------------------------------------
def _ref_forward(x_nchw, params):
    def cb(x, w_hwio, b, act):
        xpad = jnp.pad(x, ((0, 0), (0, 0), (1, 1), (1, 1)), mode="reflect")
        w_oihw = jnp.transpose(w_hwio, (3, 2, 0, 1))
        y = lax.conv_general_dilated(
            xpad, w_oihw, (1, 1), "VALID",
            dimension_numbers=("NCHW", "OIHW", "NCHW"),
        )
        y = y + b[None, :, None, None]
        mean = jnp.mean(y, axis=(2, 3), keepdims=True)
        var = jnp.var(y, axis=(2, 3), keepdims=True)
        y = (y - mean) * lax.rsqrt(var + EPS)
        if act:
            y = jnp.maximum(y, 0.0)
        return y

    y1 = cb(x_nchw, params["w1"], params["b1"], True)
    y2 = cb(y1, params["w2"], params["b2"], False)
    return x_nchw + y2


if __name__ == "__main__":
    key = jax.random.PRNGKey(0)
    k_x, k_p = jax.random.split(key)

    N, C, H, W = 2, 4, 16, 16
    x = jax.random.normal(k_x, (N, C, H, W), jnp.float32)
    params = init_params(k_p, C)

    # f32 path: tight check against the pure-JAX reference.
    out = jax.block_until_ready(residual_block_forward(x, params))
    ref = jax.block_until_ready(_ref_forward(x, params))
    assert out.shape == (N, C, H, W)
    max_err = float(jnp.max(jnp.abs(out - ref)))
    assert jnp.allclose(out, ref, atol=2e-3, rtol=2e-3), max_err

    # bf16 activation path (native MXU dtype on v6e/v7x): matmul operands in
    # bf16, accumulation / InstanceNorm / residual in f32.  Loose check only
    # (bf16 matmul rounding through two conv+IN stages).
    xb = x.astype(jnp.bfloat16)
    out_b = jax.block_until_ready(residual_block_forward(xb, params))
    assert out_b.shape == (N, C, H, W) and out_b.dtype == jnp.bfloat16
    diff_b = jnp.abs(out_b.astype(jnp.float32) - ref)
    assert bool(jnp.all(jnp.isfinite(diff_b)))
    assert float(jnp.max(diff_b)) < 0.5, float(jnp.max(diff_b))

    print("KERNEL_OK")
</pallas_src>

<mosaic_0001>
module attributes {stable_mosaic.version = 11 : i64} {
  func.func @_resblock_kernel(%arg0: i32, %arg1: memref<1x16x16x4xf32, #tpu.memory_space<vmem>>, %arg2: memref<36x4xf32, #tpu.memory_space<vmem>>, %arg3: memref<36x4xf32, #tpu.memory_space<vmem>>, %arg4: memref<1x256x4xf32, #tpu.memory_space<vmem>>, %arg5: memref<18x18x4xf32, #tpu.memory_space<vmem>>, %arg6: memref<256x36xf32, #tpu.memory_space<vmem>>) attributes {dimension_semantics = [#tpu.dimension_semantics<parallel>], iteration_bounds = array<i64: 2>, scalar_prefetch = 0 : i64, scratch_operands = 2 : i64, tpu.core_type = #tpu.core_type<tc>, window_params = [{transform_indices = @transform_0, window_bounds = array<i64: 1, 16, 16, 4>}, {pipeline_mode = #tpu.pipeline_mode<synchronous>, transform_indices = @transform_1, window_bounds = array<i64: 36, 4>}, {pipeline_mode = #tpu.pipeline_mode<synchronous>, transform_indices = @transform_2, window_bounds = array<i64: 36, 4>}, {transform_indices = @transform_3, window_bounds = array<i64: 1, 256, 4>}]} {
    %c0 = arith.constant 0 : index
    %c0_0 = arith.constant 0 : index
    %c0_1 = arith.constant 0 : index
    %c0_2 = arith.constant 0 : index
    %0 = vector.load %arg1[%c0, %c0_0, %c0_1, %c0_2] : memref<1x16x16x4xf32, #tpu.memory_space<vmem>>, vector<1x16x16x4xf32>
    %1 = vector.shape_cast %0 : vector<1x16x16x4xf32> to vector<16x16x4xf32>
    %c1 = arith.constant 1 : index
    %c1_3 = arith.constant 1 : index
    %c0_4 = arith.constant 0 : index
    %2 = vector.load %arg5[%c1, %c1_3, %c0_4] : memref<18x18x4xf32, #tpu.memory_space<vmem>>, vector<16x16x4xf32>
    tpu.vector_store %arg5[%c1, %c1_3, %c0_4], %1 {strides = array<i32>} : memref<18x18x4xf32, #tpu.memory_space<vmem>>, vector<16x16x4xf32>,
    %3 = vector.extract_strided_slice %1 {offsets = [1, 0, 0], sizes = [1, 16, 4], strides = [1, 1, 1]} : vector<16x16x4xf32> to vector<1x16x4xf32>
    %c0_5 = arith.constant 0 : index
    %c1_6 = arith.constant 1 : index
    %c0_7 = arith.constant 0 : index
    %4 = vector.load %arg5[%c0_5, %c1_6, %c0_7] : memref<18x18x4xf32, #tpu.memory_space<vmem>>, vector<1x16x4xf32>
    tpu.vector_store %arg5[%c0_5, %c1_6, %c0_7], %3 {strides = array<i32>} : memref<18x18x4xf32, #tpu.memory_space<vmem>>, vector<1x16x4xf32>,
    %5 = vector.extract_strided_slice %1 {offsets = [14, 0, 0], sizes = [1, 16, 4], strides = [1, 1, 1]} : vector<16x16x4xf32> to vector<1x16x4xf32>
    %c17 = arith.constant 17 : index
    %c1_8 = arith.constant 1 : index
    %c0_9 = arith.constant 0 : index
    %6 = vector.load %arg5[%c17, %c1_8, %c0_9] : memref<18x18x4xf32, #tpu.memory_space<vmem>>, vector<1x16x4xf32>
    tpu.vector_store %arg5[%c17, %c1_8, %c0_9], %5 {strides = array<i32>} : memref<18x18x4xf32, #tpu.memory_space<vmem>>, vector<1x16x4xf32>,
    %c0_10 = arith.constant 0 : index
    %c2 = arith.constant 2 : index
    %c0_11 = arith.constant 0 : index
    %7 = vector.load %arg5[%c0_10, %c2, %c0_11] : memref<18x18x4xf32, #tpu.memory_space<vmem>>, vector<18x1x4xf32>
    %c0_12 = arith.constant 0 : index
    %c0_13 = arith.constant 0 : index
    %c0_14 = arith.constant 0 : index
    %8 = vector.load %arg5[%c0_12, %c0_13, %c0_14] : memref<18x18x4xf32, #tpu.memory_space<vmem>>, vector<18x1x4xf32>
    tpu.vector_store %arg5[%c0_12, %c0_13, %c0_14], %7 {strides = array<i32>} : memref<18x18x4xf32, #tpu.memory_space<vmem>>, vector<18x1x4xf32>,
    %c0_15 = arith.constant 0 : index
    %c15 = arith.constant 15 : index
    %c0_16 = arith.constant 0 : index
    %9 = vector.load %arg5[%c0_15, %c15, %c0_16] : memref<18x18x4xf32, #tpu.memory_space<vmem>>, vector<18x1x4xf32>
    %c0_17 = arith.constant 0 : index
    %c17_18 = arith.constant 17 : index
    %c0_19 = arith.constant 0 : index
    %10 = vector.load %arg5[%c0_17, %c17_18, %c0_19] : memref<18x18x4xf32, #tpu.memory_space<vmem>>, vector<18x1x4xf32>
    tpu.vector_store %arg5[%c0_17, %c17_18, %c0_19], %9 {strides = array<i32>} : memref<18x18x4xf32, #tpu.memory_space<vmem>>, vector<18x1x4xf32>,
    %c0_20 = arith.constant 0 : index
    %c0_21 = arith.constant 0 : index
    %c0_22 = arith.constant 0 : index
    %11 = vector.load %arg5[%c0_20, %c0_21, %c0_22] : memref<18x18x4xf32, #tpu.memory_space<vmem>>, vector<16x16x4xf32>
    %12 = vector.shape_cast %11 : vector<16x16x4xf32> to vector<256x4xf32>
    %c0_23 = arith.constant 0 : index
    %c0_24 = arith.constant 0 : index
    %13 = vector.load %arg6[%c0_23, %c0_24] : memref<256x36xf32, #tpu.memory_space<vmem>>, vector<256x4xf32>
    tpu.vector_store %arg6[%c0_23, %c0_24], %12 {strides = array<i32>} : memref<256x36xf32, #tpu.memory_space<vmem>>, vector<256x4xf32>,
    %c0_25 = arith.constant 0 : index
    %c1_26 = arith.constant 1 : index
    %c0_27 = arith.constant 0 : index
    %14 = vector.load %arg5[%c0_25, %c1_26, %c0_27] : memref<18x18x4xf32, #tpu.memory_space<vmem>>, vector<16x16x4xf32>
    %15 = vector.shape_cast %14 : vector<16x16x4xf32> to vector<256x4xf32>
    %c0_28 = arith.constant 0 : index
    %c4 = arith.constant 4 : index
    %16 = vector.load %arg6[%c0_28, %c4] : memref<256x36xf32, #tpu.memory_space<vmem>>, vector<256x4xf32>
    tpu.vector_store %arg6[%c0_28, %c4], %15 {strides = array<i32>} : memref<256x36xf32, #tpu.memory_space<vmem>>, vector<256x4xf32>,
    %c0_29 = arith.constant 0 : index
    %c2_30 = arith.constant 2 : index
    %c0_31 = arith.constant 0 : index
    %17 = vector.load %arg5[%c0_29, %c2_30, %c0_31] : memref<18x18x4xf32, #tpu.memory_space<vmem>>, vector<16x16x4xf32>
    %18 = vector.shape_cast %17 : vector<16x16x4xf32> to vector<256x4xf32>
    %c0_32 = arith.constant 0 : index
    %c8 = arith.constant 8 : index
    %19 = vector.load %arg6[%c0_32, %c8] : memref<256x36xf32, #tpu.memory_space<vmem>>, vector<256x4xf32>
    tpu.vector_store %arg6[%c0_32, %c8], %18 {strides = array<i32>} : memref<256x36xf32, #tpu.memory_space<vmem>>, vector<256x4xf32>,
    %c1_33 = arith.constant 1 : index
    %c0_34 = arith.constant 0 : index
    %c0_35 = arith.constant 0 : index
    %20 = vector.load %arg5[%c1_33, %c0_34, %c0_35] : memref<18x18x4xf32, #tpu.memory_space<vmem>>, vector<16x16x4xf32>
    %21 = vector.shape_cast %20 : vector<16x16x4xf32> to vector<256x4xf32>
    %c0_36 = arith.constant 0 : index
    %c12 = arith.constant 12 : index
    %22 = vector.load %arg6[%c0_36, %c12] : memref<256x36xf32, #tpu.memory_space<vmem>>, vector<256x4xf32>
    tpu.vector_store %arg6[%c0_36, %c12], %21 {strides = array<i32>} : memref<256x36xf32, #tpu.memory_space<vmem>>, vector<256x4xf32>,
    %c1_37 = arith.constant 1 : index
    %c1_38 = arith.constant 1 : index
    %c0_39 = arith.constant 0 : index
    %23 = vector.load %arg5[%c1_37, %c1_38, %c0_39] : memref<18x18x4xf32, #tpu.memory_space<vmem>>, vector<16x16x4xf32>
    %24 = vector.shape_cast %23 : vector<16x16x4xf32> to vector<256x4xf32>
    %c0_40 = arith.constant 0 : index
    %c16 = arith.constant 16 : index
    %25 = vector.load %arg6[%c0_40, %c16] : memref<256x36xf32, #tpu.memory_space<vmem>>, vector<256x4xf32>
    tpu.vector_store %arg6[%c0_40, %c16], %24 {strides = array<i32>} : memref<256x36xf32, #tpu.memory_space<vmem>>, vector<256x4xf32>,
    %c1_41 = arith.constant 1 : index
    %c2_42 = arith.constant 2 : index
    %c0_43 = arith.constant 0 : index
    %26 = vector.load %arg5[%c1_41, %c2_42, %c0_43] : memref<18x18x4xf32, #tpu.memory_space<vmem>>, vector<16x16x4xf32>
    %27 = vector.shape_cast %26 : vector<16x16x4xf32> to vector<256x4xf32>
    %c0_44 = arith.constant 0 : index
    %c20 = arith.constant 20 : index
    %28 = vector.load %arg6[%c0_44, %c20] : memref<256x36xf32, #tpu.memory_space<vmem>>, vector<256x4xf32>
    tpu.vector_store %arg6[%c0_44, %c20], %27 {strides = array<i32>} : memref<256x36xf32, #tpu.memory_space<vmem>>, vector<256x4xf32>,
    %c2_45 = arith.constant 2 : index
    %c0_46 = arith.constant 0 : index
    %c0_47 = arith.constant 0 : index
    %29 = vector.load %arg5[%c2_45, %c0_46, %c0_47] : memref<18x18x4xf32, #tpu.memory_space<vmem>>, vector<16x16x4xf32>
    %30 = vector.shape_cast %29 : vector<16x16x4xf32> to vector<256x4xf32>
    %c0_48 = arith.constant 0 : index
    %c24 = arith.constant 24 : index
    %31 = vector.load %arg6[%c0_48, %c24] : memref<256x36xf32, #tpu.memory_space<vmem>>, vector<256x4xf32>
    tpu.vector_store %arg6[%c0_48, %c24], %30 {strides = array<i32>} : memref<256x36xf32, #tpu.memory_space<vmem>>, vector<256x4xf32>,
    %c2_49 = arith.constant 2 : index
    %c1_50 = arith.constant 1 : index
    %c0_51 = arith.constant 0 : index
    %32 = vector.load %arg5[%c2_49, %c1_50, %c0_51] : memref<18x18x4xf32, #tpu.memory_space<vmem>>, vector<16x16x4xf32>
    %33 = vector.shape_cast %32 : vector<16x16x4xf32> to vector<256x4xf32>
    %c0_52 = arith.constant 0 : index
    %c28 = arith.constant 28 : index
    %34 = vector.load %arg6[%c0_52, %c28] : memref<256x36xf32, #tpu.memory_space<vmem>>, vector<256x4xf32>
    tpu.vector_store %arg6[%c0_52, %c28], %33 {strides = array<i32>} : memref<256x36xf32, #tpu.memory_space<vmem>>, vector<256x4xf32>,
    %c2_53 = arith.constant 2 : index
    %c2_54 = arith.constant 2 : index
    %c0_55 = arith.constant 0 : index
    %35 = vector.load %arg5[%c2_53, %c2_54, %c0_55] : memref<18x18x4xf32, #tpu.memory_space<vmem>>, vector<16x16x4xf32>
    %36 = vector.shape_cast %35 : vector<16x16x4xf32> to vector<256x4xf32>
    %c0_56 = arith.constant 0 : index
    %c32 = arith.constant 32 : index
    %37 = vector.load %arg6[%c0_56, %c32] : memref<256x36xf32, #tpu.memory_space<vmem>>, vector<256x4xf32>
    tpu.vector_store %arg6[%c0_56, %c32], %36 {strides = array<i32>} : memref<256x36xf32, #tpu.memory_space<vmem>>, vector<256x4xf32>,
    %c0_57 = arith.constant 0 : index
    %c0_58 = arith.constant 0 : index
    %38 = vector.load %arg6[%c0_57, %c0_58] : memref<256x36xf32, #tpu.memory_space<vmem>>, vector<256x36xf32>
    %c0_59 = arith.constant 0 : index
    %c0_60 = arith.constant 0 : index
    %39 = vector.load %arg2[%c0_59, %c0_60] : memref<36x4xf32, #tpu.memory_space<vmem>>, vector<36x4xf32>
    %cst = arith.constant dense<0.000000e+00> : vector<256x4xf32>
    %40 = tpu.matmul %38, %39, %cst {dimension_numbers = #tpu.dot_dimension_numbers<[1], [0], [0], [1], [0, 0, 1, 1], [], []>} : vector<256x36xf32>, vector<36x4xf32>, vector<256x4xf32> -> vector<256x4xf32>
    %cst_61 = arith.constant dense<0.000000e+00> : vector<4xf32>
    %41 = vector.multi_reduction <add>, %40, %cst_61 [0] : vector<256x4xf32> to vector<4xf32>
    %42 = vector.shape_cast %41 : vector<4xf32> to vector<1x4xf32>
    %43 = arith.mulf %40, %40 : vector<256x4xf32>
    %cst_62 = arith.constant dense<0.000000e+00> : vector<4xf32>
    %44 = vector.multi_reduction <add>, %43, %cst_62 [0] : vector<256x4xf32> to vector<4xf32>
    %45 = vector.shape_cast %44 : vector<4xf32> to vector<1x4xf32>
    %cst_63 = arith.constant 3.906250e-03 : f32
    %46 = vector.broadcast %cst_63 : f32 to vector<1x4xf32>
    %47 = arith.mulf %42, %46 : vector<1x4xf32>
    %cst_64 = arith.constant 3.906250e-03 : f32
    %48 = vector.broadcast %cst_64 : f32 to vector<1x4xf32>
    %49 = arith.mulf %45, %48 : vector<1x4xf32>
    %50 = arith.mulf %47, %47 : vector<1x4xf32>
    %51 = arith.subf %49, %50 : vector<1x4xf32>
    %52 = vector.broadcast %47 : vector<1x4xf32> to vector<256x4xf32>
    %53 = arith.subf %40, %52 : vector<256x4xf32>
    %cst_65 = arith.constant 9.99999974E-6 : f32
    %54 = vector.broadcast %cst_65 : f32 to vector<1x4xf32>
    %55 = arith.addf %51, %54 : vector<1x4xf32>
    %56 = math.rsqrt %55 : vector<1x4xf32>
    %57 = vector.broadcast %56 : vector<1x4xf32> to vector<256x4xf32>
    %58 = arith.mulf %53, %57 : vector<256x4xf32>
    %cst_66 = arith.constant 0.000000e+00 : f32
    %59 = vector.broadcast %cst_66 : f32 to vector<256x4xf32>
    %60 = arith.maximumf %58, %59 : vector<256x4xf32>
    %61 = vector.shape_cast %60 : vector<256x4xf32> to vector<16x16x4xf32>
    %c1_67 = arith.constant 1 : index
    %c1_68 = arith.constant 1 : index
    %c0_69 = arith.constant 0 : index
    %62 = vector.load %arg5[%c1_67, %c1_68, %c0_69] : memref<18x18x4xf32, #tpu.memory_space<vmem>>, vector<16x16x4xf32>
    tpu.vector_store %arg5[%c1_67, %c1_68, %c0_69], %61 {strides = array<i32>} : memref<18x18x4xf32, #tpu.memory_space<vmem>>, vector<16x16x4xf32>,
    %63 = vector.extract_strided_slice %61 {offsets = [1, 0, 0], sizes = [1, 16, 4], strides = [1, 1, 1]} : vector<16x16x4xf32> to vector<1x16x4xf32>
    %c0_70 = arith.constant 0 : index
    %c1_71 = arith.constant 1 : index
    %c0_72 = arith.constant 0 : index
    %64 = vector.load %arg5[%c0_70, %c1_71, %c0_72] : memref<18x18x4xf32, #tpu.memory_space<vmem>>, vector<1x16x4xf32>
    tpu.vector_store %arg5[%c0_70, %c1_71, %c0_72], %63 {strides = array<i32>} : memref<18x18x4xf32, #tpu.memory_space<vmem>>, vector<1x16x4xf32>,
    %65 = vector.extract_strided_slice %61 {offsets = [14, 0, 0], sizes = [1, 16, 4], strides = [1, 1, 1]} : vector<16x16x4xf32> to vector<1x16x4xf32>
    %c17_73 = arith.constant 17 : index
    %c1_74 = arith.constant 1 : index
    %c0_75 = arith.constant 0 : index
    %66 = vector.load %arg5[%c17_73, %c1_74, %c0_75] : memref<18x18x4xf32, #tpu.memory_space<vmem>>, vector<1x16x4xf32>
    tpu.vector_store %arg5[%c17_73, %c1_74, %c0_75], %65 {strides = array<i32>} : memref<18x18x4xf32, #tpu.memory_space<vmem>>, vector<1x16x4xf32>,
    %c0_76 = arith.constant 0 : index
    %c2_77 = arith.constant 2 : index
    %c0_78 = arith.constant 0 : index
    %67 = vector.load %arg5[%c0_76, %c2_77, %c0_78] : memref<18x18x4xf32, #tpu.memory_space<vmem>>, vector<18x1x4xf32>
    %c0_79 = arith.constant 0 : index
    %c0_80 = arith.constant 0 : index
    %c0_81 = arith.constant 0 : index
    %68 = vector.load %arg5[%c0_79, %c0_80, %c0_81] : memref<18x18x4xf32, #tpu.memory_space<vmem>>, vector<18x1x4xf32>
    tpu.vector_store %arg5[%c0_79, %c0_80, %c0_81], %67 {strides = array<i32>} : memref<18x18x4xf32, #tpu.memory_space<vmem>>, vector<18x1x4xf32>,
    %c0_82 = arith.constant 0 : index
    %c15_83 = arith.constant 15 : index
    %c0_84 = arith.constant 0 : index
    %69 = vector.load %arg5[%c0_82, %c15_83, %c0_84] : memref<18x18x4xf32, #tpu.memory_space<vmem>>, vector<18x1x4xf32>
    %c0_85 = arith.constant 0 : index
    %c17_86 = arith.constant 17 : index
    %c0_87 = arith.constant 0 : index
    %70 = vector.load %arg5[%c0_85, %c17_86, %c0_87] : memref<18x18x4xf32, #tpu.memory_space<vmem>>, vector<18x1x4xf32>
    tpu.vector_store %arg5[%c0_85, %c17_86, %c0_87], %69 {strides = array<i32>} : memref<18x18x4xf32, #tpu.memory_space<vmem>>, vector<18x1x4xf32>,
    %c0_88 = arith.constant 0 : index
    %c0_89 = arith.constant 0 : index
    %c0_90 = arith.constant 0 : index
    %71 = vector.load %arg5[%c0_88, %c0_89, %c0_90] : memref<18x18x4xf32, #tpu.memory_space<vmem>>, vector<16x16x4xf32>
    %72 = vector.shape_cast %71 : vector<16x16x4xf32> to vector<256x4xf32>
    %c0_91 = arith.constant 0 : index
    %c0_92 = arith.constant 0 : index
    %73 = vector.load %arg6[%c0_91, %c0_92] : memref<256x36xf32, #tpu.memory_space<vmem>>, vector<256x4xf32>
    tpu.vector_store %arg6[%c0_91, %c0_92], %72 {strides = array<i32>} : memref<256x36xf32, #tpu.memory_space<vmem>>, vector<256x4xf32>,
    %c0_93 = arith.constant 0 : index
    %c1_94 = arith.constant 1 : index
    %c0_95 = arith.constant 0 : index
    %74 = vector.load %arg5[%c0_93, %c1_94, %c0_95] : memref<18x18x4xf32, #tpu.memory_space<vmem>>, vector<16x16x4xf32>
    %75 = vector.shape_cast %74 : vector<16x16x4xf32> to vector<256x4xf32>
    %c0_96 = arith.constant 0 : index
    %c4_97 = arith.constant 4 : index
    %76 = vector.load %arg6[%c0_96, %c4_97] : memref<256x36xf32, #tpu.memory_space<vmem>>, vector<256x4xf32>
    tpu.vector_store %arg6[%c0_96, %c4_97], %75 {strides = array<i32>} : memref<256x36xf32, #tpu.memory_space<vmem>>, vector<256x4xf32>,
    %c0_98 = arith.constant 0 : index
    %c2_99 = arith.constant 2 : index
    %c0_100 = arith.constant 0 : index
    %77 = vector.load %arg5[%c0_98, %c2_99, %c0_100] : memref<18x18x4xf32, #tpu.memory_space<vmem>>, vector<16x16x4xf32>
    %78 = vector.shape_cast %77 : vector<16x16x4xf32> to vector<256x4xf32>
    %c0_101 = arith.constant 0 : index
    %c8_102 = arith.constant 8 : index
    %79 = vector.load %arg6[%c0_101, %c8_102] : memref<256x36xf32, #tpu.memory_space<vmem>>, vector<256x4xf32>
    tpu.vector_store %arg6[%c0_101, %c8_102], %78 {strides = array<i32>} : memref<256x36xf32, #tpu.memory_space<vmem>>, vector<256x4xf32>,
    %c1_103 = arith.constant 1 : index
    %c0_104 = arith.constant 0 : index
    %c0_105 = arith.constant 0 : index
    %80 = vector.load %arg5[%c1_103, %c0_104, %c0_105] : memref<18x18x4xf32, #tpu.memory_space<vmem>>, vector<16x16x4xf32>
    %81 = vector.shape_cast %80 : vector<16x16x4xf32> to vector<256x4xf32>
    %c0_106 = arith.constant 0 : index
    %c12_107 = arith.constant 12 : index
    %82 = vector.load %arg6[%c0_106, %c12_107] : memref<256x36xf32, #tpu.memory_space<vmem>>, vector<256x4xf32>
    tpu.vector_store %arg6[%c0_106, %c12_107], %81 {strides = array<i32>} : memref<256x36xf32, #tpu.memory_space<vmem>>, vector<256x4xf32>,
    %c1_108 = arith.constant 1 : index
    %c1_109 = arith.constant 1 : index
    %c0_110 = arith.constant 0 : index
    %83 = vector.load %arg5[%c1_108, %c1_109, %c0_110] : memref<18x18x4xf32, #tpu.memory_space<vmem>>, vector<16x16x4xf32>
    %84 = vector.shape_cast %83 : vector<16x16x4xf32> to vector<256x4xf32>
    %c0_111 = arith.constant 0 : index
    %c16_112 = arith.constant 16 : index
    %85 = vector.load %arg6[%c0_111, %c16_112] : memref<256x36xf32, #tpu.memory_space<vmem>>, vector<256x4xf32>
    tpu.vector_store %arg6[%c0_111, %c16_112], %84 {strides = array<i32>} : memref<256x36xf32, #tpu.memory_space<vmem>>, vector<256x4xf32>,
    %c1_113 = arith.constant 1 : index
    %c2_114 = arith.constant 2 : index
    %c0_115 = arith.constant 0 : index
    %86 = vector.load %arg5[%c1_113, %c2_114, %c0_115] : memref<18x18x4xf32, #tpu.memory_space<vmem>>, vector<16x16x4xf32>
    %87 = vector.shape_cast %86 : vector<16x16x4xf32> to vector<256x4xf32>
    %c0_116 = arith.constant 0 : index
    %c20_117 = arith.constant 20 : index
    %88 = vector.load %arg6[%c0_116, %c20_117] : memref<256x36xf32, #tpu.memory_space<vmem>>, vector<256x4xf32>
    tpu.vector_store %arg6[%c0_116, %c20_117], %87 {strides = array<i32>} : memref<256x36xf32, #tpu.memory_space<vmem>>, vector<256x4xf32>,
    %c2_118 = arith.constant 2 : index
    %c0_119 = arith.constant 0 : index
    %c0_120 = arith.constant 0 : index
    %89 = vector.load %arg5[%c2_118, %c0_119, %c0_120] : memref<18x18x4xf32, #tpu.memory_space<vmem>>, vector<16x16x4xf32>
    %90 = vector.shape_cast %89 : vector<16x16x4xf32> to vector<256x4xf32>
    %c0_121 = arith.constant 0 : index
    %c24_122 = arith.constant 24 : index
    %91 = vector.load %arg6[%c0_121, %c24_122] : memref<256x36xf32, #tpu.memory_space<vmem>>, vector<256x4xf32>
    tpu.vector_store %arg6[%c0_121, %c24_122], %90 {strides = array<i32>} : memref<256x36xf32, #tpu.memory_space<vmem>>, vector<256x4xf32>,
    %c2_123 = arith.constant 2 : index
    %c1_124 = arith.constant 1 : index
    %c0_125 = arith.constant 0 : index
    %92 = vector.load %arg5[%c2_123, %c1_124, %c0_125] : memref<18x18x4xf32, #tpu.memory_space<vmem>>, vector<16x16x4xf32>
    %93 = vector.shape_cast %92 : vector<16x16x4xf32> to vector<256x4xf32>
    %c0_126 = arith.constant 0 : index
    %c28_127 = arith.constant 28 : index
    %94 = vector.load %arg6[%c0_126, %c28_127] : memref<256x36xf32, #tpu.memory_space<vmem>>, vector<256x4xf32>
    tpu.vector_store %arg6[%c0_126, %c28_127], %93 {strides = array<i32>} : memref<256x36xf32, #tpu.memory_space<vmem>>, vector<256x4xf32>,
    %c2_128 = arith.constant 2 : index
    %c2_129 = arith.constant 2 : index
    %c0_130 = arith.constant 0 : index
    %95 = vector.load %arg5[%c2_128, %c2_129, %c0_130] : memref<18x18x4xf32, #tpu.memory_space<vmem>>, vector<16x16x4xf32>
    %96 = vector.shape_cast %95 : vector<16x16x4xf32> to vector<256x4xf32>
    %c0_131 = arith.constant 0 : index
    %c32_132 = arith.constant 32 : index
    %97 = vector.load %arg6[%c0_131, %c32_132] : memref<256x36xf32, #tpu.memory_space<vmem>>, vector<256x4xf32>
    tpu.vector_store %arg6[%c0_131, %c32_132], %96 {strides = array<i32>} : memref<256x36xf32, #tpu.memory_space<vmem>>, vector<256x4xf32>,
    %c0_133 = arith.constant 0 : index
    %c0_134 = arith.constant 0 : index
    %98 = vector.load %arg6[%c0_133, %c0_134] : memref<256x36xf32, #tpu.memory_space<vmem>>, vector<256x36xf32>
    %c0_135 = arith.constant 0 : index
    %c0_136 = arith.constant 0 : index
    %99 = vector.load %arg3[%c0_135, %c0_136] : memref<36x4xf32, #tpu.memory_space<vmem>>, vector<36x4xf32>
    %cst_137 = arith.constant dense<0.000000e+00> : vector<256x4xf32>
    %100 = tpu.matmul %98, %99, %cst_137 {dimension_numbers = #tpu.dot_dimension_numbers<[1], [0], [0], [1], [0, 0, 1, 1], [], []>} : vector<256x36xf32>, vector<36x4xf32>, vector<256x4xf32> -> vector<256x4xf32>
    %cst_138 = arith.constant dense<0.000000e+00> : vector<4xf32>
    %101 = vector.multi_reduction <add>, %100, %cst_138 [0] : vector<256x4xf32> to vector<4xf32>
    %102 = vector.shape_cast %101 : vector<4xf32> to vector<1x4xf32>
    %103 = arith.mulf %100, %100 : vector<256x4xf32>
    %cst_139 = arith.constant dense<0.000000e+00> : vector<4xf32>
    %104 = vector.multi_reduction <add>, %103, %cst_139 [0] : vector<256x4xf32> to vector<4xf32>
    %105 = vector.shape_cast %104 : vector<4xf32> to vector<1x4xf32>
    %cst_140 = arith.constant 3.906250e-03 : f32
    %106 = vector.broadcast %cst_140 : f32 to vector<1x4xf32>
    %107 = arith.mulf %102, %106 : vector<1x4xf32>
    %cst_141 = arith.constant 3.906250e-03 : f32
    %108 = vector.broadcast %cst_141 : f32 to vector<1x4xf32>
    %109 = arith.mulf %105, %108 : vector<1x4xf32>
    %110 = arith.mulf %107, %107 : vector<1x4xf32>
    %111 = arith.subf %109, %110 : vector<1x4xf32>
    %112 = vector.broadcast %107 : vector<1x4xf32> to vector<256x4xf32>
    %113 = arith.subf %100, %112 : vector<256x4xf32>
    %cst_142 = arith.constant 9.99999974E-6 : f32
    %114 = vector.broadcast %cst_142 : f32 to vector<1x4xf32>
    %115 = arith.addf %111, %114 : vector<1x4xf32>
    %116 = math.rsqrt %115 : vector<1x4xf32>
    %117 = vector.broadcast %116 : vector<1x4xf32> to vector<256x4xf32>
    %118 = arith.mulf %113, %117 : vector<256x4xf32>
    %119 = vector.shape_cast %1 : vector<16x16x4xf32> to vector<256x4xf32>
    %120 = arith.addf %118, %119 : vector<256x4xf32>
    %c0_143 = arith.constant 0 : index
    %c0_144 = arith.constant 0 : index
    %c0_145 = arith.constant 0 : index
    %121 = vector.load %arg4[%c0_143, %c0_144, %c0_145] : memref<1x256x4xf32, #tpu.memory_space<vmem>>, vector<1x256x4xf32>
    %122 = vector.shape_cast %121 : vector<1x256x4xf32> to vector<256x4xf32>
    %123 = vector.shape_cast %120 : vector<256x4xf32> to vector<1x256x4xf32>
    tpu.vector_store %arg4[%c0_143, %c0_144, %c0_145], %123 {strides = array<i32>} : memref<1x256x4xf32, #tpu.memory_space<vmem>>, vector<1x256x4xf32>,
    return
  }
  func.func @transform_0(%arg0: i32) -> (i32, i32, i32, i32) {
    %c0_i32 = arith.constant 0 : i32
    %c0_i32_0 = arith.constant 0 : i32
    %c0_i32_1 = arith.constant 0 : i32
    %c0_i32_2 = arith.constant 0 : i32
    return %arg0, %c0_i32, %c0_i32_0, %c0_i32_1 : i32, i32, i32, i32
  }
  func.func @transform_1(%arg0: i32) -> (i32, i32) {
    %c0_i32 = arith.constant 0 : i32
    %c0_i32_0 = arith.constant 0 : i32
    %c0_i32_1 = arith.constant 0 : i32
    return %c0_i32, %c0_i32_0 : i32, i32
  }
  func.func @transform_2(%arg0: i32) -> (i32, i32) {
    %c0_i32 = arith.constant 0 : i32
    %c0_i32_0 = arith.constant 0 : i32
    %c0_i32_1 = arith.constant 0 : i32
    return %c0_i32, %c0_i32_0 : i32, i32
  }
  func.func @transform_3(%arg0: i32) -> (i32, i32, i32) {
    %c0_i32 = arith.constant 0 : i32
    %c0_i32_0 = arith.constant 0 : i32
    %c0_i32_1 = arith.constant 0 : i32
    return %arg0, %c0_i32, %c0_i32_0 : i32, i32, i32
  }
}

</mosaic_0001>

<bundles_post_ra>
// kernel: tpu_custom_call.1
= control target key start
LH: loop header
LB: loop body
LE: loop exit
PB: predicated region body
PF: predicated region fallthrough
CT: control target
= control target key end

     0   :  { %s4926_s12 = smov 0   ;;  %s7838_s0 = inlined_call_operand.vmem [shape: f32[2,16,16,4], index: 0, kind: input, shape index: {}]   ;;  %s7839_s1 = inlined_call_operand.vmem [shape: f32[36,4], index: 1, kind: input, shape index: {}]   ;;  %s7840_s2 = inlined_call_operand.vmem [shape: f32[36,4], index: 2, kind: input, shape index: {}]   ;;  %s7841_s3 = inlined_call_operand.vmem [shape: f32[2,256,4], index: 3, kind: output, shape index: {}]  }
   0x1 LB: > { %s4781_s13 = sadd.s32 4294967295, %s4896_s12   ;;  %p4785_p0 = scmp.ge.s32.totalorder %s4896_s12, 1  ;;  %s4896_s12 = sphi %s4926_s12, %s13_s12  }
   0x2   : > { %p137_p1 = scmp.lt.s32.totalorder %s4896_s12, 3 }
   0x4   : > { %p138_p2 = pnand %p4785_p0, %p137_p1 }
   0x6   : > { %141 = sbr.rel (%p138_p2) target bundleno = 2110 (0x83e), region = 32 }
   0xb   : > { %p161_p3 = scmp.lt.s32.totalorder %s4781_s13, 1  ;;  %vm204_vm0 = vcmask 31744   ;;  %s4898_s18 = smov 4   ;;  %vm260_vm1 = vcmask 24576   ;;  %vm539_vm2 = vcmask 64544   ;;  %vm732_vm3 = vcmask 97344  }
   0xc   : > { %s4899_s19 = smov 8   ;;  %s4900_s20 = smov 12   ;;  %vm925_vm4 = vcmask 130144   ;;  %vm1118_vm5 = vcmask 162944   ;;  %vm1311_vm6 = vcmask 195744   ;;  %vm1505_vm7 = vcmask 228544  }
   0xd   : > { %s7999_s13 = smov (!%p161_p3, %s4781_s13), 1  ;;  %s4901_s21 = smov 16   ;;  %vm1698_vm8 = vcmask 261344   ;;  %vm2058_vm9 = vcmask 1043456   ;;  %vm1891_vm10 = vcmask 294144   ;;  %vm1961_vm11 = vcmask 293888  }
   0xe   : > { %s4858_s14 = sshll.u32 %s7999_s13, 8  ;;  %s4902_s22 = smov 20  }
   0xf   : > { %s4942_s17 = scalar_lea.vmem %s7838_s0, %s4858_s14  ;;  %s4903_s23 = smov 24  }
  0x10   : > { %v4945_v0 = vld [vmem:[%s4942_s17 + $0x10] sm:$0xff]  ;;  %v4948_v1 = vld [vmem:[%s4942_s17 + $0x18] sm:$0xff]  ;;  %v4955_v2 = vld [vmem:[%s4942_s17] sm:$0xff]  ;;  %s4904_s24 = smov 28   ;;  %s4905_s25 = smov 32  }
  0x11   : > { %7896 = vst [vmem:[#allocation4_spill] sm:$0xff] %v4945_v0  ;;  %v4960_v3 = vld [vmem:[%s4942_s17 + $0x20] sm:$0xff]  ;;  %v4965_v4 = vld [vmem:[%s4942_s17 + $0x8] sm:$0xff]  ;;  %v4970_v5 = vld [vmem:[%s4942_s17 + $0x38] sm:$0xff] }
  0x12   : > { %7897 = vst [vmem:[#allocation5_spill] sm:$0xff] %v4948_v1  ;;  %v4975_v6 = vld [vmem:[%s4942_s17 + $0x28] sm:$0xff]  ;;  %v4980_v7 = vld [vmem:[%s4942_s17 + $0x50] sm:$0xff]  ;;  %v4985_v9 = vld [vmem:[%s4942_s17 + $0x40] sm:$0xff] }
  0x13   : > { %237 = vst.msk [vmem:[#allocation2 + $0x1] sm:$0xff] %vm204_vm0, %v4945_v0  ;;  %v4993_v11 = vld [vmem:[%s4942_s17 + $0x68] sm:$0xff]  ;;  %v5000_v12 = vld [vmem:[%s4942_s17 + $0x30] sm:$0xff]  ;;  %v5005_v13 = vld [vmem:[%s4942_s17 + $0x58] sm:$0xff] }
  0x14   : > { %207 = vst.msk [vmem:[#allocation2 + $0x31] sm:$0xff] %vm204_vm0, %v4945_v0  ;;  %v5020_v17 = vld [vmem:[%s4942_s17 + $0x80] sm:$0xff]  ;;  %v5023_v18 = vld [vmem:[%s4942_s17 + $0x48] sm:$0xff]  ;;  %v5029_v19 = vld [vmem:[%s4942_s17 + $0x70] sm:$0xff] }
  0x15   : > { %7898 = vst [vmem:[#allocation6_spill] sm:$0xff] %v4955_v2  ;;  %v5046_v23 = vld [vmem:[%s4942_s17 + $0x98] sm:$0xff]  ;;  %v5049_v24 = vld [vmem:[%s4942_s17 + $0x60] sm:$0xff]  ;;  %v5056_v25 = vld [vmem:[%s4942_s17 + $0x88] sm:$0xff] }
  0x16   : > { %238 = vst.msk [vmem:[#allocation2 + $0x9] sm:$0xff] %vm204_vm0, %v4948_v1  ;;  %v5070_v29 = vld [vmem:[%s4942_s17 + $0xb0] sm:$0xff]  ;;  %v5073_v30 = vld [vmem:[%s4942_s17 + $0x78] sm:$0xff]  ;;  %v5080_v31 = vld [vmem:[%s4942_s17 + $0xa0] sm:$0xff] }
  0x17   : > { %7899 = vst [vmem:[#allocation7_spill] sm:$0xff] %v4960_v3  ;;  %v5092_v35 = vld [vmem:[%s4942_s17 + $0xc8] sm:$0xff]  ;;  %v5095_v36 = vld [vmem:[%s4942_s17 + $0x90] sm:$0xff]  ;;  %v5101_v37 = vld [vmem:[%s4942_s17 + $0xb8] sm:$0xff] }
  0x18   : > { %208 = vst.msk [vmem:[#allocation2 + $0x39] sm:$0xff] %vm204_vm0, %v4948_v1  ;;  %v5113_v41 = vld [vmem:[%s4942_s17 + $0xe0] sm:$0xff]  ;;  %v5116_v42 = vld [vmem:[%s4942_s17 + $0xa8] sm:$0xff]  ;;  %v5122_v43 = vld [vmem:[%s4942_s17 + $0xd0] sm:$0xff] }
  0x19   : > { %7900 = vst [vmem:[#allocation8_spill] sm:$0xff] %v4965_v4  ;;  %v5136_v48 = vld [vmem:[%s4942_s17 + $0xc0] sm:$0xff]  ;;  %v5141_v49 = vld [vmem:[%s4942_s17 + $0xe8] sm:$0xff]  ;;  %v5155_v53 = vld [vmem:[%s4942_s17 + $0xd8] sm:$0xff] }
  0x1a   : > { %205 = vst.msk [vmem:[#allocation2 + $0x19] sm:$0xff] %vm204_vm0, %v4955_v2  ;;  %v379_v8 = vld [vmem:[#allocation2 + $0x1] sm:$0xff] }
  0x1b   : > { %7901 = vst [vmem:[#allocation9_spill] sm:$0xff] %v4970_v5  ;;  %443 = vrot.lane.b32.xlu0 %v379_v8, %s4898_s18  ;;  %v4988_v10 = vld [vmem:[#allocation2 + $0x31] sm:$0xff]  ;;  %v242_v8 = vld [vmem:[#allocation2 + $0x2] sm:$0x1] }
  0x1c   : > { %209 = vst.msk [vmem:[#allocation2 + $0x49] sm:$0xff] %vm204_vm0, %v4960_v3  ;;  %451 = vrot.lane.b32.xlu2 %v4988_v10, %s4898_s18 }
  0x1d   : > { %7902 = vst [vmem:[#allocation10_spill] sm:$0xff] %v4975_v6  ;;  %v380_v15 = vld [vmem:[#allocation2 + $0x9] sm:$0xff] }
  0x1e   : > { %206 = vst.msk [vmem:[#allocation2 + $0x21] sm:$0xff] %vm204_vm0, %v4965_v4  ;;  %v279_v47 = vld [vmem:[#allocation2 + $0xf] sm:$0x1] }
  0x1f   : > { %7903 = vst [vmem:[#allocation11_spill] sm:$0xff] %v4980_v7  ;;  %v5017_v16 = vld [vmem:[#allocation2 + $0x39] sm:$0xff] }
  0x20   : > { %212 = vst.msk [vmem:[#allocation2 + $0x69] sm:$0xff] %vm204_vm0, %v4970_v5  ;;  %v281_v58 = vld [vmem:[#allocation2 + $0x3f] sm:$0x1] }
  0x21   : > { %7904 = vst [vmem:[#allocation12_spill] sm:$0xff] %v4985_v9  ;;  %v5007_v14 = vld [vmem:[#allocation2 + $0x19] sm:$0xff] }
  0x22   : > { %210 = vst.msk [vmem:[#allocation2 + $0x51] sm:$0xff] %vm204_vm0, %v4975_v6  ;;  %447 = vrot.lane.b32.xlu1 %v5007_v14, %s4898_s18 }
  0x23   : > { %7905 = vst [vmem:[#allocation13_spill] sm:$0xff] %v4993_v11  ;;  %445 = vrot.lane.b32.xlu0 %v380_v15, %s4898_s18  ;;  %v5041_v21 = vld [vmem:[#allocation2 + $0x49] sm:$0xff] }
  0x24   : > { %215 = vst.msk [vmem:[#allocation2 + $0x91] sm:$0xff] %vm204_vm0, %v4980_v7  ;;  %453 = vrot.lane.b32.xlu2 %v5017_v16, %s4898_s18 }
  0x25   : > { %7906 = vst [vmem:[#allocation14_spill] sm:$0xff] %v5000_v12  ;;  %v5031_v20 = vld [vmem:[#allocation2 + $0x21] sm:$0xff] }
  0x26   : > { %213 = vst.msk [vmem:[#allocation2 + $0x79] sm:$0xff] %vm204_vm0, %v4985_v9  ;;  %v280_v62 = vld [vmem:[#allocation2 + $0x27] sm:$0x1] }
  0x27   : > { %7907 = vst [vmem:[#allocation15_spill] sm:$0xff] %v5005_v13  ;;  %v5065_v27 = vld [vmem:[#allocation2 + $0x69] sm:$0xff] }
  0x28   : > { %218 = vst.msk [vmem:[#allocation2 + $0xb1] sm:$0xff] %vm204_vm0, %v4993_v11 }
  0x29   : > { %211 = vst.msk [vmem:[#allocation2 + $0x61] sm:$0xff] %vm204_vm0, %v5000_v12  ;;  %v386_v26 = vld [vmem:[#allocation2 + $0x51] sm:$0xff] }
  0x2a   : > { %216 = vst.msk [vmem:[#allocation2 + $0x99] sm:$0xff] %vm204_vm0, %v5005_v13  ;;  %449 = vrot.lane.b32.xlu1 %v5031_v20, %s4898_s18  ;;  %v282_v57 = vld [vmem:[#allocation2 + $0x57] sm:$0x1] }
  0x2b   : > { %7908 = vst [vmem:[#allocation16_spill] sm:$0xff] %v5020_v17  ;;  %455 = vrot.lane.b32.xlu0 %v5041_v21, %s4898_s18  ;;  %v391_v33 = vld [vmem:[#allocation2 + $0x91] sm:$0xff] }
  0x2c   : > { %7909 = vst [vmem:[#allocation17_spill] sm:$0xff] %v5023_v18 }
  0x2d   : > { %221 = vst.msk [vmem:[#allocation2 + $0xd9] sm:$0xff] %vm204_vm0, %v5020_v17  ;;  %v389_v32 = vld [vmem:[#allocation2 + $0x79] sm:$0xff] }
  0x2e   : > { %7910 = vst [vmem:[#allocation18_spill] sm:$0xff] %v5029_v19 }
  0x2f   : > { %214 = vst.msk [vmem:[#allocation2 + $0x81] sm:$0xff] %vm204_vm0, %v5023_v18  ;;  %v394_v39 = vld [vmem:[#allocation2 + $0xb1] sm:$0xff] }
  0x30   : > { %219 = vst.msk [vmem:[#allocation2 + $0xc1] sm:$0xff] %vm204_vm0, %v5029_v19  ;;  %v5043_v22 = vld [vmem:[#allocation2 + $0x61] sm:$0xff] }
  0x31   : > { %7911 = vst [vmem:[#allocation19_spill] sm:$0xff] %v5046_v23  ;;  %459 = vrot.lane.b32.xlu2 %v5043_v22, %s4898_s18  ;;  %v392_v38 = vld [vmem:[#allocation2 + $0x99] sm:$0xff] }
  0x32   : > { %7912 = vst [vmem:[#allocation20_spill] sm:$0xff] %v5049_v24  ;;  %457 = vrot.lane.b32.xlu1 %v386_v26, %s4898_s18  ;;  %v572_v26 = vld [vmem:[#allocation2 + $0x2] sm:$0xff] }
  0x33   : > { %224 = vst.msk [vmem:[#allocation2 + $0xf9] sm:$0xff] %vm204_vm0, %v5046_v23  ;;  %461 = vrot.lane.b32.xlu0 %v5065_v27, %s4898_s18 }
  0x34   : > { %7913 = vst [vmem:[#allocation21_spill] sm:$0xff] %v5056_v25  ;;  %v397_v45 = vld [vmem:[#allocation2 + $0xd9] sm:$0xff] }
  0x35   : > { %217 = vst.msk [vmem:[#allocation2 + $0xa9] sm:$0xff] %vm204_vm0, %v5049_v24 }
  0x36   : > { %222 = vst.msk [vmem:[#allocation2 + $0xe1] sm:$0xff] %vm204_vm0, %v5056_v25  ;;  %v5067_v28 = vld [vmem:[#allocation2 + $0x81] sm:$0xff] }
  0x37   : > { %7914 = vst [vmem:[#allocation22_spill] sm:$0xff] %v5070_v29  ;;  %v395_v44 = vld [vmem:[#allocation2 + $0xc1] sm:$0xff] }
  0x38   : > { %7915 = vst [vmem:[#allocation23_spill] sm:$0xff] %v5073_v30 }
  0x39   : > { %227 = vst.msk [vmem:[#allocation2 + $0x121] sm:$0xff] %vm204_vm0, %v5070_v29  ;;  %465 = vrot.lane.b32.xlu2 %v5067_v28, %s4898_s18  ;;  %v251_v29 = vld [vmem:[#allocation2 + $0xda] sm:$0x1] }
  0x3a   : > { %7916 = vst [vmem:[#allocation24_spill] sm:$0xff] %v5080_v31  ;;  %463 = vrot.lane.b32.xlu1 %v389_v32, %s4898_s18  ;;  %v400_v51 = vld [vmem:[#allocation2 + $0xf9] sm:$0xff] }
  0x3b   : > { %220 = vst.msk [vmem:[#allocation2 + $0xc9] sm:$0xff] %vm204_vm0, %v5073_v30  ;;  %467 = vrot.lane.b32.xlu0 %v391_v33, %s4898_s18  ;;  %v285_v32 = vld [vmem:[#allocation2 + $0x9f] sm:$0x1]  ;;  %v284_v33 = vld [vmem:[#allocation2 + $0x87] sm:$0x1] }
  0x3c   : > { %225 = vst.msk [vmem:[#allocation2 + $0x109] sm:$0xff] %vm204_vm0, %v5080_v31  ;;  %v5089_v34 = vld [vmem:[#allocation2 + $0xa9] sm:$0xff] }
  0x3d   : > { %7917 = vst [vmem:[#allocation25_spill] sm:$0xff] %v5092_v35  ;;  %v398_v50 = vld [vmem:[#allocation2 + $0xe1] sm:$0xff] }
  0x3e   : > { %7918 = vst [vmem:[#allocation26_spill] sm:$0xff] %v5095_v36  ;;  %v5361_v24 = vld [vmem:[#allocation2 + $0xe0] sm:$0xff] }
  0x3f   : > { %230 = vst.msk [vmem:[#allocation2 + $0x141] sm:$0xff] %vm204_vm0, %v5092_v35 }
  0x40   : > { %7919 = vst [vmem:[#allocation27_spill] sm:$0xff] %v5101_v37  ;;  %v403_v55 = vld [vmem:[#allocation2 + $0x121] sm:$0xff] }
  0x41   : > { %471 = vrot.lane.b32.xlu2 %v5089_v34, %s4898_s18  ;;  %223 = vst.msk [vmem:[#allocation2 + $0xf1] sm:$0xff] %vm204_vm0, %v5095_v36  ;;  %v254_v18 = vld [vmem:[#allocation2 + $0x122] sm:$0x1] }
  0x42   : > { %228 = vst.msk [vmem:[#allocation2 + $0x129] sm:$0xff] %vm204_vm0, %v5101_v37  ;;  %469 = vrot.lane.b32.xlu1 %v392_v38, %s4898_s18  ;;  %v5110_v40 = vld [vmem:[#allocation2 + $0xc9] sm:$0xff] }
  0x43   : > { %7920 = vst [vmem:[#allocation28_spill] sm:$0xff] %v5113_v41  ;;  %473 = vrot.lane.b32.xlu0 %v394_v39, %s4898_s18  ;;  %v401_v54 = vld [vmem:[#allocation2 + $0x109] sm:$0xff] }
  0x44   : > { %7921 = vst [vmem:[#allocation29_spill] sm:$0xff] %v5116_v42  ;;  %v5298_v35 = vld [vmem:[#allocation2 + $0xc2] sm:$0xff]  ;;  %v253_v12 = vld [vmem:[#allocation2 + $0x10a] sm:$0x1] }
  0x45   : > { %233 = vst.msk [vmem:[#allocation2 + $0x169] sm:$0xff] %vm204_vm0, %v5113_v41 }
  0x46   : > { %7922 = vst [vmem:[#allocation30_spill] sm:$0xff] %v5122_v43  ;;  %v406_v60 = vld [vmem:[#allocation2 + $0x141] sm:$0xff] }
  0x47   : > { %240 = vst.msk [vmem:[#allocation2 + $0x199] sm:$0xff] %vm204_vm0, %v5113_v41  ;;  %v249_v41 = vld [vmem:[#allocation2 + $0xaa] sm:$0x1]  ;;  %v292_v13 = vld [vmem:[#allocation2 + $0x147] sm:$0x1] }
  0x48   : > { %226 = vst.msk [vmem:[#allocation2 + $0x111] sm:$0xff] %vm204_vm0, %v5116_v42  ;;  %v5133_v46 = vld [vmem:[#allocation2 + $0xf1] sm:$0xff]  ;;  %v250_v42 = vld [vmem:[#allocation2 + $0xc2] sm:$0x1] }
  0x49   : > { %477 = vrot.lane.b32.xlu2 %v5110_v40, %s4898_s18  ;;  %231 = vst.msk [vmem:[#allocation2 + $0x151] sm:$0xff] %vm204_vm0, %v5122_v43  ;;  %v404_v59 = vld [vmem:[#allocation2 + $0x129] sm:$0xff] }
  0x4a   : > { %475 = vrot.lane.b32.xlu1 %v395_v44, %s4898_s18  ;;  %7923 = vst [vmem:[#allocation31_spill] sm:$0xff] %v5136_v48  ;;  %v243_v44 = vld [vmem:[#allocation2 + $0x1a] sm:$0x1]  ;;  %v5292_v43 = vld [vmem:[#allocation2 + $0xc8] sm:$0xff] }
  0x4b   : > { %479 = vrot.lane.b32.xlu0 %v397_v45, %s4898_s18  ;;  %297 = vst.msk [vmem:[#allocation2 + $0x11] sm:$0x1] %vm260_vm1, %v279_v47  ;;  %v244_v45 = vld [vmem:[#allocation2 + $0x32] sm:$0x1] }
  0x4c   : > { %7924 = vst [vmem:[#allocation32_spill] sm:$0xff] %v5141_v49  ;;  %v409_v15 = vld [vmem:[#allocation2 + $0x169] sm:$0xff] }
  0x4d   : > { %229 = vst.msk [vmem:[#allocation2 + $0x139] sm:$0xff] %vm204_vm0, %v5136_v48 }
  0x4e   : > { %234 = vst.msk [vmem:[#allocation2 + $0x171] sm:$0xff] %vm204_vm0, %v5141_v49 }
  0x4f   : > { %241 = vst.msk [vmem:[#allocation2 + $0x1a1] sm:$0xff] %vm204_vm0, %v5141_v49  ;;  %v5152_v52 = vld [vmem:[#allocation2 + $0x111] sm:$0xff] }
  0x50   : > { %7925 = vst [vmem:[#allocation33_spill] sm:$0xff] %v5155_v53  ;;  %v407_v63 = vld [vmem:[#allocation2 + $0x151] sm:$0xff] }
  0x51   : > { %483 = vrot.lane.b32.xlu2 %v5133_v46, %s4898_s18  ;;  %232 = vst.msk [vmem:[#allocation2 + $0x159] sm:$0xff] %vm204_vm0, %v5155_v53  ;;  %v5352_v30 = vld [vmem:[#allocation2 + $0x10a] sm:$0xff] }
  0x52   : > { %481 = vrot.lane.b32.xlu1 %v398_v50, %s4898_s18  ;;  %300 = vst.msk [vmem:[#allocation2 + $0x59] sm:$0x1] %vm260_vm1, %v282_v57  ;;  %v573_v47 = vld [vmem:[#allocation2 + $0xa] sm:$0xff] }
  0x53   : > { %485 = vrot.lane.b32.xlu0 %v400_v51, %s4898_s18  ;;  %299 = vst.msk [vmem:[#allocation2 + $0x41] sm:$0x1] %vm260_vm1, %v281_v58  ;;  %v283_v51 = vld [vmem:[#allocation2 + $0x6f] sm:$0x1]  ;;  %v5356_v19 = vld [vmem:[#allocation2 + $0x110] sm:$0xff] }
  0x54   : > { %v5163_v56 = vld [vmem:[#allocation2 + $0x139] sm:$0xff]  ;;  %298 = vst.msk [vmem:[#allocation2 + $0x29] sm:$0x1] %vm260_vm1, %v280_v62  ;;  %v245_v62 = vld [vmem:[#allocation2 + $0x4a] sm:$0x1] }
  0x55   : > { %261 = vst.msk [vmem:[#allocation2] sm:$0x1] %vm260_vm1, %v242_v8  ;;  %v410_v38 = vld [vmem:[#allocation2 + $0x171] sm:$0xff]  ;;  %v255_v9 = vld [vmem:[#allocation2 + $0x13a] sm:$0x1] }
  0x56   : > { %303 = vst.msk [vmem:[#allocation2 + $0xa1] sm:$0x1] %vm260_vm1, %v285_v32  ;;  %v5206_v8 = vld [vmem:[#allocation2 + $0x4a] sm:$0xff]  ;;  %v294_v36 = vld [vmem:[#allocation2 + $0x177] sm:$0x1] }
  0x57   : > { %302 = vst.msk [vmem:[#allocation2 + $0x89] sm:$0x1] %vm260_vm1, %v284_v33  ;;  %v5215_v33 = vld [vmem:[#allocation2 + $0x20] sm:$0xff]  ;;  %v5421_v2 = vld [vmem:[#allocation2 + $0x16a] sm:$0xff] }
  0x58   : > { %v5171_v61 = vld [vmem:[#allocation2 + $0x159] sm:$0xff]  ;;  %262 = vst.msk [vmem:[#allocation2 + $0x18] sm:$0x1] %vm260_vm1, %v243_v44 }
  0x59   : > { %489 = vrot.lane.b32.xlu2 %v5152_v52, %s4898_s18  ;;  %263 = vst.msk [vmem:[#allocation2 + $0x30] sm:$0x1] %vm260_vm1, %v244_v45  ;;  %v579_v44 = vld [vmem:[#allocation2 + $0x52] sm:$0xff]  ;;  %v293_v25 = vld [vmem:[#allocation2 + $0x15f] sm:$0x1] }
  0x5a   : > { %487 = vrot.lane.b32.xlu1 %v401_v54, %s4898_s18  ;;  %301 = vst.msk [vmem:[#allocation2 + $0x71] sm:$0x1] %vm260_vm1, %v283_v51  ;;  %v574_v54 = vld [vmem:[#allocation2 + $0x1a] sm:$0xff]  ;;  %v286_v51 = vld [vmem:[#allocation2 + $0xb7] sm:$0x1] }
  0x5b   : > { %491 = vrot.lane.b32.xlu0 %v403_v55, %s4898_s18  ;;  %v5187_v50 = vld [vmem:[#allocation2 + $0x22] sm:$0xff]  ;;  %264 = vst.msk [vmem:[#allocation2 + $0x48] sm:$0x1] %vm260_vm1, %v245_v62  ;;  %v577_v32 = vld [vmem:[#allocation2 + $0x3a] sm:$0xff]  ;;  %v248_v62 = vld [vmem:[#allocation2 + $0x92] sm:$0x1] }
  0x5c   : > { %v315_v39 = vld [vmem:[#allocation2] sm:$0xff]  ;;  %v316_v55 = vld [vmem:[#allocation2 + $0x8] sm:$0xff]  ;;  %350 = vst.msk [vmem:[#allocation3 + $0x18] sm:$0xff] %vm204_vm0, %v5215_v33  ;;  %v5410_v1 = vld [vmem:[#allocation2 + $0x152] sm:$0xff] }
  0x5d   : > { %347 = vst.msk [vmem:[#allocation3] sm:$0xff] %vm204_vm0, %v315_v39  ;;  %v246_v39 = vld [vmem:[#allocation2 + $0x62] sm:$0x1] }
  0x5e   : > { %348 = vst.msk [vmem:[#allocation3 + $0x8] sm:$0xff] %vm204_vm0, %v316_v55  ;;  %v580_v55 = vld [vmem:[#allocation2 + $0x62] sm:$0xff] }
  0x5f   : > { %v5194_v57 = vld [vmem:[#allocation2 + $0x18] sm:$0xff]  ;;  %265 = vst.msk [vmem:[#allocation2 + $0x60] sm:$0x1] %vm260_vm1, %v246_v39 }
  0x60   : > { %349 = vst.msk [vmem:[#allocation3 + $0x10] sm:$0xff] %vm204_vm0, %v5194_v57  ;;  %v5252_v39 = vld [vmem:[#allocation2 + $0x92] sm:$0xff] }
  0x61   : > { %495 = vrot.lane.b32.xlu2 %v5163_v56, %s4898_s18  ;;  %v5223_v45 = vld [vmem:[#allocation2 + $0x6a] sm:$0xff]  ;;  %304 = vst.msk [vmem:[#allocation2 + $0xb9] sm:$0x1] %vm260_vm1, %v286_v51  ;;  %v290_v51 = vld [vmem:[#allocation2 + $0x117] sm:$0x1] }
  0x62   : > { %493 = vrot.lane.b32.xlu1 %v404_v59, %s4898_s18  ;;  %v5196_v59 = vld [vmem:[#allocation2 + $0x30] sm:$0xff]  ;;  %267 = vst.msk [vmem:[#allocation2 + $0x90] sm:$0x1] %vm260_vm1, %v248_v62 }
  0x63   : > { %497 = vrot.lane.b32.xlu0 %v406_v60, %s4898_s18  ;;  %v5198_v60 = vld [vmem:[#allocation2 + $0x38] sm:$0xff]  ;;  %351 = vst.msk [vmem:[#allocation3 + $0x20] sm:$0xff] %vm204_vm0, %v5196_v59 }
  0x64   : > { %352 = vst.msk [vmem:[#allocation3 + $0x28] sm:$0xff] %vm204_vm0, %v5198_v60 }
  0x65   : > { %308 = vst.msk [vmem:[#allocation2 + $0x119] sm:$0x1] %vm260_vm1, %v290_v51 }
  0x66   : > { %268 = vst.msk [vmem:[#allocation2 + $0xa8] sm:$0x1] %vm260_vm1, %v249_v41  ;;  %v5287_v41 = vld [vmem:[#allocation2 + $0x98] sm:$0xff] }
  0x67   : > { %360 = vst.msk [vmem:[#allocation3 + $0x68] sm:$0xff] %vm204_vm0, %v5287_v41 }
  0x68   : > { %364 = vst.msk [vmem:[#allocation3 + $0x88] sm:$0xff] %vm204_vm0, %v5292_v43 }
  0x69   : > { %501 = vrot.lane.b32.xlu2 %v5171_v61, %s4898_s18  ;;  %v5260_v49 = vld [vmem:[#allocation2 + $0x90] sm:$0xff]  ;;  %270 = vst.msk [vmem:[#allocation2 + $0xd8] sm:$0x1] %vm260_vm1, %v251_v29 }
  0x6a   : > { %499 = vrot.lane.b32.xlu1 %v407_v63, %s4898_s18  ;;  %v576_v63 = vld [vmem:[#allocation2 + $0x32] sm:$0xff]  ;;  %359 = vst.msk [vmem:[#allocation3 + $0x60] sm:$0xff] %vm204_vm0, %v5260_v49 }
  0x6b   : > { %503 = vrot.lane.b32.xlu0 %v409_v15, %s4898_s18  ;;  %v288_v15 = vld [vmem:[#allocation2 + $0xe7] sm:$0x1]  ;;  %269 = vst.msk [vmem:[#allocation2 + $0xc0] sm:$0x1] %vm260_vm1, %v250_v42 }
  0x6c   : > { %306 = vst.msk [vmem:[#allocation2 + $0xe9] sm:$0x1] %vm260_vm1, %v288_v15  ;;  %v5241_v15 = vld [vmem:[#allocation2 + $0x80] sm:$0xff]  ;;  %v5368_v7 = vld [vmem:[#allocation2 + $0x112] sm:$0xff] }
  0x6d   : > { %358 = vst.msk [vmem:[#allocation3 + $0x58] sm:$0xff] %vm204_vm0, %v5241_v15  ;;  %v5300_v48 = vld [vmem:[#allocation2 + $0xa8] sm:$0xff] }
  0x6e   : > { %361 = vst.msk [vmem:[#allocation3 + $0x70] sm:$0xff] %vm204_vm0, %v5300_v48 }
  0x6f   : > { %312 = vst.msk [vmem:[#allocation2 + $0x179] sm:$0x1] %vm260_vm1, %v294_v36  ;;  %v5341_v36 = vld [vmem:[#allocation2 + $0xf8] sm:$0xff] }
  0x70   : > { %v5330_v42 = vld [vmem:[#allocation2 + $0xd8] sm:$0xff]  ;;  %311 = vst.msk [vmem:[#allocation2 + $0x161] sm:$0x1] %vm260_vm1, %v293_v25 }
  0x71   : > { %636 = vrot.lane.b32.xlu2 %v572_v26, %s4899_s19  ;;  %v287_v26 = vld [vmem:[#allocation2 + $0xcf] sm:$0x1]  ;;  %365 = vst.msk [vmem:[#allocation3 + $0x90] sm:$0xff] %vm204_vm0, %v5330_v42 }
  0x72   : > { %505 = vrot.lane.b32.xlu1 %v410_v38, %s4898_s18  ;;  %305 = vst.msk [vmem:[#allocation2 + $0xd1] sm:$0x1] %vm260_vm1, %v287_v26  ;;  %v5245_v26 = vld [vmem:[#allocation2 + $0x60] sm:$0xff] }
  0x73   : > { %638 = vrot.lane.b32.xlu0 %v573_v47, %s4899_s19  ;;  %v5225_v47 = vld [vmem:[#allocation2 + $0x48] sm:$0xff]  ;;  %355 = vst.msk [vmem:[#allocation3 + $0x40] sm:$0xff] %vm204_vm0, %v5245_v26 }
  0x74   : > { %353 = vst.msk [vmem:[#allocation3 + $0x30] sm:$0xff] %vm204_vm0, %v5225_v47 }
  0x75   : > { %368 = vst.msk [vmem:[#allocation3 + $0xa8] sm:$0xff] %vm204_vm0, %v5341_v36 }
  0x76   : > { %v452_v58 = vpop.permute.xlu2 %451  ;;  %370 = vst.msk [vmem:[#allocation3 + $0xb8] sm:$0xff] %vm204_vm0, %v5356_v19 }
  0x77   : > { %544 = vst.msk [vmem:[#allocation3 + $0x20] sm:$0xff] %vm539_vm2, %v452_v58  ;;  %v5237_v58 = vld [vmem:[#allocation2 + $0x50] sm:$0xff] }
  0x78   : > { %354 = vst.msk [vmem:[#allocation3 + $0x38] sm:$0xff] %vm204_vm0, %v5237_v58 }
  0x79   : > { %642 = vrot.lane.b32.xlu2 %v5187_v50, %s4899_s19  ;;  %v5311_v31 = vld [vmem:[#allocation2 + $0xca] sm:$0xff]  ;;  %366 = vst.msk [vmem:[#allocation3 + $0x98] sm:$0xff] %vm204_vm0, %v5361_v24 }
  0x7a   : > { %640 = vrot.lane.b32.xlu1 %v574_v54, %s4899_s19  ;;  %v5230_v54 = vld [vmem:[#allocation2 + $0x68] sm:$0xff]  ;;  %310 = vst.msk [vmem:[#allocation2 + $0x149] sm:$0x1] %vm260_vm1, %v292_v13  ;;  %v5387_v13 = vld [vmem:[#allocation2 + $0x140] sm:$0xff] }
  0x7b   : > { %644 = vrot.lane.b32.xlu0 %v576_v63, %s4899_s19  ;;  %356 = vst.msk [vmem:[#allocation3 + $0x48] sm:$0xff] %vm204_vm0, %v5230_v54 }
  0x7c   : > { %273 = vst.msk [vmem:[#allocation2 + $0x120] sm:$0x1] %vm260_vm1, %v254_v18  ;;  %v5395_v18 = vld [vmem:[#allocation2 + $0x128] sm:$0xff] }
  0x7d   : > { %274 = vst.msk [vmem:[#allocation2 + $0x138] sm:$0x1] %vm260_vm1, %v255_v9  ;;  %v5402_v9 = vld [vmem:[#allocation2 + $0x158] sm:$0xff] }
  0x7e   : > { %v454_v38 = vpop.permute.xlu2 %453  ;;  %272 = vst.msk [vmem:[#allocation2 + $0x108] sm:$0x1] %vm260_vm1, %v253_v12 }
  0x7f   : > { %545 = vst.msk [vmem:[#allocation3 + $0x28] sm:$0xff] %vm539_vm2, %v454_v38  ;;  %v582_v38 = vld [vmem:[#allocation2 + $0x7a] sm:$0xff] }
  0x80   : > { %374 = vst.msk [vmem:[#allocation3 + $0xd8] sm:$0xff] %vm204_vm0, %v5387_v13 }
  0x81   : > { %648 = vrot.lane.b32.xlu2 %v5206_v8, %s4899_s19  ;;  %372 = vst.msk [vmem:[#allocation3 + $0xc8] sm:$0xff] %vm204_vm0, %v5395_v18 }
  0x82   : > { %646 = vrot.lane.b32.xlu1 %v577_v32, %s4899_s19  ;;  %v247_v32 = vld [vmem:[#allocation2 + $0x7a] sm:$0x1]  ;;  %376 = vst.msk [vmem:[#allocation3 + $0xe8] sm:$0xff] %vm204_vm0, %v5402_v9 }
  0x83   : > { %650 = vrot.lane.b32.xlu0 %v579_v44, %s4899_s19  ;;  %266 = vst.msk [vmem:[#allocation2 + $0x78] sm:$0x1] %vm260_vm1, %v247_v32  ;;  %v291_v44 = vld [vmem:[#allocation2 + $0x12f] sm:$0x1]  ;;  %v5265_v32 = vld [vmem:[#allocation2 + $0x9a] sm:$0xff] }
  0x84   : > { %309 = vst.msk [vmem:[#allocation2 + $0x131] sm:$0x1] %vm260_vm1, %v291_v44  ;;  %v5269_v44 = vld [vmem:[#allocation2 + $0xb2] sm:$0xff]  ;;  %v5406_v12 = vld [vmem:[#allocation2 + $0x120] sm:$0xff] }
  0x85   : > { %7930 = vst [vmem:[#allocation38_spill] sm:$0xff] %v5410_v1  ;;  %v5414_v0 = vld [vmem:[#allocation2 + $0x138] sm:$0xff] }
  0x86   : > { %371 = vst.msk [vmem:[#allocation3 + $0xc0] sm:$0xff] %vm204_vm0, %v5406_v12 }
  0x87   : > { %373 = vst.msk [vmem:[#allocation3 + $0xd0] sm:$0xff] %vm204_vm0, %v5414_v0 }
  0x88   : > { %7931 = vst [vmem:[#allocation39_spill] sm:$0xff] %v5421_v2 }
  0x89   : > { %654 = vrot.lane.b32.xlu2 %v5223_v45, %s4899_s19 }
  0x8a   : > { %652 = vrot.lane.b32.xlu1 %v580_v55, %s4899_s19  ;;  %v583_v55 = vld [vmem:[#allocation2 + $0x82] sm:$0xff]  ;;  %v5272_v51 = vld [vmem:[#allocation2 + $0x78] sm:$0xff] }
  0x8b   : > { %v460_v63 = vpop.permute.xlu2 %459  ;;  %656 = vrot.lane.b32.xlu0 %v582_v38, %s4899_s19  ;;  %357 = vst.msk [vmem:[#allocation3 + $0x50] sm:$0xff] %vm204_vm0, %v5272_v51  ;;  %v5379_v5 = vld [vmem:[#allocation2 + $0x12a] sm:$0xff] }
  0x8c   : > { %548 = vst.msk [vmem:[#allocation3 + $0x40] sm:$0xff] %vm539_vm2, %v460_v63 }
  0x8d   : > { %v444_v62 = vpop.permute.xlu0 %443  ;;  %7927 = vst [vmem:[#allocation35_spill] sm:$0xff] %v5379_v5 }
  0x8e   : > { %540 = vst.msk [vmem:[#allocation3] sm:$0xff] %vm539_vm2, %v444_v62  ;;  %v5281_v62 = vld [vmem:[#allocation2 + $0xaa] sm:$0xff] }
  0x91   : > { %660 = vrot.lane.b32.xlu2 %v5252_v39, %s4899_s19 }
  0x92   : > { %658 = vrot.lane.b32.xlu1 %v583_v55, %s4899_s19  ;;  %v5279_v55 = vld [vmem:[#allocation2 + $0xb0] sm:$0xff] }
  0x93   : > { %v466_v63 = vpop.permute.xlu2 %465  ;;  %662 = vrot.lane.b32.xlu0 %v5265_v32, %s4899_s19  ;;  %362 = vst.msk [vmem:[#allocation3 + $0x78] sm:$0xff] %vm204_vm0, %v5279_v55 }
  0x94   : > { %551 = vst.msk [vmem:[#allocation3 + $0x58] sm:$0xff] %vm539_vm2, %v466_v63  ;;  %v448_v38 = vpop.permute.xlu1 %447 }
  0x95   : > { %542 = vst.msk [vmem:[#allocation3 + $0x10] sm:$0xff] %vm539_vm2, %v448_v38  ;;  %v446_v63 = vpop.permute.xlu0 %445  ;;  %v289_v38 = vld [vmem:[#allocation2 + $0xff] sm:$0x1] }
  0x96   : > { %541 = vst.msk [vmem:[#allocation3 + $0x8] sm:$0xff] %vm539_vm2, %v446_v63  ;;  %v5305_v63 = vld [vmem:[#allocation2 + $0xda] sm:$0xff] }
  0x97   : > { %307 = vst.msk [vmem:[#allocation2 + $0x101] sm:$0x1] %vm260_vm1, %v289_v38 }
  0x99   : > { %666 = vrot.lane.b32.xlu2 %v5269_v44, %s4899_s19 }
  0x9a   : > { %664 = vrot.lane.b32.xlu1 %v5281_v62, %s4899_s19 }
  0x9b   : > { %v472_v53 = vpop.permute.xlu2 %471  ;;  %668 = vrot.lane.b32.xlu0 %v5298_v35, %s4899_s19 }
  0x9c   : > { %v450_v37 = vpop.permute.xlu1 %449  ;;  %554 = vst.msk [vmem:[#allocation3 + $0x70] sm:$0xff] %vm539_vm2, %v472_v53  ;;  %v5321_v53 = vld [vmem:[#allocation2 + $0xe2] sm:$0xff] }
  0x9d   : > { %543 = vst.msk [vmem:[#allocation3 + $0x18] sm:$0xff] %vm539_vm2, %v450_v37  ;;  %v456_v38 = vpop.permute.xlu0 %455  ;;  %v252_v37 = vld [vmem:[#allocation2 + $0xf2] sm:$0x1] }
  0x9e   : > { %546 = vst.msk [vmem:[#allocation3 + $0x30] sm:$0xff] %vm539_vm2, %v456_v38  ;;  %v5324_v29 = vld [vmem:[#allocation2 + $0xfa] sm:$0xff] }
  0x9f   : > { %271 = vst.msk [vmem:[#allocation2 + $0xf0] sm:$0x1] %vm260_vm1, %v252_v37  ;;  %v5339_v38 = vld [vmem:[#allocation2 + $0xc0] sm:$0xff] }
  0xa0   : > { %363 = vst.msk [vmem:[#allocation3 + $0x80] sm:$0xff] %vm204_vm0, %v5339_v38 }
  0xa1   : > { %672 = vrot.lane.b32.xlu2 %v5305_v63, %s4899_s19 }
  0xa2   : > { %670 = vrot.lane.b32.xlu1 %v5311_v31, %s4899_s19 }
  0xa3   : > { %v478_v23 = vpop.permute.xlu2 %477  ;;  %674 = vrot.lane.b32.xlu0 %v5321_v53, %s4899_s19 }
  0xa4   : > { %557 = vst.msk [vmem:[#allocation3 + $0x88] sm:$0xff] %vm539_vm2, %v478_v23  ;;  %v458_v17 = vpop.permute.xlu1 %457  ;;  %v5333_v23 = vld [vmem:[#allocation2 + $0xf2] sm:$0xff] }
  0xa5   : > { %547 = vst.msk [vmem:[#allocation3 + $0x38] sm:$0xff] %vm539_vm2, %v458_v17  ;;  %v462_v17 = vpop.permute.xlu0 %461 }
  0xa6   : > { %549 = vst.msk [vmem:[#allocation3 + $0x48] sm:$0xff] %vm539_vm2, %v462_v17  ;;  %v5348_v25 = vld [vmem:[#allocation2 + $0xf0] sm:$0xff]  ;;  %v5359_v17 = vld [vmem:[#allocation2 + $0x122] sm:$0xff] }
  0xa7   : > { %367 = vst.msk [vmem:[#allocation3 + $0xa0] sm:$0xff] %vm204_vm0, %v5348_v25 }
  0xa8   : > { %7926 = vst [vmem:[#allocation34_spill] sm:$0xff] %v5359_v17 }
  0xa9   : > { %678 = vrot.lane.b32.xlu2 %v5324_v29, %s4899_s19 }
  0xaa   : > { %676 = vrot.lane.b32.xlu1 %v5333_v23, %s4899_s19 }
  0xab   : > { %v484_v37 = vpop.permute.xlu2 %483  ;;  %680 = vrot.lane.b32.xlu0 %v5352_v30, %s4899_s19 }
  0xac   : > { %v464_v11 = vpop.permute.xlu1 %463  ;;  %560 = vst.msk [vmem:[#allocation3 + $0xa0] sm:$0xff] %vm539_vm2, %v484_v37 }
  0xad   : > { %550 = vst.msk [vmem:[#allocation3 + $0x50] sm:$0xff] %vm539_vm2, %v464_v11  ;;  %v468_v37 = vpop.permute.xlu0 %467 }
  0xae   : > { %552 = vst.msk [vmem:[#allocation3 + $0x60] sm:$0xff] %vm539_vm2, %v468_v37  ;;  %v5389_v37 = vld [vmem:[#allocation2 + $0x13a] sm:$0xff] }
  0xaf   : > { %7928 = vst [vmem:[#allocation36_spill] sm:$0xff] %v5389_v37 }
  0xb1   : > { %684 = vrot.lane.b32.xlu2 %v5359_v17, %s4899_s19 }
  0xb2   : > { %682 = vrot.lane.b32.xlu1 %v5368_v7, %s4899_s19 }
  0xb3   : > { %v490_v11 = vpop.permute.xlu2 %489  ;;  %686 = vrot.lane.b32.xlu0 %v5379_v5, %s4899_s19  ;;  %v5426_v5 = vld [vmem:[#allocation2 + $0x15a] sm:$0xff] }
  0xb4   : > { %563 = vst.msk [vmem:[#allocation3 + $0xb8] sm:$0xff] %vm539_vm2, %v490_v11  ;;  %v470_v6 = vpop.permute.xlu1 %469  ;;  %v5391_v11 = vld [vmem:[#allocation2 + $0x142] sm:$0xff] }
  0xb5   : > { %553 = vst.msk [vmem:[#allocation3 + $0x68] sm:$0xff] %vm539_vm2, %v470_v6  ;;  %v474_v3 = vpop.permute.xlu0 %473 }
  0xb6   : > { %7929 = vst [vmem:[#allocation37_spill] sm:$0xff] %v5391_v11 }
  0xb7   : > { %555 = vst.msk [vmem:[#allocation3 + $0x78] sm:$0xff] %vm539_vm2, %v474_v3  ;;  %v5419_v3 = vld [vmem:[#allocation2 + $0x108] sm:$0xff] }
  0xb8   : > { %369 = vst.msk [vmem:[#allocation3 + $0xb0] sm:$0xff] %vm204_vm0, %v5419_v3 }
  0xb9   : > { %690 = vrot.lane.b32.xlu2 %v5391_v11, %s4899_s19  ;;  %v257_v11 = vld [vmem:[#allocation2 + $0x16a] sm:$0x1] }
  0xba   : > { %688 = vrot.lane.b32.xlu1 %v5389_v37, %s4899_s19  ;;  %276 = vst.msk [vmem:[#allocation2 + $0x168] sm:$0x1] %vm260_vm1, %v257_v11 }
  0xbb   : > { %v496_v6 = vpop.permute.xlu2 %495  ;;  %692 = vrot.lane.b32.xlu0 %v5410_v1, %s4899_s19 }
  0xbc   : > { %v476_v4 = vpop.permute.xlu1 %475  ;;  %566 = vst.msk [vmem:[#allocation3 + $0xd0] sm:$0xff] %vm539_vm2, %v496_v6  ;;  %v5437_v6 = vld [vmem:[#allocation2 + $0x172] sm:$0xff] }
  0xbd   : > { %556 = vst.msk [vmem:[#allocation3 + $0x80] sm:$0xff] %vm539_vm2, %v476_v4  ;;  %v480_v37 = vpop.permute.xlu0 %479  ;;  %v256_v4 = vld [vmem:[#allocation2 + $0x152] sm:$0x1] }
  0xbe   : > { %558 = vst.msk [vmem:[#allocation3 + $0x90] sm:$0xff] %vm539_vm2, %v480_v37  ;;  %v5450_v37 = vld [vmem:[#allocation2 + $0x170] sm:$0xff] }
  0xbf   : > { %275 = vst.msk [vmem:[#allocation2 + $0x150] sm:$0x1] %vm260_vm1, %v256_v4 }
  0xc0   : > { %378 = vst.msk [vmem:[#allocation3 + $0xf8] sm:$0xff] %vm204_vm0, %v5450_v37 }
  0xc1   : > { %696 = vrot.lane.b32.xlu2 %v5421_v2, %s4899_s19  ;;  %v5443_v11 = vld [vmem:[#allocation2 + $0x168] sm:$0xff] }
  0xc2   : > { %694 = vrot.lane.b32.xlu1 %v5426_v5, %s4899_s19  ;;  %377 = vst.msk [vmem:[#allocation3 + $0xf0] sm:$0xff] %vm204_vm0, %v5443_v11 }
  0xc3   : > { %v502_v17 = vpop.permute.xlu2 %501  ;;  %698 = vrot.lane.b32.xlu0 %v5437_v6, %s4899_s19 }
  0xc4   : > { %569 = vst.msk [vmem:[#allocation3 + $0xe8] sm:$0xff] %vm539_vm2, %v502_v17  ;;  %v482_v1 = vpop.permute.xlu1 %481 }
  0xc5   : > { %559 = vst.msk [vmem:[#allocation3 + $0x98] sm:$0xff] %vm539_vm2, %v482_v1  ;;  %v486_v2 = vpop.permute.xlu0 %485 }
  0xc6   : > { %561 = vst.msk [vmem:[#allocation3 + $0xa8] sm:$0xff] %vm539_vm2, %v486_v2  ;;  %v5455_v1 = vld [vmem:[#allocation2 + $0x150] sm:$0xff] }
  0xc7   : > { %375 = vst.msk [vmem:[#allocation3 + $0xe0] sm:$0xff] %vm204_vm0, %v5455_v1 }
  0xc9   : > { %831 = vrot.lane.b32.xlu2 %v5215_v33, %s4900_s20 }
  0xca   : > { %829 = vrot.lane.b32.xlu1 %v5194_v57, %s4900_s20 }
  0xcb   : > { %v637_v17 = vpop.permute.xlu2 %636  ;;  %833 = vrot.lane.b32.xlu0 %v5196_v59, %s4900_s20 }
  0xcc   : > { %733 = vst.msk [vmem:[#allocation3] sm:$0xff] %vm732_vm3, %v637_v17  ;;  %v488_v33 = vpop.permute.xlu1 %487 }
  0xcd   : > { %562 = vst.msk [vmem:[#allocation3 + $0xb0] sm:$0xff] %vm539_vm2, %v488_v33  ;;  %v492_v2 = vpop.permute.xlu0 %491 }
  0xce   : > { %564 = vst.msk [vmem:[#allocation3 + $0xc0] sm:$0xff] %vm539_vm2, %v492_v2 }
  0xd1   : > { %837 = vrot.lane.b32.xlu2 %v5225_v47, %s4900_s20 }
  0xd2   : > { %835 = vrot.lane.b32.xlu1 %v5198_v60, %s4900_s20 }
  0xd3   : > { %v643_v57 = vpop.permute.xlu2 %642  ;;  %839 = vrot.lane.b32.xlu0 %v5237_v58, %s4900_s20 }
  0xd4   : > { %736 = vst.msk [vmem:[#allocation3 + $0x18] sm:$0xff] %vm732_vm3, %v643_v57  ;;  %v494_v4 = vpop.permute.xlu1 %493 }
  0xd5   : > { %565 = vst.msk [vmem:[#allocation3 + $0xc8] sm:$0xff] %vm539_vm2, %v494_v4  ;;  %v498_v17 = vpop.permute.xlu0 %497 }
  0xd6   : > { %567 = vst.msk [vmem:[#allocation3 + $0xd8] sm:$0xff] %vm539_vm2, %v498_v17  ;;  %v5532_v17 = vld [vmem:[%s4942_s17 + $0xf8] sm:$0xff] }
  0xd7   : > { %7933 = vst [vmem:[#allocation41_spill] sm:$0xff] %v5532_v17 }
  0xd8   : > { %236 = vst.msk [vmem:[#allocation2 + $0x189] sm:$0xff] %vm204_vm0, %v5532_v17 }
  0xd9   : > { %843 = vrot.lane.b32.xlu2 %v5230_v54, %s4900_s20 }
  0xda   : > { %841 = vrot.lane.b32.xlu1 %v5245_v26, %s4900_s20 }
  0xdb   : > { %v649_v59 = vpop.permute.xlu2 %648  ;;  %845 = vrot.lane.b32.xlu0 %v5272_v51, %s4900_s20  ;;  %v5499_v51 = vld [vmem:[%s4942_s17 + $0xf0] sm:$0xff] }
  0xdc   : > { %739 = vst.msk [vmem:[#allocation3 + $0x30] sm:$0xff] %vm732_vm3, %v649_v59  ;;  %v500_v60 = vpop.permute.xlu1 %499 }
  0xdd   : > { %568 = vst.msk [vmem:[#allocation3 + $0xe0] sm:$0xff] %vm539_vm2, %v500_v60  ;;  %v504_v47 = vpop.permute.xlu0 %503 }
  0xde   : > { %570 = vst.msk [vmem:[#allocation3 + $0xf0] sm:$0xff] %vm539_vm2, %v504_v47 }
  0xdf   : > { %7932 = vst [vmem:[#allocation40_spill] sm:$0xff] %v5499_v51 }
  0xe0   : > { %235 = vst.msk [vmem:[#allocation2 + $0x181] sm:$0xff] %vm204_vm0, %v5499_v51 }
  0xe1   : > { %849 = vrot.lane.b32.xlu2 %v5260_v49, %s4900_s20 }
  0xe2   : > { %847 = vrot.lane.b32.xlu1 %v5241_v15, %s4900_s20 }
  0xe3   : > { %v655_v54 = vpop.permute.xlu2 %654  ;;  %851 = vrot.lane.b32.xlu0 %v5287_v41, %s4900_s20 }
  0xe4   : > { %742 = vst.msk [vmem:[#allocation3 + $0x48] sm:$0xff] %vm732_vm3, %v655_v54  ;;  %v506_v58 = vpop.permute.xlu1 %505 }
  0xe5   : > { %571 = vst.msk [vmem:[#allocation3 + $0xf8] sm:$0xff] %vm539_vm2, %v506_v58  ;;  %v639_v26 = vpop.permute.xlu0 %638 }
  0xe6   : > { %734 = vst.msk [vmem:[#allocation3 + $0x8] sm:$0xff] %vm732_vm3, %v639_v26 }
  0xe7   : > { %v258_v33 = vld [vmem:[#allocation2 + $0x182] sm:$0x1]  ;;  %v5554_v58 = vld [vmem:[#allocation2 + $0x188] sm:$0xff] }
  0xe8   : > { %277 = vst.msk [vmem:[#allocation2 + $0x180] sm:$0x1] %vm260_vm1, %v258_v33  ;;  %v5576_v33 = vld [vmem:[#allocation2 + $0x51] sm:$0xff] }
  0xe9   : > { %855 = vrot.lane.b32.xlu2 %v5279_v55, %s4900_s20 }
  0xea   : > { %853 = vrot.lane.b32.xlu1 %v5300_v48, %s4900_s20 }
  0xeb   : > { %v661_v49 = vpop.permute.xlu2 %660  ;;  %857 = vrot.lane.b32.xlu0 %v5339_v38, %s4900_s20 }
  0xec   : > { %745 = vst.msk [vmem:[#allocation3 + $0x60] sm:$0xff] %vm732_vm3, %v661_v49  ;;  %v641_v15 = vpop.permute.xlu1 %640 }
  0xed   : > { %735 = vst.msk [vmem:[#allocation3 + $0x10] sm:$0xff] %vm732_vm3, %v641_v15  ;;  %v645_v55 = vpop.permute.xlu0 %644 }
  0xee   : > { %737 = vst.msk [vmem:[#allocation3 + $0x20] sm:$0xff] %vm732_vm3, %v645_v55 }
  0xef   : > { %v5558_v26 = vld [vmem:[#allocation2 + $0x180] sm:$0xff] }
  0xf1   : > { %861 = vrot.lane.b32.xlu2 %v5330_v42, %s4900_s20 }
  0xf2   : > { %859 = vrot.lane.b32.xlu1 %v5292_v43, %s4900_s20 }
  0xf3   : > { %v667_v48 = vpop.permute.xlu2 %666  ;;  %863 = vrot.lane.b32.xlu0 %v5361_v24, %s4900_s20 }
  0xf4   : > { %748 = vst.msk [vmem:[#allocation3 + $0x78] sm:$0xff] %vm732_vm3, %v667_v48  ;;  %v647_v41 = vpop.permute.xlu1 %646 }
  0xf5   : > { %738 = vst.msk [vmem:[#allocation3 + $0x28] sm:$0xff] %vm732_vm3, %v647_v41  ;;  %v651_v2 = vpop.permute.xlu0 %650 }
  0xf6   : > { %740 = vst.msk [vmem:[#allocation3 + $0x38] sm:$0xff] %vm732_vm3, %v651_v2  ;;  %v5587_v2 = vld [vmem:[#allocation2 + $0x79] sm:$0xff] }
  0xf9   : > { %867 = vrot.lane.b32.xlu2 %v5341_v36, %s4900_s20 }
  0xfa   : > { %865 = vrot.lane.b32.xlu1 %v5348_v25, %s4900_s20 }
  0xfb   : > { %v673_v42 = vpop.permute.xlu2 %672  ;;  %869 = vrot.lane.b32.xlu0 %v5419_v3, %s4900_s20 }
  0xfc   : > { %751 = vst.msk [vmem:[#allocation3 + $0x90] sm:$0xff] %vm732_vm3, %v673_v42  ;;  %v653_v43 = vpop.permute.xlu1 %652 }
  0xfd   : > { %741 = vst.msk [vmem:[#allocation3 + $0x40] sm:$0xff] %vm732_vm3, %v653_v43  ;;  %v657_v57 = vpop.permute.xlu0 %656  ;;  %v5598_v43 = vld [vmem:[#allocation2 + $0x99] sm:$0xff] }
  0xfe   : > { %743 = vst.msk [vmem:[#allocation3 + $0x50] sm:$0xff] %vm732_vm3, %v657_v57 }
 0x101   : > { %873 = vrot.lane.b32.xlu2 %v5406_v12, %s4900_s20 }
 0x102   : > { %871 = vrot.lane.b32.xlu1 %v5356_v19, %s4900_s20 }
 0x103   : > { %v679_v4 = vpop.permute.xlu2 %678  ;;  %875 = vrot.lane.b32.xlu0 %v5395_v18, %s4900_s20 }
 0x104   : > { %754 = vst.msk [vmem:[#allocation3 + $0xa8] sm:$0xff] %vm732_vm3, %v679_v4  ;;  %v659_v25 = vpop.permute.xlu1 %658 }
 0x105   : > { %744 = vst.msk [vmem:[#allocation3 + $0x58] sm:$0xff] %vm732_vm3, %v659_v25  ;;  %v663_v59 = vpop.permute.xlu0 %662  ;;  %v5611_v25 = vld [vmem:[#allocation2 + $0xc1] sm:$0xff] }
 0x106   : > { %746 = vst.msk [vmem:[#allocation3 + $0x68] sm:$0xff] %vm732_vm3, %v663_v59 }
 0x109   : > { %879 = vrot.lane.b32.xlu2 %v5387_v13, %s4900_s20 }
 0x10a   : > { %877 = vrot.lane.b32.xlu1 %v5414_v0, %s4900_s20 }
 0x10b   : > { %v685_v19 = vpop.permute.xlu2 %684  ;;  %881 = vrot.lane.b32.xlu0 %v5455_v1, %s4900_s20 }
 0x10c   : > { %757 = vst.msk [vmem:[#allocation3 + $0xc0] sm:$0xff] %vm732_vm3, %v685_v19  ;;  %v665_v60 = vpop.permute.xlu1 %664 }
 0x10d   : > { %747 = vst.msk [vmem:[#allocation3 + $0x70] sm:$0xff] %vm732_vm3, %v665_v60  ;;  %v669_v47 = vpop.permute.xlu0 %668 }
 0x10e   : > { %749 = vst.msk [vmem:[#allocation3 + $0x80] sm:$0xff] %vm732_vm3, %v669_v47  ;;  %v5624_v47 = vld [vmem:[#allocation2 + $0xe1] sm:$0xff] }
 0x111   : > { %885 = vrot.lane.b32.xlu2 %v5443_v11, %s4900_s20 }
 0x112   : > { %883 = vrot.lane.b32.xlu1 %v5402_v9, %s4900_s20 }
 0x113   : > { %v691_v54 = vpop.permute.xlu2 %690  ;;  %887 = vrot.lane.b32.xlu0 %v5450_v37, %s4900_s20 }
 0x114   : > { %760 = vst.msk [vmem:[#allocation3 + $0xd8] sm:$0xff] %vm732_vm3, %v691_v54  ;;  %v671_v0 = vpop.permute.xlu1 %670 }
 0x115   : > { %750 = vst.msk [vmem:[#allocation3 + $0x88] sm:$0xff] %vm732_vm3, %v671_v0  ;;  %v675_v49 = vpop.permute.xlu0 %674 }
 0x116   : > { %752 = vst.msk [vmem:[#allocation3 + $0x98] sm:$0xff] %vm732_vm3, %v675_v49 }
 0x119   : > { %891 = vrot.lane.b32.xlu2 %v5554_v58, %s4900_s20 }
 0x11a   : > { %889 = vrot.lane.b32.xlu1 %v5558_v26, %s4900_s20 }
 0x11b   : > { %v697_v9 = vpop.permute.xlu2 %696  ;;  %1022 = vrot.lane.b32.xlu0 %v5007_v14, %s4901_s21 }
 0x11c   : > { %763 = vst.msk [vmem:[#allocation3 + $0xf0] sm:$0xff] %vm732_vm3, %v697_v9  ;;  %v677_v15 = vpop.permute.xlu1 %676  ;;  %v5637_v9 = vld [vmem:[#allocation2 + $0x109] sm:$0xff] }
 0x11d   : > { %753 = vst.msk [vmem:[#allocation3 + $0xa0] sm:$0xff] %vm732_vm3, %v677_v15  ;;  %v681_v55 = vpop.permute.xlu0 %680 }
 0x11e   : > { %755 = vst.msk [vmem:[#allocation3 + $0xb0] sm:$0xff] %vm732_vm3, %v681_v55 }
 0x121   : > { %1026 = vrot.lane.b32.xlu2 %v4988_v10, %s4901_s21 }
 0x122   : > { %1024 = vrot.lane.b32.xlu1 %v5031_v20, %s4901_s21 }
 0x123   : > { %v832_v48 = vpop.permute.xlu2 %831  ;;  %1028 = vrot.lane.b32.xlu0 %v5017_v16, %s4901_s21 }
 0x124   : > { %927 = vst.msk [vmem:[#allocation3 + $0x8] sm:$0xff] %vm925_vm4, %v832_v48  ;;  %v683_v41 = vpop.permute.xlu1 %682 }
 0x125   : > { %756 = vst.msk [vmem:[#allocation3 + $0xb8] sm:$0xff] %vm732_vm3, %v683_v41  ;;  %v687_v14 = vpop.permute.xlu0 %686  ;;  %v5650_v41 = vld [vmem:[#allocation2 + $0x129] sm:$0xff] }
 0x126   : > { %758 = vst.msk [vmem:[#allocation3 + $0xc8] sm:$0xff] %vm732_vm3, %v687_v14 }
 0x129   : > { %1032 = vrot.lane.b32.xlu2 %v5576_v33, %s4901_s21 }
 0x12a   : > { %1030 = vrot.lane.b32.xlu1 %v5041_v21, %s4901_s21 }
 0x12b   : > { %v838_v10 = vpop.permute.xlu2 %837  ;;  %1034 = vrot.lane.b32.xlu0 %v5043_v22, %s4901_s21  ;;  %v5602_v22 = vld [vmem:[#allocation2 + $0x91] sm:$0xff] }
 0x12c   : > { %930 = vst.msk [vmem:[#allocation3 + $0x20] sm:$0xff] %vm925_vm4, %v838_v10  ;;  %v689_v20 = vpop.permute.xlu1 %688 }
 0x12d   : > { %759 = vst.msk [vmem:[#allocation3 + $0xd0] sm:$0xff] %vm732_vm3, %v689_v20  ;;  %v693_v16 = vpop.permute.xlu0 %692 }
 0x12e   : > { %761 = vst.msk [vmem:[#allocation3 + $0xe0] sm:$0xff] %vm732_vm3, %v693_v16  ;;  %v5663_v16 = vld [vmem:[#allocation2 + $0x151] sm:$0xff] }
 0x131   : > { %1038 = vrot.lane.b32.xlu2 %v5587_v2, %s4901_s21 }
 0x132   : > { %1036 = vrot.lane.b32.xlu1 %v5065_v27, %s4901_s21 }
 0x133   : > { %v844_v21 = vpop.permute.xlu2 %843  ;;  %1040 = vrot.lane.b32.xlu0 %v5067_v28, %s4901_s21  ;;  %v5615_v28 = vld [vmem:[#allocation2 + $0xb1] sm:$0xff] }
 0x134   : > { %933 = vst.msk [vmem:[#allocation3 + $0x38] sm:$0xff] %vm925_vm4, %v844_v21  ;;  %v695_v42 = vpop.permute.xlu1 %694 }
 0x135   : > { %762 = vst.msk [vmem:[#allocation3 + $0xe8] sm:$0xff] %vm732_vm3, %v695_v42  ;;  %v699_v57 = vpop.permute.xlu0 %698 }
 0x136   : > { %764 = vst.msk [vmem:[#allocation3 + $0xf8] sm:$0xff] %vm732_vm3, %v699_v57 }
 0x139   : > { %1044 = vrot.lane.b32.xlu2 %v5598_v43, %s4901_s21 }
 0x13a   : > { %1042 = vrot.lane.b32.xlu1 %v5602_v22, %s4901_s21 }
 0x13b   : > { %v850_v27 = vpop.permute.xlu2 %849  ;;  %1046 = vrot.lane.b32.xlu0 %v5089_v34, %s4901_s21  ;;  %v5628_v34 = vld [vmem:[#allocation2 + $0xd9] sm:$0xff] }
 0x13c   : > { %936 = vst.msk [vmem:[#allocation3 + $0x50] sm:$0xff] %vm925_vm4, %v850_v27  ;;  %v830_v4 = vpop.permute.xlu1 %829  ;;  %v5676_v27 = vld [vmem:[#allocation2 + $0x171] sm:$0xff] }
 0x13d   : > { %926 = vst.msk [vmem:[#allocation3] sm:$0xff] %vm925_vm4, %v830_v4  ;;  %v834_v59 = vpop.permute.xlu0 %833 }
 0x13e   : > { %928 = vst.msk [vmem:[#allocation3 + $0x10] sm:$0xff] %vm925_vm4, %v834_v59 }
 0x141   : > { %1050 = vrot.lane.b32.xlu2 %v5611_v25, %s4901_s21 }
 0x142   : > { %1048 = vrot.lane.b32.xlu1 %v5615_v28, %s4901_s21 }
 0x143   : > { %v856_v19 = vpop.permute.xlu2 %855  ;;  %1052 = vrot.lane.b32.xlu0 %v5110_v40, %s4901_s21  ;;  %v5641_v40 = vld [vmem:[#allocation2 + $0xf9] sm:$0xff] }
 0x144   : > { %939 = vst.msk [vmem:[#allocation3 + $0x68] sm:$0xff] %vm925_vm4, %v856_v19  ;;  %v836_v60 = vpop.permute.xlu1 %835  ;;  %v5687_v19 = vld [vmem:[#allocation2 + $0x181] sm:$0xff] }
 0x145   : > { %929 = vst.msk [vmem:[#allocation3 + $0x18] sm:$0xff] %vm925_vm4, %v836_v60  ;;  %v840_v54 = vpop.permute.xlu0 %839 }
 0x146   : > { %931 = vst.msk [vmem:[#allocation3 + $0x28] sm:$0xff] %vm925_vm4, %v840_v54  ;;  %v5693_v54 = vld [vmem:[#allocation2 + $0x189] sm:$0xff] }
 0x149   : > { %1056 = vrot.lane.b32.xlu2 %v5624_v47, %s4901_s21 }
 0x14a   : > { %1054 = vrot.lane.b32.xlu1 %v5628_v34, %s4901_s21 }
 0x14b   : > { %v862_v0 = vpop.permute.xlu2 %861  ;;  %1058 = vrot.lane.b32.xlu0 %v5133_v46, %s4901_s21  ;;  %v5654_v46 = vld [vmem:[#allocation2 + $0x121] sm:$0xff] }
 0x14c   : > { %942 = vst.msk [vmem:[#allocation3 + $0x80] sm:$0xff] %vm925_vm4, %v862_v0  ;;  %v842_v49 = vpop.permute.xlu1 %841 }
 0x14d   : > { %932 = vst.msk [vmem:[#allocation3 + $0x30] sm:$0xff] %vm925_vm4, %v842_v49  ;;  %v846_v15 = vpop.permute.xlu0 %845 }
 0x14e   : > { %934 = vst.msk [vmem:[#allocation3 + $0x40] sm:$0xff] %vm925_vm4, %v846_v15 }
 0x151   : > { %1062 = vrot.lane.b32.xlu2 %v5637_v9, %s4901_s21 }
 0x152   : > { %1060 = vrot.lane.b32.xlu1 %v5641_v40, %s4901_s21 }
 0x153   : > { %v868_v55 = vpop.permute.xlu2 %867  ;;  %1064 = vrot.lane.b32.xlu0 %v5152_v52, %s4901_s21  ;;  %v5667_v52 = vld [vmem:[#allocation2 + $0x141] sm:$0xff] }
 0x154   : > { %945 = vst.msk [vmem:[#allocation3 + $0x98] sm:$0xff] %vm925_vm4, %v868_v55  ;;  %v848_v48 = vpop.permute.xlu1 %847  ;;  %v5701_v55 = vld [vmem:[#allocation2 + $0x3a] sm:$0xff] }
 0x155   : > { %935 = vst.msk [vmem:[#allocation3 + $0x48] sm:$0xff] %vm925_vm4, %v848_v48  ;;  %v852_v14 = vpop.permute.xlu0 %851  ;;  %v5705_v48 = vld [vmem:[#allocation2 + $0x32] sm:$0xff] }
 0x156   : > { %937 = vst.msk [vmem:[#allocation3 + $0x58] sm:$0xff] %vm925_vm4, %v852_v14 }
 0x159   : > { %1068 = vrot.lane.b32.xlu2 %v5650_v41, %s4901_s21 }
 0x15a   : > { %1066 = vrot.lane.b32.xlu1 %v5654_v46, %s4901_s21 }
 0x15b   : > { %v874_v10 = vpop.permute.xlu2 %873  ;;  %1070 = vrot.lane.b32.xlu0 %v5163_v56, %s4901_s21  ;;  %v5680_v56 = vld [vmem:[#allocation2 + $0x169] sm:$0xff] }
 0x15c   : > { %948 = vst.msk [vmem:[#allocation3 + $0xb0] sm:$0xff] %vm925_vm4, %v874_v10  ;;  %v854_v20 = vpop.permute.xlu1 %853 }
 0x15d   : > { %938 = vst.msk [vmem:[#allocation3 + $0x60] sm:$0xff] %vm925_vm4, %v854_v20  ;;  %v858_v21 = vpop.permute.xlu0 %857 }
 0x15e   : > { %940 = vst.msk [vmem:[#allocation3 + $0x70] sm:$0xff] %vm925_vm4, %v858_v21  ;;  %v5714_v21 = vld [vmem:[#allocation2 + $0x62] sm:$0xff] }
 0x161   : > { %1074 = vrot.lane.b32.xlu2 %v5663_v16, %s4901_s21 }
 0x162   : > { %1072 = vrot.lane.b32.xlu1 %v5667_v52, %s4901_s21 }
 0x163   : > { %v880_v42 = vpop.permute.xlu2 %879  ;;  %1076 = vrot.lane.b32.xlu0 %v5171_v61, %s4901_s21  ;;  %v1151_v61 = vld [vmem:[#allocation2 + $0x1a] sm:$0xff] }
 0x164   : > { %951 = vst.msk [vmem:[#allocation3 + $0xc8] sm:$0xff] %vm925_vm4, %v880_v42  ;;  %v860_v57 = vpop.permute.xlu1 %859 }
 0x165   : > { %941 = vst.msk [vmem:[#allocation3 + $0x78] sm:$0xff] %vm925_vm4, %v860_v57  ;;  %v864_v4 = vpop.permute.xlu0 %863 }
 0x166   : > { %943 = vst.msk [vmem:[#allocation3 + $0x88] sm:$0xff] %vm925_vm4, %v864_v4 }
 0x169   : > { %1080 = vrot.lane.b32.xlu2 %v5676_v27, %s4901_s21 }
 0x16a   : > { %1078 = vrot.lane.b32.xlu1 %v5680_v56, %s4901_s21 }
 0x16b   : > { %v886_v59 = vpop.permute.xlu2 %885  ;;  %1082 = vrot.lane.b32.xlu0 %v5687_v19, %s4901_s21 }
 0x16c   : > { %954 = vst.msk [vmem:[#allocation3 + $0xe0] sm:$0xff] %vm925_vm4, %v886_v59  ;;  %v866_v60 = vpop.permute.xlu1 %865  ;;  %v5727_v59 = vld [vmem:[#allocation2 + $0x82] sm:$0xff] }
 0x16d   : > { %944 = vst.msk [vmem:[#allocation3 + $0x90] sm:$0xff] %vm925_vm4, %v866_v60  ;;  %v870_v0 = vpop.permute.xlu0 %869 }
 0x16e   : > { %946 = vst.msk [vmem:[#allocation3 + $0xa0] sm:$0xff] %vm925_vm4, %v870_v0 }
 0x171   : > { %1215 = vrot.lane.b32.xlu2 %v1151_v61, %s4902_s22 }
 0x172   : > { %1084 = vrot.lane.b32.xlu1 %v5693_v54, %s4901_s21 }
 0x173   : > { %v892_v49 = vpop.permute.xlu2 %891  ;;  %1217 = vrot.lane.b32.xlu0 %v5187_v50, %s4902_s22  ;;  %v5718_v50 = vld [vmem:[#allocation2 + $0x52] sm:$0xff] }
 0x174   : > { %957 = vst.msk [vmem:[#allocation3 + $0xf8] sm:$0xff] %vm925_vm4, %v892_v49  ;;  %v872_v15 = vpop.permute.xlu1 %871 }
 0x175   : > { %947 = vst.msk [vmem:[#allocation3 + $0xa8] sm:$0xff] %vm925_vm4, %v872_v15  ;;  %v876_v14 = vpop.permute.xlu0 %875 }
 0x176   : > { %949 = vst.msk [vmem:[#allocation3 + $0xb8] sm:$0xff] %vm925_vm4, %v876_v14 }
 0x179   : > { %1221 = vrot.lane.b32.xlu2 %v5701_v55, %s4902_s22 }
 0x17a   : > { %1219 = vrot.lane.b32.xlu1 %v5705_v48, %s4902_s22 }
 0x17b   : > { %v1027_v10 = vpop.permute.xlu2 %1026  ;;  %1223 = vrot.lane.b32.xlu0 %v5206_v8, %s4902_s22  ;;  %v5731_v8 = vld [vmem:[#allocation2 + $0x7a] sm:$0xff] }
 0x17c   : > { %1121 = vst.msk [vmem:[#allocation3 + $0x10] sm:$0xff] %vm1118_vm5, %v1027_v10  ;;  %v878_v20 = vpop.permute.xlu1 %877  ;;  %v7934_v10 = vld [vmem:[#allocation34_spill] sm:$0xff] }
 0x17d   : > { %950 = vst.msk [vmem:[#allocation3 + $0xc0] sm:$0xff] %vm925_vm4, %v878_v20  ;;  %v882_v42 = vpop.permute.xlu0 %881 }
 0x17e   : > { %952 = vst.msk [vmem:[#allocation3 + $0xd0] sm:$0xff] %vm925_vm4, %v882_v42 }
 0x181   : > { %1227 = vrot.lane.b32.xlu2 %v5714_v21, %s4902_s22 }
 0x182   : > { %1225 = vrot.lane.b32.xlu1 %v5718_v50, %s4902_s22 }
 0x183   : > { %v1033_v57 = vpop.permute.xlu2 %1032  ;;  %1229 = vrot.lane.b32.xlu0 %v5223_v45, %s4902_s22 }
 0x184   : > { %1124 = vst.msk [vmem:[#allocation3 + $0x28] sm:$0xff] %vm1118_vm5, %v1033_v57  ;;  %v884_v4 = vpop.permute.xlu1 %883  ;;  %v7937_v57 = vld [vmem:[#allocation37_spill] sm:$0xff] }
 0x185   : > { %953 = vst.msk [vmem:[#allocation3 + $0xd8] sm:$0xff] %vm925_vm4, %v884_v4  ;;  %v888_v60 = vpop.permute.xlu0 %887 }
 0x186   : > { %955 = vst.msk [vmem:[#allocation3 + $0xe8] sm:$0xff] %vm925_vm4, %v888_v60  ;;  %v7938_v60 = vld [vmem:[#allocation38_spill] sm:$0xff] }
 0x189   : > { %1233 = vrot.lane.b32.xlu2 %v5727_v59, %s4902_s22 }
 0x18a   : > { %1231 = vrot.lane.b32.xlu1 %v5731_v8, %s4902_s22 }
 0x18b   : > { %v1039_v61 = vpop.permute.xlu2 %1038  ;;  %1235 = vrot.lane.b32.xlu0 %v5252_v39, %s4902_s22 }
 0x18c   : > { %1127 = vst.msk [vmem:[#allocation3 + $0x40] sm:$0xff] %vm1118_vm5, %v1039_v61  ;;  %v890_v0 = vpop.permute.xlu1 %889 }
 0x18d   : > { %956 = vst.msk [vmem:[#allocation3 + $0xf0] sm:$0xff] %vm925_vm4, %v890_v0  ;;  %v1023_v45 = vpop.permute.xlu0 %1022 }
 0x18e   : > { %1119 = vst.msk [vmem:[#allocation3] sm:$0xff] %vm1118_vm5, %v1023_v45  ;;  %v5795_v45 = vld [vmem:[#allocation2 + $0x182] sm:$0xff] }
 0x191   : > { %1239 = vrot.lane.b32.xlu2 %v5281_v62, %s4902_s22  ;;  %v295_v62 = vld [vmem:[#allocation2 + $0x18f] sm:$0x1] }
 0x192   : > { %1237 = vrot.lane.b32.xlu1 %v5265_v32, %s4902_s22  ;;  %313 = vst.msk [vmem:[#allocation2 + $0x191] sm:$0x1] %vm260_vm1, %v295_v62  ;;  %v1345_v62 = vld [vmem:[#allocation2 + $0x30] sm:$0xff] }
 0x193   : > { %v1045_v49 = vpop.permute.xlu2 %1044  ;;  %1241 = vrot.lane.b32.xlu0 %v5269_v44, %s4902_s22 }
 0x194   : > { %1130 = vst.msk [vmem:[#allocation3 + $0x58] sm:$0xff] %vm1118_vm5, %v1045_v49  ;;  %v1025_v15 = vpop.permute.xlu1 %1024  ;;  %v7939_v49 = vld [vmem:[#allocation39_spill] sm:$0xff] }
 0x195   : > { %1120 = vst.msk [vmem:[#allocation3 + $0x8] sm:$0xff] %vm1118_vm5, %v1025_v15  ;;  %v1029_v14 = vpop.permute.xlu0 %1028 }
 0x196   : > { %1122 = vst.msk [vmem:[#allocation3 + $0x18] sm:$0xff] %vm1118_vm5, %v1029_v14 }
 0x199   : > { %1245 = vrot.lane.b32.xlu2 %v5311_v31, %s4902_s22  ;;  %v5804_v14 = vld [vmem:[#allocation2 + $0x18a] sm:$0xff] }
 0x19a   : > { %1243 = vrot.lane.b32.xlu1 %v5298_v35, %s4902_s22 }
 0x19b   : > { %v1051_v39 = vpop.permute.xlu2 %1050  ;;  %1247 = vrot.lane.b32.xlu0 %v5305_v63, %s4902_s22 }
 0x19c   : > { %1133 = vst.msk [vmem:[#allocation3 + $0x70] sm:$0xff] %vm1118_vm5, %v1051_v39  ;;  %v1031_v32 = vpop.permute.xlu1 %1030 }
 0x19d   : > { %1123 = vst.msk [vmem:[#allocation3 + $0x20] sm:$0xff] %vm1118_vm5, %v1031_v32  ;;  %v1035_v44 = vpop.permute.xlu0 %1034  ;;  %v1346_v32 = vld [vmem:[#allocation2 + $0x38] sm:$0xff] }
 0x19e   : > { %1125 = vst.msk [vmem:[#allocation3 + $0x30] sm:$0xff] %vm1118_vm5, %v1035_v44 }
 0x1a1   : > { %1251 = vrot.lane.b32.xlu2 %v5333_v23, %s4902_s22 }
 0x1a2   : > { %1249 = vrot.lane.b32.xlu1 %v5321_v53, %s4902_s22 }
 0x1a3   : > { %v1057_v31 = vpop.permute.xlu2 %1056  ;;  %1253 = vrot.lane.b32.xlu0 %v5324_v29, %s4902_s22  ;;  %v7935_v29 = vld [vmem:[#allocation36_spill] sm:$0xff] }
 0x1a4   : > { %1136 = vst.msk [vmem:[#allocation3 + $0x88] sm:$0xff] %vm1118_vm5, %v1057_v31  ;;  %v1037_v35 = vpop.permute.xlu1 %1036  ;;  %v1347_v31 = vld [vmem:[#allocation2 + $0x48] sm:$0xff] }
 0x1a5   : > { %1126 = vst.msk [vmem:[#allocation3 + $0x38] sm:$0xff] %vm1118_vm5, %v1037_v35  ;;  %v1041_v63 = vpop.permute.xlu0 %1040 }
 0x1a6   : > { %1128 = vst.msk [vmem:[#allocation3 + $0x48] sm:$0xff] %vm1118_vm5, %v1041_v63  ;;  %v1349_v63 = vld [vmem:[#allocation2 + $0x60] sm:$0xff] }
 0x1a9   : > { %1257 = vrot.lane.b32.xlu2 %v5368_v7, %s4902_s22  ;;  %v7936_v7 = vld [vmem:[#allocation35_spill] sm:$0xff] }
 0x1aa   : > { %1255 = vrot.lane.b32.xlu1 %v5352_v30, %s4902_s22 }
 0x1ab   : > { %v1063_v23 = vpop.permute.xlu2 %1062  ;;  %1259 = vrot.lane.b32.xlu0 %v7934_v10, %s4902_s22 }
 0x1ac   : > { %1139 = vst.msk [vmem:[#allocation3 + $0xa0] sm:$0xff] %vm1118_vm5, %v1063_v23  ;;  %v1043_v53 = vpop.permute.xlu1 %1042  ;;  %v1348_v23 = vld [vmem:[#allocation2 + $0x50] sm:$0xff] }
 0x1ad   : > { %1129 = vst.msk [vmem:[#allocation3 + $0x50] sm:$0xff] %vm1118_vm5, %v1043_v53  ;;  %v1047_v20 = vpop.permute.xlu0 %1046 }
 0x1ae   : > { %1131 = vst.msk [vmem:[#allocation3 + $0x60] sm:$0xff] %vm1118_vm5, %v1047_v20  ;;  %v1350_v20 = vld [vmem:[#allocation2 + $0x68] sm:$0xff] }
 0x1b1   : > { %1263 = vrot.lane.b32.xlu2 %v7935_v29, %s4902_s22 }
 0x1b2   : > { %1261 = vrot.lane.b32.xlu1 %v7936_v7, %s4902_s22  ;;  %v1352_v7 = vld [vmem:[#allocation2 + $0x80] sm:$0xff] }
 0x1b3   : > { %v1069_v42 = vpop.permute.xlu2 %1068  ;;  %1265 = vrot.lane.b32.xlu0 %v7937_v57, %s4902_s22 }
 0x1b4   : > { %1142 = vst.msk [vmem:[#allocation3 + $0xb8] sm:$0xff] %vm1118_vm5, %v1069_v42  ;;  %v1049_v30 = vpop.permute.xlu1 %1048  ;;  %v1351_v42 = vld [vmem:[#allocation2 + $0x78] sm:$0xff] }
 0x1b5   : > { %1132 = vst.msk [vmem:[#allocation3 + $0x68] sm:$0xff] %vm1118_vm5, %v1049_v30  ;;  %v1053_v4 = vpop.permute.xlu0 %1052 }
 0x1b6   : > { %1134 = vst.msk [vmem:[#allocation3 + $0x78] sm:$0xff] %vm1118_vm5, %v1053_v4  ;;  %v1353_v4 = vld [vmem:[#allocation2 + $0x90] sm:$0xff] }
 0x1b9   : > { %1269 = vrot.lane.b32.xlu2 %v5426_v5, %s4902_s22 }
 0x1ba   : > { %1267 = vrot.lane.b32.xlu1 %v7938_v60, %s4902_s22 }
 0x1bb   : > { %v1075_v61 = vpop.permute.xlu2 %1074  ;;  %1271 = vrot.lane.b32.xlu0 %v7939_v49, %s4902_s22 }
 0x1bc   : > { %1145 = vst.msk [vmem:[#allocation3 + $0xd0] sm:$0xff] %vm1118_vm5, %v1075_v61  ;;  %v1055_v0 = vpop.permute.xlu1 %1054  ;;  %v1355_v61 = vld [vmem:[#allocation2 + $0xa8] sm:$0xff] }
 0x1bd   : > { %1135 = vst.msk [vmem:[#allocation3 + $0x80] sm:$0xff] %vm1118_vm5, %v1055_v0  ;;  %v1059_v15 = vpop.permute.xlu0 %1058  ;;  %v1354_v0 = vld [vmem:[#allocation2 + $0x98] sm:$0xff] }
 0x1be   : > { %1137 = vst.msk [vmem:[#allocation3 + $0x90] sm:$0xff] %vm1118_vm5, %v1059_v15 }
 0x1c1   : > { %1275 = vrot.lane.b32.xlu2 %v5795_v45, %s4902_s22 }
 0x1c2   : > { %1273 = vrot.lane.b32.xlu1 %v5437_v6, %s4902_s22 }
 0x1c3   : > { %v1081_v5 = vpop.permute.xlu2 %1080  ;;  %1277 = vrot.lane.b32.xlu0 %v5804_v14, %s4902_s22 }
 0x1c4   : > { %1148 = vst.msk [vmem:[#allocation3 + $0xe8] sm:$0xff] %vm1118_vm5, %v1081_v5  ;;  %v1061_v39 = vpop.permute.xlu1 %1060  ;;  %v1356_v5 = vld [vmem:[#allocation2 + $0xb0] sm:$0xff] }
 0x1c5   : > { %1138 = vst.msk [vmem:[#allocation3 + $0x98] sm:$0xff] %vm1118_vm5, %v1061_v39  ;;  %v1065_v44 = vpop.permute.xlu0 %1064 }
 0x1c6   : > { %1140 = vst.msk [vmem:[#allocation3 + $0xa8] sm:$0xff] %vm1118_vm5, %v1065_v44 }
 0x1c9   : > { %1411 = vrot.lane.b32.xlu2 %v1346_v32, %s4903_s23  ;;  %v1358_v32 = vld [vmem:[#allocation2 + $0xc8] sm:$0xff] }
 0x1ca   : > { %1409 = vrot.lane.b32.xlu1 %v1345_v62, %s4903_s23 }
 0x1cb   : > { %v1216_v6 = vpop.permute.xlu2 %1215  ;;  %1413 = vrot.lane.b32.xlu0 %v1347_v31, %s4903_s23 }
 0x1cc   : > { %1312 = vst.msk [vmem:[#allocation3] sm:$0xff] %vm1311_vm6, %v1216_v6  ;;  %v1067_v35 = vpop.permute.xlu1 %1066  ;;  %v1359_v6 = vld [vmem:[#allocation2 + $0xd8] sm:$0xff] }
 0x1cd   : > { %1141 = vst.msk [vmem:[#allocation3 + $0xb0] sm:$0xff] %vm1118_vm5, %v1067_v35  ;;  %v1071_v53 = vpop.permute.xlu0 %1070  ;;  %v1361_v35 = vld [vmem:[#allocation2 + $0xf0] sm:$0xff] }
 0x1ce   : > { %1143 = vst.msk [vmem:[#allocation3 + $0xc0] sm:$0xff] %vm1118_vm5, %v1071_v53  ;;  %v1364_v53 = vld [vmem:[#allocation2 + $0x110] sm:$0xff] }
 0x1d1   : > { %1417 = vrot.lane.b32.xlu2 %v1349_v63, %s4903_s23 }
 0x1d2   : > { %1415 = vrot.lane.b32.xlu1 %v1348_v23, %s4903_s23 }
 0x1d3   : > { %v1222_v10 = vpop.permute.xlu2 %1221  ;;  %1419 = vrot.lane.b32.xlu0 %v1350_v20, %s4903_s23 }
 0x1d4   : > { %1315 = vst.msk [vmem:[#allocation3 + $0x18] sm:$0xff] %vm1311_vm6, %v1222_v10  ;;  %v1073_v29 = vpop.permute.xlu1 %1072  ;;  %v259_v10 = vld [vmem:[#allocation2 + $0x19a] sm:$0x1] }
 0x1d5   : > { %1144 = vst.msk [vmem:[#allocation3 + $0xc8] sm:$0xff] %vm1118_vm5, %v1073_v29  ;;  %v1077_v30 = vpop.permute.xlu0 %1076 }
 0x1d6   : > { %1146 = vst.msk [vmem:[#allocation3 + $0xd8] sm:$0xff] %vm1118_vm5, %v1077_v30  ;;  %v1370_v30 = vld [vmem:[#allocation2 + $0x158] sm:$0xff] }
 0x1d7   : > { %278 = vst.msk [vmem:[#allocation2 + $0x198] sm:$0x1] %vm260_vm1, %v259_v10  ;;  %v1551_v10 = vld [vmem:[#allocation2 + $0xc9] sm:$0xff] }
 0x1d9   : > { %1423 = vrot.lane.b32.xlu2 %v1352_v7, %s4903_s23  ;;  %v1367_v7 = vld [vmem:[#allocation2 + $0x138] sm:$0xff] }
 0x1da   : > { %1421 = vrot.lane.b32.xlu1 %v1351_v42, %s4903_s23 }
 0x1db   : > { %v1228_v57 = vpop.permute.xlu2 %1227  ;;  %1425 = vrot.lane.b32.xlu0 %v1353_v4, %s4903_s23 }
 0x1dc   : > { %1318 = vst.msk [vmem:[#allocation3 + $0x30] sm:$0xff] %vm1311_vm6, %v1228_v57  ;;  %v1079_v60 = vpop.permute.xlu1 %1078 }
 0x1dd   : > { %1147 = vst.msk [vmem:[#allocation3 + $0xe0] sm:$0xff] %vm1118_vm5, %v1079_v60  ;;  %v1083_v49 = vpop.permute.xlu0 %1082  ;;  %v1376_v60 = vld [vmem:[#allocation2 + $0x1a0] sm:$0xff] }
 0x1de   : > { %1149 = vst.msk [vmem:[#allocation3 + $0xf0] sm:$0xff] %vm1118_vm5, %v1083_v49  ;;  %v1540_v49 = vld [vmem:[#allocation2 + $0x49] sm:$0xff] }
 0x1e1   : > { %1429 = vrot.lane.b32.xlu2 %v1355_v61, %s4903_s23 }
 0x1e2   : > { %1427 = vrot.lane.b32.xlu1 %v1354_v0, %s4903_s23 }
 0x1e3   : > { %v1234_v15 = vpop.permute.xlu2 %1233  ;;  %1431 = vrot.lane.b32.xlu0 %v1356_v5, %s4903_s23 }
 0x1e4   : > { %1321 = vst.msk [vmem:[#allocation3 + $0x48] sm:$0xff] %vm1311_vm6, %v1234_v15  ;;  %v1085_v39 = vpop.permute.xlu1 %1084 }
 0x1e5   : > { %1150 = vst.msk [vmem:[#allocation3 + $0xf8] sm:$0xff] %vm1118_vm5, %v1085_v39  ;;  %v1218_v62 = vpop.permute.xlu0 %1217 }
 0x1e6   : > { %1313 = vst.msk [vmem:[#allocation3 + $0x8] sm:$0xff] %vm1311_vm6, %v1218_v62  ;;  %v1542_v62 = vld [vmem:[#allocation2 + $0x61] sm:$0xff] }
 0x1e9   : > { %1435 = vrot.lane.b32.xlu2 %v1358_v32, %s4903_s23  ;;  %v1543_v32 = vld [vmem:[#allocation2 + $0x69] sm:$0xff] }
 0x1ea   : > { %1433 = vrot.lane.b32.xlu1 %v5339_v38, %s4903_s23 }
 0x1eb   : > { %v1240_v44 = vpop.permute.xlu2 %1239  ;;  %1437 = vrot.lane.b32.xlu0 %v1359_v6, %s4903_s23 }
 0x1ec   : > { %1324 = vst.msk [vmem:[#allocation3 + $0x60] sm:$0xff] %vm1311_vm6, %v1240_v44  ;;  %v1220_v31 = vpop.permute.xlu1 %1219 }
 0x1ed   : > { %1314 = vst.msk [vmem:[#allocation3 + $0x10] sm:$0xff] %vm1311_vm6, %v1220_v31  ;;  %v1224_v63 = vpop.permute.xlu0 %1223 }
 0x1ee   : > { %1316 = vst.msk [vmem:[#allocation3 + $0x20] sm:$0xff] %vm1311_vm6, %v1224_v63 }
 0x1f1   : > { %1441 = vrot.lane.b32.xlu2 %v1361_v35, %s4903_s23  ;;  %v1545_v35 = vld [vmem:[#allocation2 + $0x81] sm:$0xff] }
 0x1f2   : > { %1439 = vrot.lane.b32.xlu1 %v5361_v24, %s4903_s23 }
 0x1f3   : > { %v1246_v23 = vpop.permute.xlu2 %1245  ;;  %1443 = vrot.lane.b32.xlu0 %v5341_v36, %s4903_s23 }
 0x1f4   : > { %1327 = vst.msk [vmem:[#allocation3 + $0x78] sm:$0xff] %vm1311_vm6, %v1246_v23  ;;  %v1226_v38 = vpop.permute.xlu1 %1225 }
 0x1f5   : > { %1317 = vst.msk [vmem:[#allocation3 + $0x28] sm:$0xff] %vm1311_vm6, %v1226_v38  ;;  %v1230_v20 = vpop.permute.xlu0 %1229  ;;  %v1548_v38 = vld [vmem:[#allocation2 + $0xa9] sm:$0xff] }
 0x1f6   : > { %1319 = vst.msk [vmem:[#allocation3 + $0x38] sm:$0xff] %vm1311_vm6, %v1230_v20 }
 0x1f9   : > { %1447 = vrot.lane.b32.xlu2 %v1364_v53, %s4903_s23 }
 0x1fa   : > { %1445 = vrot.lane.b32.xlu1 %v5419_v3, %s4903_s23 }
 0x1fb   : > { %v1252_v24 = vpop.permute.xlu2 %1251  ;;  %1449 = vrot.lane.b32.xlu0 %v5406_v12, %s4903_s23 }
 0x1fc   : > { %1330 = vst.msk [vmem:[#allocation3 + $0x90] sm:$0xff] %vm1311_vm6, %v1252_v24  ;;  %v1232_v29 = vpop.permute.xlu1 %1231  ;;  %v1554_v24 = vld [vmem:[#allocation2 + $0xf1] sm:$0xff] }
 0x1fd   : > { %1320 = vst.msk [vmem:[#allocation3 + $0x40] sm:$0xff] %vm1311_vm6, %v1232_v29  ;;  %v1236_v36 = vpop.permute.xlu0 %1235 }
 0x1fe   : > { %1322 = vst.msk [vmem:[#allocation3 + $0x50] sm:$0xff] %vm1311_vm6, %v1236_v36 }
 0x201   : > { %1453 = vrot.lane.b32.xlu2 %v1367_v7, %s4903_s23  ;;  %v1557_v7 = vld [vmem:[#allocation2 + $0x111] sm:$0xff] }
 0x202   : > { %1451 = vrot.lane.b32.xlu1 %v5395_v18, %s4903_s23 }
 0x203   : > { %v1258_v42 = vpop.permute.xlu2 %1257  ;;  %1455 = vrot.lane.b32.xlu0 %v5387_v13, %s4903_s23 }
 0x204   : > { %1333 = vst.msk [vmem:[#allocation3 + $0xa8] sm:$0xff] %vm1311_vm6, %v1258_v42  ;;  %v1238_v3 = vpop.permute.xlu1 %1237  ;;  %v1560_v42 = vld [vmem:[#allocation2 + $0x139] sm:$0xff] }
 0x205   : > { %1323 = vst.msk [vmem:[#allocation3 + $0x58] sm:$0xff] %vm1311_vm6, %v1238_v3  ;;  %v1242_v57 = vpop.permute.xlu0 %1241 }
 0x206   : > { %1325 = vst.msk [vmem:[#allocation3 + $0x68] sm:$0xff] %vm1311_vm6, %v1242_v57 }
 0x209   : > { %1459 = vrot.lane.b32.xlu2 %v1370_v30, %s4903_s23  ;;  %v1563_v30 = vld [vmem:[#allocation2 + $0x159] sm:$0xff] }
 0x20a   : > { %1457 = vrot.lane.b32.xlu1 %v5455_v1, %s4903_s23 }
 0x20b   : > { %v1264_v12 = vpop.permute.xlu2 %1263  ;;  %1461 = vrot.lane.b32.xlu0 %v5443_v11, %s4903_s23  ;;  %v1375_v11 = vld [vmem:[#allocation2 + $0x198] sm:$0xff] }
 0x20c   : > { %1336 = vst.msk [vmem:[#allocation3 + $0xc0] sm:$0xff] %vm1311_vm6, %v1264_v12  ;;  %v1244_v18 = vpop.permute.xlu1 %1243 }
 0x20d   : > { %1326 = vst.msk [vmem:[#allocation3 + $0x70] sm:$0xff] %vm1311_vm6, %v1244_v18  ;;  %v1248_v4 = vpop.permute.xlu0 %1247 }
 0x20e   : > { %1328 = vst.msk [vmem:[#allocation3 + $0x80] sm:$0xff] %vm1311_vm6, %v1248_v4  ;;  %v1569_v4 = vld [vmem:[#allocation2 + $0x1a1] sm:$0xff] }
 0x211   : > { %1465 = vrot.lane.b32.xlu2 %v5558_v26, %s4903_s23 }
 0x212   : > { %1463 = vrot.lane.b32.xlu1 %v5450_v37, %s4903_s23  ;;  %v1538_v37 = vld [vmem:[#allocation2 + $0x31] sm:$0xff] }
 0x213   : > { %v1270_v13 = vpop.permute.xlu2 %1269  ;;  %1467 = vrot.lane.b32.xlu0 %v5554_v58, %s4903_s23  ;;  %v1539_v58 = vld [vmem:[#allocation2 + $0x39] sm:$0xff] }
 0x214   : > { %1339 = vst.msk [vmem:[#allocation3 + $0xd8] sm:$0xff] %vm1311_vm6, %v1270_v13  ;;  %v1250_v1 = vpop.permute.xlu1 %1249  ;;  %v1733_v13 = vld [vmem:[#allocation2 + $0x4a] sm:$0xff] }
 0x215   : > { %1329 = vst.msk [vmem:[#allocation3 + $0x88] sm:$0xff] %vm1311_vm6, %v1250_v1  ;;  %v1254_v61 = vpop.permute.xlu0 %1253 }
 0x216   : > { %1331 = vst.msk [vmem:[#allocation3 + $0x98] sm:$0xff] %vm1311_vm6, %v1254_v61 }
 0x219   : > { %1471 = vrot.lane.b32.xlu2 %v1376_v60, %s4903_s23 }
 0x21a   : > { %1469 = vrot.lane.b32.xlu1 %v1375_v11, %s4903_s23 }
 0x21b   : > { %v1276_v26 = vpop.permute.xlu2 %1275  ;;  %1602 = vrot.lane.b32.xlu0 %v1538_v37, %s4904_s24  ;;  %v1740_v37 = vld [vmem:[#allocation2 + $0x9a] sm:$0xff] }
 0x21c   : > { %1342 = vst.msk [vmem:[#allocation3 + $0xf0] sm:$0xff] %vm1311_vm6, %v1276_v26  ;;  %v1256_v0 = vpop.permute.xlu1 %1255  ;;  %v1739_v26 = vld [vmem:[#allocation2 + $0x92] sm:$0xff] }
 0x21d   : > { %1332 = vst.msk [vmem:[#allocation3 + $0xa0] sm:$0xff] %vm1311_vm6, %v1256_v0  ;;  %v1260_v15 = vpop.permute.xlu0 %1259  ;;  %v1741_v0 = vld [vmem:[#allocation2 + $0xaa] sm:$0xff] }
 0x21e   : > { %1334 = vst.msk [vmem:[#allocation3 + $0xb0] sm:$0xff] %vm1311_vm6, %v1260_v15  ;;  %v1743_v15 = vld [vmem:[#allocation2 + $0xc2] sm:$0xff] }
 0x221   : > { %1606 = vrot.lane.b32.xlu2 %v1540_v49, %s4904_s24 }
 0x222   : > { %1604 = vrot.lane.b32.xlu1 %v1539_v58, %s4904_s24  ;;  %v1742_v58 = vld [vmem:[#allocation2 + $0xb2] sm:$0xff] }
 0x223   : > { %v1412_v5 = vpop.permute.xlu2 %1411  ;;  %1608 = vrot.lane.b32.xlu0 %v5576_v33, %s4904_s24 }
 0x224   : > { %1507 = vst.msk [vmem:[#allocation3 + $0x8] sm:$0xff] %vm1505_vm7, %v1412_v5  ;;  %v1262_v39 = vpop.permute.xlu1 %1261 }
 0x225   : > { %1335 = vst.msk [vmem:[#allocation3 + $0xb8] sm:$0xff] %vm1311_vm6, %v1262_v39  ;;  %v1266_v44 = vpop.permute.xlu0 %1265  ;;  %v1744_v39 = vld [vmem:[#allocation2 + $0xca] sm:$0xff] }
 0x226   : > { %1337 = vst.msk [vmem:[#allocation3 + $0xc8] sm:$0xff] %vm1311_vm6, %v1266_v44 }
 0x229   : > { %1612 = vrot.lane.b32.xlu2 %v1543_v32, %s4904_s24 }
 0x22a   : > { %1610 = vrot.lane.b32.xlu1 %v1542_v62, %s4904_s24  ;;  %v1745_v62 = vld [vmem:[#allocation2 + $0xda] sm:$0xff] }
 0x22b   : > { %v1418_v6 = vpop.permute.xlu2 %1417  ;;  %1614 = vrot.lane.b32.xlu0 %v5587_v2, %s4904_s24 }
 0x22c   : > { %1510 = vst.msk [vmem:[#allocation3 + $0x20] sm:$0xff] %vm1505_vm7, %v1418_v6  ;;  %v1268_v31 = vpop.permute.xlu1 %1267  ;;  %v1746_v6 = vld [vmem:[#allocation2 + $0xe2] sm:$0xff] }
 0x22d   : > { %1338 = vst.msk [vmem:[#allocation3 + $0xd0] sm:$0xff] %vm1311_vm6, %v1268_v31  ;;  %v1272_v63 = vpop.permute.xlu0 %1271 }
 0x22e   : > { %1340 = vst.msk [vmem:[#allocation3 + $0xe0] sm:$0xff] %vm1311_vm6, %v1272_v63 }
 0x231   : > { %1618 = vrot.lane.b32.xlu2 %v5602_v22, %s4904_s24 }
 0x232   : > { %1616 = vrot.lane.b32.xlu1 %v1545_v35, %s4904_s24  ;;  %v1747_v35 = vld [vmem:[#allocation2 + $0xf2] sm:$0xff] }
 0x233   : > { %v1424_v33 = vpop.permute.xlu2 %1423  ;;  %1620 = vrot.lane.b32.xlu0 %v5598_v43, %s4904_s24 }
 0x234   : > { %1513 = vst.msk [vmem:[#allocation3 + $0x38] sm:$0xff] %vm1505_vm7, %v1424_v33  ;;  %v1274_v23 = vpop.permute.xlu1 %1273  ;;  %v1748_v33 = vld [vmem:[#allocation2 + $0xfa] sm:$0xff] }
 0x235   : > { %1341 = vst.msk [vmem:[#allocation3 + $0xe8] sm:$0xff] %vm1311_vm6, %v1274_v23  ;;  %v1278_v2 = vpop.permute.xlu0 %1277 }
 0x236   : > { %1343 = vst.msk [vmem:[#allocation3 + $0xf8] sm:$0xff] %vm1311_vm6, %v1278_v2 }
 0x239   : > { %1624 = vrot.lane.b32.xlu2 %v5615_v28, %s4904_s24 }
 0x23a   : > { %1622 = vrot.lane.b32.xlu1 %v1548_v38, %s4904_s24  ;;  %v1749_v38 = vld [vmem:[#allocation2 + $0x10a] sm:$0xff] }
 0x23b   : > { %v1430_v22 = vpop.permute.xlu2 %1429  ;;  %1626 = vrot.lane.b32.xlu0 %v5611_v25, %s4904_s24 }
 0x23c   : > { %1516 = vst.msk [vmem:[#allocation3 + $0x50] sm:$0xff] %vm1505_vm7, %v1430_v22  ;;  %v1410_v53 = vpop.permute.xlu1 %1409  ;;  %v1750_v22 = vld [vmem:[#allocation2 + $0x112] sm:$0xff] }
 0x23d   : > { %1506 = vst.msk [vmem:[#allocation3] sm:$0xff] %vm1505_vm7, %v1410_v53  ;;  %v1414_v43 = vpop.permute.xlu0 %1413 }
 0x23e   : > { %1508 = vst.msk [vmem:[#allocation3 + $0x10] sm:$0xff] %vm1505_vm7, %v1414_v43 }
 0x241   : > { %1630 = vrot.lane.b32.xlu2 %v5628_v34, %s4904_s24 }
 0x242   : > { %1628 = vrot.lane.b32.xlu1 %v1551_v10, %s4904_s24  ;;  %v1751_v10 = vld [vmem:[#allocation2 + $0x122] sm:$0xff] }
 0x243   : > { %v1436_v28 = vpop.permute.xlu2 %1435  ;;  %1632 = vrot.lane.b32.xlu0 %v5624_v47, %s4904_s24 }
 0x244   : > { %1519 = vst.msk [vmem:[#allocation3 + $0x68] sm:$0xff] %vm1505_vm7, %v1436_v28  ;;  %v1416_v20 = vpop.permute.xlu1 %1415 }
 0x245   : > { %1509 = vst.msk [vmem:[#allocation3 + $0x18] sm:$0xff] %vm1505_vm7, %v1416_v20  ;;  %v1420_v25 = vpop.permute.xlu0 %1419  ;;  %v1753_v20 = vld [vmem:[#allocation2 + $0x13a] sm:$0xff] }
 0x246   : > { %1511 = vst.msk [vmem:[#allocation3 + $0x28] sm:$0xff] %vm1505_vm7, %v1420_v25 }
 0x249   : > { %1636 = vrot.lane.b32.xlu2 %v5641_v40, %s4904_s24 }
 0x24a   : > { %1634 = vrot.lane.b32.xlu1 %v1554_v24, %s4904_s24 }
 0x24b   : > { %v1442_v34 = vpop.permute.xlu2 %1441  ;;  %1638 = vrot.lane.b32.xlu0 %v5637_v9, %s4904_s24 }
 0x24c   : > { %1522 = vst.msk [vmem:[#allocation3 + $0x80] sm:$0xff] %vm1505_vm7, %v1442_v34  ;;  %v1422_v29 = vpop.permute.xlu1 %1421  ;;  %v1754_v34 = vld [vmem:[#allocation2 + $0x142] sm:$0xff] }
 0x24d   : > { %1512 = vst.msk [vmem:[#allocation3 + $0x30] sm:$0xff] %vm1505_vm7, %v1422_v29  ;;  %v1426_v47 = vpop.permute.xlu0 %1425 }
 0x24e   : > { %1514 = vst.msk [vmem:[#allocation3 + $0x40] sm:$0xff] %vm1505_vm7, %v1426_v47 }
 0x251   : > { %1642 = vrot.lane.b32.xlu2 %v5654_v46, %s4904_s24 }
 0x252   : > { %1640 = vrot.lane.b32.xlu1 %v1557_v7, %s4904_s24 }
 0x253   : > { %v1448_v40 = vpop.permute.xlu2 %1447  ;;  %1644 = vrot.lane.b32.xlu0 %v5650_v41, %s4904_s24 }
 0x254   : > { %1525 = vst.msk [vmem:[#allocation3 + $0x98] sm:$0xff] %vm1505_vm7, %v1448_v40  ;;  %v1428_v36 = vpop.permute.xlu1 %1427  ;;  %v1752_v40 = vld [vmem:[#allocation2 + $0x12a] sm:$0xff] }
 0x255   : > { %1515 = vst.msk [vmem:[#allocation3 + $0x48] sm:$0xff] %vm1505_vm7, %v1428_v36  ;;  %v1432_v9 = vpop.permute.xlu0 %1431  ;;  %v1960_v36 = vld [vmem:[%s7839_s1 + $0x20] sm:$0xf] }
 0x256   : > { %1517 = vst.msk [vmem:[#allocation3 + $0x58] sm:$0xff] %vm1505_vm7, %v1432_v9  ;;  %4790 = vmatpush.msk.msra.mxu0 %vm2058_vm9, %v1960_v36  ;;  %4860 = vmatpush.msk.msra.mxu2 %vm2058_vm9, %v1960_v36 }
 0x259   : > { %1648 = vrot.lane.b32.xlu2 %v5667_v52, %s4904_s24 }
 0x25a   : > { %1646 = vrot.lane.b32.xlu1 %v1560_v42, %s4904_s24 }
 0x25b   : > { %v1454_v46 = vpop.permute.xlu2 %1453  ;;  %1650 = vrot.lane.b32.xlu0 %v5663_v16, %s4904_s24 }
 0x25c   : > { %1528 = vst.msk [vmem:[#allocation3 + $0xb0] sm:$0xff] %vm1505_vm7, %v1454_v46  ;;  %v1434_v3 = vpop.permute.xlu1 %1433 }
 0x25d   : > { %1518 = vst.msk [vmem:[#allocation3 + $0x60] sm:$0xff] %vm1505_vm7, %v1434_v3  ;;  %v1438_v41 = vpop.permute.xlu0 %1437  ;;  %v1959_v3 = vld [vmem:[%s7839_s1 + $0x18] sm:$0xff] }
 0x25e   : > { %1520 = vst.msk [vmem:[#allocation3 + $0x70] sm:$0xff] %vm1505_vm7, %v1438_v41  ;;  %2074 = vmatpush.msra.mxu0 %v1959_v3  ;;  %4861 = vmatpush.msra.mxu2 %v1959_v3 }
 0x261   : > { %1654 = vrot.lane.b32.xlu2 %v5680_v56, %s4904_s24  ;;  %v1568_v56 = vld [vmem:[#allocation2 + $0x199] sm:$0xff] }
 0x262   : > { %1652 = vrot.lane.b32.xlu1 %v1563_v30, %s4904_s24  ;;  %v1958_v30 = vld [vmem:[%s7839_s1 + $0x10] sm:$0xff] }
 0x263   : > { %v1460_v52 = vpop.permute.xlu2 %1459  ;;  %1656 = vrot.lane.b32.xlu0 %v5676_v27, %s4904_s24  ;;  %2075 = vmatpush.msra.mxu0 %v1958_v30 }
 0x264   : > { %1531 = vst.msk [vmem:[#allocation3 + $0xc8] sm:$0xff] %vm1505_vm7, %v1460_v52  ;;  %v1440_v57 = vpop.permute.xlu1 %1439  ;;  %v1756_v52 = vld [vmem:[#allocation2 + $0x15a] sm:$0xff]  ;;  %4862 = vmatpush.msra.mxu2 %v1958_v30 }
 0x265   : > { %1521 = vst.msk [vmem:[#allocation3 + $0x78] sm:$0xff] %vm1505_vm7, %v1440_v57  ;;  %v1444_v12 = vpop.permute.xlu0 %1443  ;;  %v1957_v57 = vld [vmem:[%s7839_s1 + $0x8] sm:$0xff] }
 0x266   : > { %1523 = vst.msk [vmem:[#allocation3 + $0x88] sm:$0xff] %vm1505_vm7, %v1444_v12  ;;  %2076 = vmatpush.msra.mxu0 %v1957_v57  ;;  %4863 = vmatpush.msra.mxu2 %v1957_v57 }
 0x269   : > { %1660 = vrot.lane.b32.xlu2 %v5693_v54, %s4904_s24 }
 0x26a   : > { %1658 = vrot.lane.b32.xlu1 %v5687_v19, %s4904_s24 }
 0x26b   : > { %v1466_v16 = vpop.permute.xlu2 %1465  ;;  %1662 = vrot.lane.b32.xlu0 %v1568_v56, %s4904_s24 }
 0x26c   : > { %1534 = vst.msk [vmem:[#allocation3 + $0xe0] sm:$0xff] %vm1505_vm7, %v1466_v16  ;;  %v1446_v18 = vpop.permute.xlu1 %1445  ;;  %v1956_v16 = vld [vmem:[%s7839_s1] sm:$0xff] }
 0x26d   : > { %1524 = vst.msk [vmem:[#allocation3 + $0x90] sm:$0xff] %vm1505_vm7, %v1446_v18  ;;  %v1450_v27 = vpop.permute.xlu0 %1449  ;;  %2077 = vmatpush.msra.mxu0 %v1956_v16  ;;  %4864 = vmatpush.msra.mxu2 %v1956_v16  ;;  %v1757_v18 = vld [vmem:[#allocation2 + $0x16a] sm:$0xff] }
 0x26e   : > { %1526 = vst.msk [vmem:[#allocation3 + $0xa0] sm:$0xff] %vm1505_vm7, %v1450_v27 }
 0x271   : > { %1795 = vrot.lane.b32.xlu2 %v5705_v48, %s4905_s25 }
 0x272   : > { %1664 = vrot.lane.b32.xlu1 %v1569_v4, %s4904_s24 }
 0x273   : > { %v1472_v19 = vpop.permute.xlu2 %1471  ;;  %1797 = vrot.lane.b32.xlu0 %v5701_v55, %s4905_s25  ;;  %v1736_v55 = vld [vmem:[#allocation2 + $0x6a] sm:$0xff] }
 0x274   : > { %1537 = vst.msk [vmem:[#allocation3 + $0xf8] sm:$0xff] %vm1505_vm7, %v1472_v19  ;;  %v1452_v54 = vpop.permute.xlu1 %1451 }
 0x275   : > { %1527 = vst.msk [vmem:[#allocation3 + $0xa8] sm:$0xff] %vm1505_vm7, %v1452_v54  ;;  %v1456_v1 = vpop.permute.xlu0 %1455  ;;  %v1755_v54 = vld [vmem:[#allocation2 + $0x152] sm:$0xff] }
 0x276   : > { %1529 = vst.msk [vmem:[#allocation3 + $0xb8] sm:$0xff] %vm1505_vm7, %v1456_v1 }
 0x279   : > { %1801 = vrot.lane.b32.xlu2 %v5718_v50, %s4905_s25 }
 0x27a   : > { %1799 = vrot.lane.b32.xlu1 %v1733_v13, %s4905_s25 }
 0x27b   : > { %v1607_v48 = vpop.permute.xlu2 %1606  ;;  %1803 = vrot.lane.b32.xlu0 %v5714_v21, %s4905_s25 }
 0x27c   : > { %1701 = vst.msk [vmem:[#allocation3 + $0x10] sm:$0xff] %vm1698_vm8, %v1607_v48  ;;  %v1458_v60 = vpop.permute.xlu1 %1457 }
 0x27d   : > { %1530 = vst.msk [vmem:[#allocation3 + $0xc0] sm:$0xff] %vm1505_vm7, %v1458_v60  ;;  %v1462_v11 = vpop.permute.xlu0 %1461 }
 0x27e   : > { %1532 = vst.msk [vmem:[#allocation3 + $0xd0] sm:$0xff] %vm1505_vm7, %v1462_v11 }
 0x281   : > { %1807 = vrot.lane.b32.xlu2 %v5731_v8, %s4905_s25 }
 0x282   : > { %1805 = vrot.lane.b32.xlu1 %v1736_v55, %s4905_s25 }
 0x283   : > { %v1613_v50 = vpop.permute.xlu2 %1612  ;;  %1809 = vrot.lane.b32.xlu0 %v5727_v59, %s4905_s25 }
 0x284   : > { %1704 = vst.msk [vmem:[#allocation3 + $0x28] sm:$0xff] %vm1698_vm8, %v1613_v50  ;;  %v1464_v61 = vpop.permute.xlu1 %1463 }
 0x285   : > { %1533 = vst.msk [vmem:[#allocation3 + $0xd8] sm:$0xff] %vm1505_vm7, %v1464_v61  ;;  %v1468_v21 = vpop.permute.xlu0 %1467 }
 0x286   : > { %1535 = vst.msk [vmem:[#allocation3 + $0xe8] sm:$0xff] %vm1505_vm7, %v1468_v21 }
 0x289   : > { %1813 = vrot.lane.b32.xlu2 %v1740_v37, %s4905_s25  ;;  %v296_v37 = vld [vmem:[#allocation2 + $0x1a7] sm:$0x1] }
 0x28a   : > { %1811 = vrot.lane.b32.xlu1 %v1739_v26, %s4905_s25  ;;  %v1758_v26 = vld [vmem:[#allocation2 + $0x172] sm:$0xff]  ;;  %314 = vst.msk [vmem:[#allocation2 + $0x1a9] sm:$0x1] %vm260_vm1, %v296_v37 }
 0x28b   : > { %v1619_v8 = vpop.permute.xlu2 %1618  ;;  %1815 = vrot.lane.b32.xlu0 %v1741_v0, %s4905_s25 }
 0x28c   : > { %1707 = vst.msk [vmem:[#allocation3 + $0x40] sm:$0xff] %vm1698_vm8, %v1619_v8  ;;  %v1470_v49 = vpop.permute.xlu1 %1469 }
 0x28d   : > { %1536 = vst.msk [vmem:[#allocation3 + $0xf0] sm:$0xff] %vm1505_vm7, %v1470_v49  ;;  %v1603_v59 = vpop.permute.xlu0 %1602 }
 0x28e   : > { %1699 = vst.msk [vmem:[#allocation3] sm:$0xff] %vm1698_vm8, %v1603_v59 }
 0x291   : > { %1819 = vrot.lane.b32.xlu2 %v1743_v15, %s4905_s25  ;;  %v1762_v59 = vld [vmem:[#allocation2 + $0x1a2] sm:$0xff] }
 0x292   : > { %1817 = vrot.lane.b32.xlu1 %v1742_v58, %s4905_s25 }
 0x293   : > { %v1625_v5 = vpop.permute.xlu2 %1624  ;;  %1821 = vrot.lane.b32.xlu0 %v1744_v39, %s4905_s25 }
 0x294   : > { %1710 = vst.msk [vmem:[#allocation3 + $0x58] sm:$0xff] %vm1698_vm8, %v1625_v5  ;;  %v1605_v32 = vpop.permute.xlu1 %1604 }
 0x295   : > { %1700 = vst.msk [vmem:[#allocation3 + $0x8] sm:$0xff] %vm1698_vm8, %v1605_v32  ;;  %v1609_v44 = vpop.permute.xlu0 %1608 }
 0x296   : > { %1702 = vst.msk [vmem:[#allocation3 + $0x18] sm:$0xff] %vm1698_vm8, %v1609_v44 }
 0x299   : > { %1825 = vrot.lane.b32.xlu2 %v1746_v6, %s4905_s25 }
 0x29a   : > { %1823 = vrot.lane.b32.xlu1 %v1745_v62, %s4905_s25 }
 0x29b   : > { %v1631_v31 = vpop.permute.xlu2 %1630  ;;  %1827 = vrot.lane.b32.xlu0 %v1747_v35, %s4905_s25 }
 0x29c   : > { %1713 = vst.msk [vmem:[#allocation3 + $0x70] sm:$0xff] %vm1698_vm8, %v1631_v31  ;;  %v1611_v63 = vpop.permute.xlu1 %1610  ;;  %v1761_v31 = vld [vmem:[#allocation2 + $0x19a] sm:$0xff] }
 0x29d   : > { %1703 = vst.msk [vmem:[#allocation3 + $0x20] sm:$0xff] %vm1698_vm8, %v1611_v63  ;;  %v1615_v23 = vpop.permute.xlu0 %1614 }
 0x29e   : > { %1705 = vst.msk [vmem:[#allocation3 + $0x30] sm:$0xff] %vm1698_vm8, %v1615_v23 }
 0x2a1   : > { %1831 = vrot.lane.b32.xlu2 %v1749_v38, %s4905_s25 }
 0x2a2   : > { %1829 = vrot.lane.b32.xlu1 %v1748_v33, %s4905_s25 }
 0x2a3   : > { %v1637_v2 = vpop.permute.xlu2 %1636  ;;  %1833 = vrot.lane.b32.xlu0 %v1750_v22, %s4905_s25 }
 0x2a4   : > { %1716 = vst.msk [vmem:[#allocation3 + $0x88] sm:$0xff] %vm1698_vm8, %v1637_v2  ;;  %v1617_v53 = vpop.permute.xlu1 %1616 }
 0x2a5   : > { %1706 = vst.msk [vmem:[#allocation3 + $0x38] sm:$0xff] %vm1698_vm8, %v1617_v53  ;;  %v1621_v43 = vpop.permute.xlu0 %1620 }
 0x2a6   : > { %1708 = vst.msk [vmem:[#allocation3 + $0x48] sm:$0xff] %vm1698_vm8, %v1621_v43 }
 0x2a9   : > { %1837 = vrot.lane.b32.xlu2 %v1752_v40, %s4905_s25 }
 0x2aa   : > { %1835 = vrot.lane.b32.xlu1 %v1751_v10, %s4905_s25 }
 0x2ab   : > { %v1643_v28 = vpop.permute.xlu2 %1642  ;;  %1839 = vrot.lane.b32.xlu0 %v1753_v20, %s4905_s25 }
 0x2ac   : > { %1719 = vst.msk [vmem:[#allocation3 + $0xa0] sm:$0xff] %vm1698_vm8, %v1643_v28  ;;  %v1623_v24 = vpop.permute.xlu1 %1622 }
 0x2ad   : > { %1709 = vst.msk [vmem:[#allocation3 + $0x50] sm:$0xff] %vm1698_vm8, %v1623_v24  ;;  %v1627_v25 = vpop.permute.xlu0 %1626 }
 0x2ae   : > { %1711 = vst.msk [vmem:[#allocation3 + $0x60] sm:$0xff] %vm1698_vm8, %v1627_v25 }
 0x2b1   : > { %1843 = vrot.lane.b32.xlu2 %v1755_v54, %s4905_s25 }
 0x2b2   : > { %1841 = vrot.lane.b32.xlu1 %v1754_v34, %s4905_s25 }
 0x2b3   : > { %v1649_v29 = vpop.permute.xlu2 %1648  ;;  %1845 = vrot.lane.b32.xlu0 %v1756_v52, %s4905_s25 }
 0x2b4   : > { %1722 = vst.msk [vmem:[#allocation3 + $0xb8] sm:$0xff] %vm1698_vm8, %v1649_v29  ;;  %v1629_v7 = vpop.permute.xlu1 %1628 }
 0x2b5   : > { %1712 = vst.msk [vmem:[#allocation3 + $0x68] sm:$0xff] %vm1698_vm8, %v1629_v7  ;;  %v1633_v47 = vpop.permute.xlu0 %1632 }
 0x2b6   : > { %1714 = vst.msk [vmem:[#allocation3 + $0x78] sm:$0xff] %vm1698_vm8, %v1633_v47 }
 0x2b9   : > { %1849 = vrot.lane.b32.xlu2 %v1758_v26, %s4905_s25 }
 0x2ba   : > { %1847 = vrot.lane.b32.xlu1 %v1757_v18, %s4905_s25 }
 0x2bb   : > { %v1655_v42 = vpop.permute.xlu2 %1654  ;;  %1851 = vrot.lane.b32.xlu0 %v5795_v45, %s4905_s25 }
 0x2bc   : > { %1725 = vst.msk [vmem:[#allocation3 + $0xd0] sm:$0xff] %vm1698_vm8, %v1655_v42  ;;  %v1635_v9 = vpop.permute.xlu1 %1634 }
 0x2bd   : > { %1715 = vst.msk [vmem:[#allocation3 + $0x80] sm:$0xff] %vm1698_vm8, %v1635_v9  ;;  %v1639_v46 = vpop.permute.xlu0 %1638 }
 0x2be   : > { %1717 = vst.msk [vmem:[#allocation3 + $0x90] sm:$0xff] %vm1698_vm8, %v1639_v46 }
 0x2c1   : > { %1855 = vrot.lane.b32.xlu2 %v1761_v31, %s4905_s25 }
 0x2c2   : > { %1853 = vrot.lane.b32.xlu1 %v5804_v14, %s4905_s25 }
 0x2c3   : > { %v1661_v41 = vpop.permute.xlu2 %1660  ;;  %1857 = vrot.lane.b32.xlu0 %v1762_v59, %s4905_s25 }
 0x2c4   : > { %1728 = vst.msk [vmem:[#allocation3 + $0xe8] sm:$0xff] %vm1698_vm8, %v1661_v41  ;;  %v1641_v12 = vpop.permute.xlu1 %1640 }
 0x2c5   : > { %1718 = vst.msk [vmem:[#allocation3 + $0x98] sm:$0xff] %vm1698_vm8, %v1641_v12  ;;  %v1645_v56 = vpop.permute.xlu0 %1644 }
 0x2c6   : > { %1720 = vst.msk [vmem:[#allocation3 + $0xa8] sm:$0xff] %vm1698_vm8, %v1645_v56 }
 0x2cb   : > { %v1796_v4 = vpop.permute.xlu2 %1795 }
 0x2cc   : > { %1892 = vst.msk [vmem:[#allocation3] sm:$0xff] %vm1891_vm10, %v1796_v4  ;;  %v1647_v27 = vpop.permute.xlu1 %1646 }
 0x2cd   : > { %1721 = vst.msk [vmem:[#allocation3 + $0xb0] sm:$0xff] %vm1698_vm8, %v1647_v27  ;;  %v1651_v19 = vpop.permute.xlu0 %1650 }
 0x2ce   : > { %1723 = vst.msk [vmem:[#allocation3 + $0xc0] sm:$0xff] %vm1698_vm8, %v1651_v19 }
 0x2d3   : > { %v1924_v13 = vld [vmem:[#allocation3] sm:$0xff]  ;;  %v1802_v48 = vpop.permute.xlu2 %1801 }
 0x2d4   : > { %4791 = vmatmul.msk.f32.vlgmr.msra.gmra.mxu0 %vm1961_vm11, %v1924_v13  ;;  %v1653_v1 = vpop.permute.xlu1 %1652  ;;  %1895 = vst.msk [vmem:[#allocation3 + $0x18] sm:$0xff] %vm1891_vm10, %v1802_v48 }
 0x2d5   : > { %1724 = vst.msk [vmem:[#allocation3 + $0xc8] sm:$0xff] %vm1698_vm8, %v1653_v1  ;;  %v1657_v45 = vpop.permute.xlu0 %1656 }
 0x2d6   : > { %1726 = vst.msk [vmem:[#allocation3 + $0xd8] sm:$0xff] %vm1698_vm8, %v1657_v45 }
 0x2db   : > { %v1808_v11 = vpop.permute.xlu2 %1807  ;;  %v1927_v62 = vld [vmem:[#allocation3 + $0x18] sm:$0xff] }
 0x2dc   : > { %v1659_v60 = vpop.permute.xlu1 %1658  ;;  %1898 = vst.msk [vmem:[#allocation3 + $0x30] sm:$0xff] %vm1891_vm10, %v1808_v11 }
 0x2dd   : > { %1727 = vst.msk [vmem:[#allocation3 + $0xe0] sm:$0xff] %vm1698_vm8, %v1659_v60  ;;  %v1663_v55 = vpop.permute.xlu0 %1662 }
 0x2de   : > { %1729 = vst.msk [vmem:[#allocation3 + $0xf0] sm:$0xff] %vm1698_vm8, %v1663_v55 }
 0x2e3   : > { %v1814_v61 = vpop.permute.xlu2 %1813  ;;  %v1930_v10 = vld [vmem:[#allocation3 + $0x30] sm:$0xff] }
 0x2e4   : > { %v1665_v14 = vpop.permute.xlu1 %1664  ;;  %1901 = vst.msk [vmem:[#allocation3 + $0x48] sm:$0xff] %vm1891_vm10, %v1814_v61 }
 0x2e5   : > { %1730 = vst.msk [vmem:[#allocation3 + $0xf8] sm:$0xff] %vm1698_vm8, %v1665_v14  ;;  %v1798_v50 = vpop.permute.xlu0 %1797 }
 0x2e6   : > { %1893 = vst.msk [vmem:[#allocation3 + $0x8] sm:$0xff] %vm1891_vm10, %v1798_v50 }
 0x2eb   : > { %v1820_v49 = vpop.permute.xlu2 %1819  ;;  %v1933_v42 = vld [vmem:[#allocation3 + $0x48] sm:$0xff] }
 0x2ec   : > { %v1800_v21 = vpop.permute.xlu1 %1799  ;;  %1904 = vst.msk [vmem:[#allocation3 + $0x60] sm:$0xff] %vm1891_vm10, %v1820_v49 }
 0x2ed   : > { %1894 = vst.msk [vmem:[#allocation3 + $0x10] sm:$0xff] %vm1891_vm10, %v1800_v21  ;;  %v1804_v8 = vpop.permute.xlu0 %1803  ;;  %v1925_v0 = vld [vmem:[#allocation3 + $0x8] sm:$0xff] }
 0x2ee   : > { %1896 = vst.msk [vmem:[#allocation3 + $0x20] sm:$0xff] %vm1891_vm10, %v1804_v8  ;;  %4792 = vmatmul.msk.f32.gmra.mxu0 %vm1961_vm11, %v1925_v0 }
 0x2f3   : > { %v1826_v39 = vpop.permute.xlu2 %1825  ;;  %v1936_v16 = vld [vmem:[#allocation3 + $0x60] sm:$0xff] }
 0x2f4   : > { %v1806_v58 = vpop.permute.xlu1 %1805  ;;  %v1926_v15 = vld [vmem:[#allocation3 + $0x10] sm:$0xff]  ;;  %1907 = vst.msk [vmem:[#allocation3 + $0x78] sm:$0xff] %vm1891_vm10, %v1826_v39 }
 0x2f5   : > { %1897 = vst.msk [vmem:[#allocation3 + $0x28] sm:$0xff] %vm1891_vm10, %v1806_v58  ;;  %v1810_v5 = vpop.permute.xlu0 %1809  ;;  %v1928_v33 = vld [vmem:[#allocation3 + $0x20] sm:$0xff] }
 0x2f6   : > { %1899 = vst.msk [vmem:[#allocation3 + $0x38] sm:$0xff] %vm1891_vm10, %v1810_v5  ;;  %4793 = vmatmul.msk.f32.gmra.mxu0 %vm1961_vm11, %v1926_v15 }
 0x2fb   : > { %v1832_v6 = vpop.permute.xlu2 %1831  ;;  %v1939_v1 = vld [vmem:[#allocation3 + $0x78] sm:$0xff] }
 0x2fc   : > { %v1812_v32 = vpop.permute.xlu1 %1811  ;;  %1910 = vst.msk [vmem:[#allocation3 + $0x90] sm:$0xff] %vm1891_vm10, %v1832_v6  ;;  %v1929_v2 = vld [vmem:[#allocation3 + $0x28] sm:$0xff] }
 0x2fd   : > { %1900 = vst.msk [vmem:[#allocation3 + $0x40] sm:$0xff] %vm1891_vm10, %v1812_v32  ;;  %v1816_v44 = vpop.permute.xlu0 %1815  ;;  %v1931_v25 = vld [vmem:[#allocation3 + $0x38] sm:$0xff] }
 0x2fe   : > { %1902 = vst.msk [vmem:[#allocation3 + $0x50] sm:$0xff] %vm1891_vm10, %v1816_v44  ;;  %4794 = vmatmul.msk.f32.gmra.mxu0 %vm1961_vm11, %v1927_v62 }
 0x303   : > { %v1838_v53 = vpop.permute.xlu2 %1837  ;;  %v1942_v7 = vld [vmem:[#allocation3 + $0x90] sm:$0xff] }
 0x304   : > { %v1818_v35 = vpop.permute.xlu1 %1817  ;;  %1913 = vst.msk [vmem:[#allocation3 + $0xa8] sm:$0xff] %vm1891_vm10, %v1838_v53  ;;  %v1932_v47 = vld [vmem:[#allocation3 + $0x40] sm:$0xff] }
 0x305   : > { %1903 = vst.msk [vmem:[#allocation3 + $0x58] sm:$0xff] %vm1891_vm10, %v1818_v35  ;;  %v1822_v63 = vpop.permute.xlu0 %1821  ;;  %v1934_v3 = vld [vmem:[#allocation3 + $0x50] sm:$0xff] }
 0x306   : > { %1905 = vst.msk [vmem:[#allocation3 + $0x68] sm:$0xff] %vm1891_vm10, %v1822_v63  ;;  %4795 = vmatmul.msk.f32.gmra.mxu0 %vm1961_vm11, %v1928_v33 }
 0x30b   : > { %v1844_v40 = vpop.permute.xlu2 %1843  ;;  %v1945_v41 = vld [vmem:[#allocation3 + $0xa8] sm:$0xff] }
 0x30c   : > { %v1824_v23 = vpop.permute.xlu1 %1823  ;;  %1916 = vst.msk [vmem:[#allocation3 + $0xc0] sm:$0xff] %vm1891_vm10, %v1844_v40  ;;  %v1935_v52 = vld [vmem:[#allocation3 + $0x58] sm:$0xff] }
 0x30d   : > { %1906 = vst.msk [vmem:[#allocation3 + $0x70] sm:$0xff] %vm1891_vm10, %v1824_v23  ;;  %v1828_v38 = vpop.permute.xlu0 %1827  ;;  %v1937_v18 = vld [vmem:[#allocation3 + $0x68] sm:$0xff] }
 0x30e   : > { %1908 = vst.msk [vmem:[#allocation3 + $0x80] sm:$0xff] %vm1891_vm10, %v1828_v38  ;;  %4796 = vmatmul.msk.f32.gmra.mxu0 %vm1961_vm11, %v1929_v2 }
 0x313   : > { %v1850_v57 = vpop.permute.xlu2 %1849  ;;  %v1948_v27 = vld [vmem:[#allocation3 + $0xc0] sm:$0xff] }
 0x314   : > { %v1830_v22 = vpop.permute.xlu1 %1829  ;;  %1919 = vst.msk [vmem:[#allocation3 + $0xd8] sm:$0xff] %vm1891_vm10, %v1850_v57  ;;  %v1938_v19 = vld [vmem:[#allocation3 + $0x70] sm:$0xff] }
 0x315   : > { %1909 = vst.msk [vmem:[#allocation3 + $0x88] sm:$0xff] %vm1891_vm10, %v1830_v22  ;;  %v1940_v43 = vld [vmem:[#allocation3 + $0x80] sm:$0xff]  ;;  %v1834_v28 = vpop.permute.xlu0 %1833 }
 0x316   : > { %4797 = vmatmul.msk.f32.gmra.mxu0 %vm1961_vm11, %v1930_v10  ;;  %4807 = vmatmul.msk.f32.vlgmr.msra.gmra.mxu2 %vm1961_vm11, %v1940_v43  ;;  %1911 = vst.msk [vmem:[#allocation3 + $0x98] sm:$0xff] %vm1891_vm10, %v1834_v28 }
 0x31b   : > { %v1856_v45 = vpop.permute.xlu2 %1855  ;;  %v1951_v14 = vld [vmem:[#allocation3 + $0xd8] sm:$0xff] }
 0x31c   : > { %v1836_v20 = vpop.permute.xlu1 %1835  ;;  %v1941_v24 = vld [vmem:[#allocation3 + $0x88] sm:$0xff]  ;;  %1922 = vst.msk [vmem:[#allocation3 + $0xf0] sm:$0xff] %vm1891_vm10, %v1856_v45 }
 0x31d   : > { %1912 = vst.msk [vmem:[#allocation3 + $0xa0] sm:$0xff] %vm1891_vm10, %v1836_v20  ;;  %v1840_v34 = vpop.permute.xlu0 %1839  ;;  %v1943_v36 = vld [vmem:[#allocation3 + $0x98] sm:$0xff] }
 0x31e   : > { %4798 = vmatmul.msk.f32.gmra.mxu0 %vm1961_vm11, %v1931_v25  ;;  %4808 = vmatmul.msk.f32.gmra.mxu2 %vm1961_vm11, %v1941_v24  ;;  %1914 = vst.msk [vmem:[#allocation3 + $0xb0] sm:$0xff] %vm1891_vm10, %v1840_v34 }
 0x323   : > { %v1954_v8 = vld [vmem:[#allocation3 + $0xf0] sm:$0xff] }
 0x324   : > { %v1842_v29 = vpop.permute.xlu1 %1841  ;;  %v1944_v46 = vld [vmem:[#allocation3 + $0xa0] sm:$0xff] }
 0x325   : > { %1915 = vst.msk [vmem:[#allocation3 + $0xb8] sm:$0xff] %vm1891_vm10, %v1842_v29  ;;  %v1846_v9 = vpop.permute.xlu0 %1845  ;;  %v1946_v12 = vld [vmem:[#allocation3 + $0xb0] sm:$0xff] }
 0x326   : > { %4799 = vmatmul.msk.f32.gmra.mxu0 %vm1961_vm11, %v1932_v47  ;;  %4809 = vmatmul.msk.f32.gmra.mxu2 %vm1961_vm11, %v1942_v7  ;;  %1917 = vst.msk [vmem:[#allocation3 + $0xc8] sm:$0xff] %vm1891_vm10, %v1846_v9 }
 0x32c   : > { %v1848_v30 = vpop.permute.xlu1 %1847  ;;  %v1947_v56 = vld [vmem:[#allocation3 + $0xb8] sm:$0xff] }
 0x32d   : > { %1918 = vst.msk [vmem:[#allocation3 + $0xd0] sm:$0xff] %vm1891_vm10, %v1848_v30  ;;  %v1852_v4 = vpop.permute.xlu0 %1851  ;;  %v1949_v13 = vld [vmem:[#allocation3 + $0xc8] sm:$0xff] }
 0x32e   : > { %4800 = vmatmul.msk.f32.gmra.mxu0 %vm1961_vm11, %v1933_v42  ;;  %4810 = vmatmul.msk.f32.gmra.mxu2 %vm1961_vm11, %v1943_v36  ;;  %1920 = vst.msk [vmem:[#allocation3 + $0xe0] sm:$0xff] %vm1891_vm10, %v1852_v4 }
 0x334   : > { %v1854_v54 = vpop.permute.xlu1 %1853  ;;  %v1950_v60 = vld [vmem:[#allocation3 + $0xd0] sm:$0xff] }
 0x335   : > { %1921 = vst.msk [vmem:[#allocation3 + $0xe8] sm:$0xff] %vm1891_vm10, %v1854_v54  ;;  %v1858_v55 = vpop.permute.xlu0 %1857  ;;  %v1952_v61 = vld [vmem:[#allocation3 + $0xe0] sm:$0xff] }
 0x336   : > { %4801 = vmatmul.msk.f32.gmra.mxu0 %vm1961_vm11, %v1934_v3  ;;  %4811 = vmatmul.msk.f32.gmra.mxu2 %vm1961_vm11, %v1944_v46  ;;  %1923 = vst.msk [vmem:[#allocation3 + $0xf8] sm:$0xff] %vm1891_vm10, %v1858_v55 }
 0x33c   : > { %v1953_v21 = vld [vmem:[#allocation3 + $0xe8] sm:$0xff] }
 0x33d   : > { %v1955_v49 = vld [vmem:[#allocation3 + $0xf8] sm:$0xff] }
 0x33e   : > { %4802 = vmatmul.msk.f32.gmra.mxu0 %vm1961_vm11, %v1935_v52  ;;  %4812 = vmatmul.msk.f32.gmra.mxu2 %vm1961_vm11, %v1945_v41 }
 0x346   : > { %4803 = vmatmul.msk.f32.gmra.mxu0 %vm1961_vm11, %v1936_v16  ;;  %4813 = vmatmul.msk.f32.gmra.mxu2 %vm1961_vm11, %v1946_v12 }
 0x34e   : > { %4804 = vmatmul.msk.f32.gmra.mxu0 %vm1961_vm11, %v1937_v18  ;;  %4814 = vmatmul.msk.f32.gmra.mxu2 %vm1961_vm11, %v1947_v56 }
 0x351   : > { %v6124_v48 = vpop.f32.mrf.mxu0 }
 0x352   : > { %v2244_v63 = vmul.f32 %v6124_v48, %v6124_v48  ;;  %v2175_v23 = vsel %vm204_vm0, %v6124_v48, 0.0 }
 0x354   : > { %v2276_v22 = vsel %vm204_vm0, %v2244_v63, 0.0 }
 0x356   : > { %4805 = vmatmul.msk.f32.gmra.mxu0 %vm1961_vm11, %v1938_v19  ;;  %4815 = vmatmul.msk.f32.gmra.mxu2 %vm1961_vm11, %v1948_v27 }
 0x35e   : > { %4806 = vmatmul.msk.f32.gmra.mxu0 %vm1961_vm11, %v1939_v1  ;;  %4816 = vmatmul.msk.f32.gmra.mxu2 %vm1961_vm11, %v1949_v13 }
 0x366   : > { %4817 = vmatmul.msk.f32.gmra.mxu2 %vm1961_vm11, %v1950_v60 }
 0x36b   : > { %v6128_v11 = vpop.f32.mrf.mxu0 }
 0x36c   : > { %v2245_v33 = vmul.f32 %v6128_v11, %v6128_v11  ;;  %v2176_v38 = vsel %vm204_vm0, %v6128_v11, 0.0 }
 0x36d   : > { %v2177_v28 = vadd.f32 %v2176_v38, %v2175_v23 }
 0x36e   : > { %4818 = vmatmul.msk.f32.gmra.mxu2 %vm1961_vm11, %v1951_v14  ;;  %v2277_v53 = vsel %vm204_vm0, %v2245_v33, 0.0 }
 0x36f   : > { %v2278_v29 = vadd.f32 %v2277_v53, %v2276_v22 }
 0x373   : > { %v6131_v50 = vpop.f32.mrf.mxu0 }
 0x374   : > { %v2246_v2 = vmul.f32 %v6131_v50, %v6131_v50  ;;  %v2178_v10 = vsel %vm204_vm0, %v6131_v50, 0.0 }
 0x375   : > { %v2179_v7 = vadd.f32 %v2178_v10, %v2177_v28 }
 0x376   : > { %4819 = vmatmul.msk.f32.gmra.mxu2 %vm1961_vm11, %v1952_v61  ;;  %v2279_v24 = vsel %vm204_vm0, %v2246_v2, 0.0 }
 0x377   : > { %v2280_v9 = vadd.f32 %v2279_v24, %v2278_v29 }
 0x37b   : > { %v6134_v26 = vpop.f32.mrf.mxu0 }
 0x37c   : > { %v2247_v43 = vmul.f32 %v6134_v26, %v6134_v26  ;;  %v2180_v25 = vsel %vm204_vm0, %v6134_v26, 0.0 }
 0x37d   : > { %v2181_v46 = vadd.f32 %v2180_v25, %v2179_v7 }
 0x37e   : > { %4820 = vmatmul.msk.f32.gmra.mxu2 %vm1961_vm11, %v1953_v21  ;;  %v2281_v40 = vsel %vm204_vm0, %v2247_v43, 0.0 }
 0x37f   : > { %v2282_v52 = vadd.f32 %v2281_v40, %v2280_v9 }
 0x383   : > { %v6137_v37 = vpop.f32.mrf.mxu0 }
 0x384   : > { %v2248_v34 = vmul.f32 %v6137_v37, %v6137_v37  ;;  %v2182_v36 = vsel %vm204_vm0, %v6137_v37, 0.0 }
 0x385   : > { %v2183_v57 = vadd.f32 %v2182_v36, %v2181_v46 }
 0x386   : > { %4821 = vmatmul.msk.f32.gmra.mxu2 %vm1961_vm11, %v1954_v8  ;;  %v2283_v3 = vsel %vm204_vm0, %v2248_v34, 0.0 }
 0x387   : > { %v2284_v18 = vadd.f32 %v2283_v3, %v2282_v52 }
 0x38b   : > { %v6140_v0 = vpop.f32.mrf.mxu0 }
 0x38c   : > { %v2249_v42 = vmul.f32 %v6140_v0, %v6140_v0  ;;  %v2184_v30 = vsel %vm204_vm0, %v6140_v0, 0.0 }
 0x38d   : > { %v2185_v4 = vadd.f32 %v2184_v30, %v2183_v57 }
 0x38e   : > { %4822 = vmatmul.msk.f32.gmra.mxu2 %vm1961_vm11, %v1955_v49  ;;  %v2285_v12 = vsel %vm204_vm0, %v2249_v42, 0.0 }
 0x38f   : > { %v2286_v1 = vadd.f32 %v2285_v12, %v2284_v18 }
 0x393   : > { %v6143_v58 = vpop.f32.mrf.mxu0 }
 0x394   : > { %v2250_v41 = vmul.f32 %v6143_v58, %v6143_v58  ;;  %v2186_v16 = vsel %vm204_vm0, %v6143_v58, 0.0 }
 0x395   : > { %v2187_v45 = vadd.f32 %v2186_v16, %v2185_v4 }
 0x396   : > { %v2287_v19 = vsel %vm204_vm0, %v2250_v41, 0.0 }
 0x397   : > { %v2288_v21 = vadd.f32 %v2287_v19, %v2286_v1 }
 0x399   : > { %v6145_v59 = vpop.f32.mrf.mxu2 }
 0x39b   : > { %v6147_v15 = vpop.f32.mrf.mxu0 }
 0x39c   : > { %v2251_v56 = vmul.f32 %v6147_v15, %v6147_v15  ;;  %v2188_v54 = vsel %vm204_vm0, %v6147_v15, 0.0 }
 0x39d   : > { %v2189_v8 = vadd.f32 %v2188_v54, %v2187_v45 }
 0x39e   : > { %v2289_v55 = vsel %vm204_vm0, %v2251_v56, 0.0 }
 0x39f   : > { %v2290_v23 = vadd.f32 %v2289_v55, %v2288_v21  ;;  %v2260_v55 = vmul.f32 %v6145_v59, %v6145_v59 }
 0x3a1   : > { %v6149_v5 = vpop.f32.mrf.mxu2 }
 0x3a3   : > { %v6151_v39 = vpop.f32.mrf.mxu0 }
 0x3a4   : > { %v2252_v13 = vmul.f32 %v6151_v39, %v6151_v39  ;;  %v2190_v14 = vsel %vm204_vm0, %v6151_v39, 0.0 }
 0x3a5   : > { %v2191_v38 = vadd.f32 %v2190_v14, %v2189_v8 }
 0x3a6   : > { %v2291_v49 = vsel %vm204_vm0, %v2252_v13, 0.0 }
 0x3a7   : > { %v2292_v10 = vadd.f32 %v2291_v49, %v2290_v23  ;;  %v2206_v49 = vsel %vm204_vm0, %v6145_v59, 0.0 }
 0x3a9   : > { %v6153_v32 = vpop.f32.mrf.mxu2 }
 0x3ab   : > { %v6155_v62 = vpop.f32.mrf.mxu0 }
 0x3ac   : > { %v2253_v61 = vmul.f32 %v6155_v62, %v6155_v62  ;;  %v2192_v63 = vsel %vm204_vm0, %v6155_v62, 0.0 }
 0x3ad   : > { %v2193_v43 = vadd.f32 %v2192_v63, %v2191_v38  ;;  %v2307_v38 = vsel %vm204_vm0, %v2260_v55, 0.0 }
 0x3ae   : > { %v2293_v2 = vsel %vm204_vm0, %v2253_v61, 0.0 }
 0x3af   : > { %v2294_v29 = vadd.f32 %v2293_v2, %v2292_v10  ;;  %v2261_v2 = vmul.f32 %v6149_v5, %v6149_v5  ;;  %v2208_v10 = vsel %vm204_vm0, %v6149_v5, 0.0 }
 0x3b1   : > { %v6157_v44 = vpop.f32.mrf.mxu2 }
 0x3b3   : > { %v6159_v6 = vpop.f32.mrf.mxu0 }
 0x3b4   : > { %v2254_v33 = vmul.f32 %v6159_v6, %v6159_v6  ;;  %v2194_v22 = vsel %vm204_vm0, %v6159_v6, 0.0 }
 0x3b5   : > { %v2195_v7 = vadd.f32 %v2194_v22, %v2193_v43 }
 0x3b6   : > { %v2295_v24 = vsel %vm204_vm0, %v2254_v33, 0.0 }
 0x3b7   : > { %v2296_v46 = vadd.f32 %v2295_v24, %v2294_v29  ;;  %v2309_v24 = vsel %vm204_vm0, %v2261_v2, 0.0  ;;  %v2210_v29 = vsel %vm204_vm0, %v6153_v32, 0.0 }
 0x3b9   : > { %v6161_v31 = vpop.f32.mrf.mxu2 }
 0x3bb   : > { %v6163_v35 = vpop.f32.mrf.mxu0 }
 0x3bc   : > { %v2255_v53 = vmul.f32 %v6163_v35, %v6163_v35  ;;  %v2196_v25 = vsel %vm204_vm0, %v6163_v35, 0.0 }
 0x3bd   : > { %v2197_v3 = vadd.f32 %v2196_v25, %v2195_v7  ;;  %v2262_v25 = vmul.f32 %v6153_v32, %v6153_v32 }
 0x3be   : > { %v2297_v36 = vsel %vm204_vm0, %v2255_v53, 0.0 }
 0x3bf   : > { %v2298_v57 = vadd.f32 %v2297_v36, %v2296_v46  ;;  %v2311_v36 = vsel %vm204_vm0, %v2262_v25, 0.0 }
 0x3c1   : > { %v6181_v20 = vpop.f32.mrf.mxu2 }
 0x3c3   : > { %v6188_v47 = vpop.f32.mrf.mxu0 }
 0x3c4   : > { %v2256_v34 = vmul.f32 %v6188_v47, %v6188_v47  ;;  %v2198_v42 = vsel %vm204_vm0, %v6188_v47, 0.0 }
 0x3c5   : > { %v2199_v12 = vadd.f32 %v2198_v42, %v2197_v3  ;;  %v2263_v42 = vmul.f32 %v6157_v44, %v6157_v44  ;;  %v2212_v3 = vsel %vm204_vm0, %v6157_v44, 0.0 }
 0x3c6   : > { %v2299_v30 = vsel %vm204_vm0, %v2256_v34, 0.0 }
 0x3c7   : > { %v2300_v18 = vadd.f32 %v2299_v30, %v2298_v57 }
 0x3c9   : > { %v6205_v27 = vpop.f32.mrf.mxu2 }
 0x3cb   : > { %v6212_v60 = vpop.f32.mrf.mxu0 }
 0x3cc   : > { %v2257_v9 = vmul.f32 %v6212_v60, %v6212_v60  ;;  %v2200_v41 = vsel %vm204_vm0, %v6212_v60, 0.0 }
 0x3cd   : > { %v2201_v4 = vadd.f32 %v2200_v41, %v2199_v12  ;;  %v2313_v41 = vsel %vm204_vm0, %v2263_v42, 0.0  ;;  %v2214_v12 = vsel %vm204_vm0, %v6161_v31, 0.0 }
 0x3ce   : > { %v2301_v16 = vsel %vm204_vm0, %v2257_v9, 0.0 }
 0x3cf   : > { %v2302_v13 = vadd.f32 %v2301_v16, %v2300_v18  ;;  %v2265_v18 = vmul.f32 %v6181_v20, %v6181_v20 }
 0x3d1   : > { %v6229_v28 = vpop.f32.mrf.mxu2  ;;  %v2317_v55 = vsel %vm204_vm0, %v2265_v18, 0.0 }
 0x3d3   : > { %v6236_v40 = vpop.f32.mrf.mxu0 }
 0x3d4   : > { %v2258_v52 = vmul.f32 %v6236_v40, %v6236_v40  ;;  %v2202_v56 = vsel %vm204_vm0, %v6236_v40, 0.0 }
 0x3d5   : > { %v2203_v1 = vadd.f32 %v2202_v56, %v2201_v4 }
 0x3d6   : > { %v2303_v54 = vsel %vm204_vm0, %v2258_v52, 0.0  ;;  %v2264_v52 = vmul.f32 %v6161_v31, %v6161_v31 }
 0x3d7   : > { %v2304_v21 = vadd.f32 %v2303_v54, %v2302_v13  ;;  %v2216_v13 = vsel %vm204_vm0, %v6181_v20, 0.0 }
 0x3d8   : > { %v2315_v56 = vsel %vm204_vm0, %v2264_v52, 0.0 }
 0x3d9   : > { %v6251_v19 = vpop.f32.mrf.mxu2 }
 0x3db   : > { %v6254_v45 = vpop.f32.mrf.mxu0 }
 0x3dc   : > { %v2204_v14 = vsel %vm204_vm0, %v6254_v45, 0.0  ;;  %v2259_v61 = vmul.f32 %v6254_v45, %v6254_v45 }
 0x3dd   : > { %v2205_v8 = vadd.f32 %v2204_v14, %v2203_v1  ;;  %v2266_v14 = vmul.f32 %v6205_v27, %v6205_v27 }
 0x3de   : > { %v2305_v63 = vsel %vm204_vm0, %v2259_v61, 0.0 }
 0x3df   : > { %v2207_v33 = vadd.f32 %v2206_v49, %v2205_v8  ;;  %v2306_v23 = vadd.f32 %v2305_v63, %v2304_v21  ;;  %v2218_v21 = vsel %vm204_vm0, %v6205_v27, 0.0  ;;  %v2319_v49 = vsel %vm204_vm0, %v2266_v14, 0.0 }
 0x3e0   : > { %v2267_v63 = vmul.f32 %v6229_v28, %v6229_v28 }
 0x3e1   : > { %v2308_v22 = vadd.f32 %v2307_v38, %v2306_v23  ;;  %v6268_v53 = vpop.f32.mrf.mxu2  ;;  %v2209_v43 = vadd.f32 %v2208_v10, %v2207_v33  ;;  %v2220_v38 = vsel %vm204_vm0, %v6229_v28, 0.0  ;;  %v2268_v10 = vmul.f32 %v6251_v19, %v6251_v19 }
 0x3e2   : > { %v2224_v42 = vsel %vm204_vm0, %v6268_v53, 0.0 }
 0x3e3   : > { %v2310_v34 = vadd.f32 %v2309_v24, %v2308_v22  ;;  %v2211_v7 = vadd.f32 %v2210_v29, %v2209_v43  ;;  %v2321_v22 = vsel %vm204_vm0, %v2267_v63, 0.0  ;;  %v2222_v24 = vsel %vm204_vm0, %v6251_v19, 0.0 }
 0x3e4   : > { %v2269_v29 = vmul.f32 %v6268_v53, %v6268_v53 }
 0x3e5   : > { %v2312_v9 = vadd.f32 %v2311_v36, %v2310_v34  ;;  %v2213_v30 = vadd.f32 %v2212_v3, %v2211_v7  ;;  %v2323_v34 = vsel %vm204_vm0, %v2268_v10, 0.0 }
 0x3e6   : > { %v2325_v3 = vsel %vm204_vm0, %v2269_v29, 0.0 }
 0x3e7   : > { %v2314_v57 = vadd.f32 %v2313_v41, %v2312_v9  ;;  %v2215_v16 = vadd.f32 %v2214_v12, %v2213_v30 }
 0x3e9   : > { %v6280_v46 = vpop.f32.mrf.mxu2  ;;  %v2316_v4 = vadd.f32 %v2315_v56, %v2314_v57  ;;  %v2217_v1 = vadd.f32 %v2216_v13, %v2215_v16 }
 0x3ea   : > { %v2270_v30 = vmul.f32 %v6280_v46, %v6280_v46  ;;  %v2226_v52 = vsel %vm204_vm0, %v6280_v46, 0.0 }
 0x3eb   : > { %v2318_v61 = vadd.f32 %v2317_v55, %v2316_v4  ;;  %v2219_v8 = vadd.f32 %v2218_v21, %v2217_v1 }
 0x3ec   : > { %v2327_v12 = vsel %vm204_vm0, %v2270_v30, 0.0 }
 0x3ed   : > { %v2320_v33 = vadd.f32 %v2319_v49, %v2318_v61  ;;  %v2221_v2 = vadd.f32 %v2220_v38, %v2219_v8 }
 0x3ef   : > { %v2322_v43 = vadd.f32 %v2321_v22, %v2320_v33  ;;  %v2223_v25 = vadd.f32 %v2222_v24, %v2221_v2 }
 0x3f1   : > { %v6292_v54 = vpop.f32.mrf.mxu2  ;;  %v2324_v7 = vadd.f32 %v2323_v34, %v2322_v43  ;;  %v2225_v9 = vadd.f32 %v2224_v42, %v2223_v25 }
 0x3f2   : > { %v2271_v16 = vmul.f32 %v6292_v54, %v6292_v54  ;;  %v2228_v13 = vsel %vm204_vm0, %v6292_v54, 0.0 }
 0x3f3   : > { %v2326_v41 = vadd.f32 %v2325_v3, %v2324_v7  ;;  %v2227_v57 = vadd.f32 %v2226_v52, %v2225_v9 }
 0x3f4   : > { %v2329_v61 = vsel %vm204_vm0, %v2271_v16, 0.0 }
 0x3f5   : > { %v2328_v18 = vadd.f32 %v2327_v12, %v2326_v41  ;;  %v2229_v14 = vadd.f32 %v2228_v13, %v2227_v57 }
 0x3f7   : > { %v2330_v63 = vadd.f32 %v2329_v61, %v2328_v18 }
 0x3f9   : > { %v6304_v23 = vpop.f32.mrf.mxu2 }
 0x3fa   : > { %v2272_v56 = vmul.f32 %v6304_v23, %v6304_v23  ;;  %v2230_v1 = vsel %vm204_vm0, %v6304_v23, 0.0 }
 0x3fb   : > { %v2231_v33 = vadd.f32 %v2230_v1, %v2229_v14 }
 0x3fc   : > { %v2331_v21 = vsel %vm204_vm0, %v2272_v56, 0.0 }
 0x3fd   : > { %v2332_v22 = vadd.f32 %v2331_v21, %v2330_v63 }
 0x401   : > { %v6316_v36 = vpop.f32.mrf.mxu2 }
 0x402   : > { %v2273_v55 = vmul.f32 %v6316_v36, %v6316_v36  ;;  %v2232_v8 = vsel %vm204_vm0, %v6316_v36, 0.0 }
 0x403   : > { %v2233_v10 = vadd.f32 %v2232_v8, %v2231_v33 }
 0x404   : > { %v2333_v38 = vsel %vm204_vm0, %v2273_v55, 0.0 }
 0x405   : > { %v2334_v24 = vadd.f32 %v2333_v38, %v2332_v22 }
 0x409   : > { %v6330_v4 = vpop.f32.mrf.mxu2 }
 0x40a   : > { %v2274_v49 = vmul.f32 %v6330_v4, %v6330_v4  ;;  %v2234_v2 = vsel %vm204_vm0, %v6330_v4, 0.0 }
 0x40b   : > { %v2235_v25 = vadd.f32 %v2234_v2, %v2233_v10 }
 0x40c   : > { %v2335_v43 = vsel %vm204_vm0, %v2274_v49, 0.0 }
 0x40d   : > { %v2336_v42 = vadd.f32 %v2335_v43, %v2334_v24 }
 0x411   : > { %v2172_v34 = vpop.f32.mrf.mxu2 }
 0x412   : > { %v2236_v29 = vsel %vm204_vm0, %v2172_v34, 0.0  ;;  %v2275_v7 = vmul.f32 %v2172_v34, %v2172_v34 }
 0x413   : > { %v2237_v9 = vadd.f32 %v2236_v29, %v2235_v25 }
 0x414   : > { %v2337_v3 = vsel %vm204_vm0, %v2275_v7, 0.0 }
 0x415   : > { %v2238_v30 = vrot.slane %v2237_v9, 4  ;;  %v2338_v41 = vadd.f32 %v2337_v3, %v2336_v42 }
 0x417   : > { %v2239_v52 = vadd.f32 %v2238_v30, %v2237_v9  ;;  %v2339_v57 = vrot.slane %v2338_v41, 4 }
 0x419   : > { %v2240_v12 = vrot.slane %v2239_v52, 2  ;;  %v2340_v16 = vadd.f32 %v2339_v57, %v2338_v41 }
 0x41b   : > { %v2241_v56 = vadd.f32 %v2240_v12, %v2239_v52  ;;  %v2341_v18 = vrot.slane %v2340_v16, 2 }
 0x41d   : > { %v2242_v13 = vrot.slane %v2241_v56, 1  ;;  %v2342_v1 = vadd.f32 %v2341_v18, %v2340_v16 }
 0x41f   : > { %v2243_v55 = vadd.f32 %v2242_v13, %v2241_v56  ;;  %v2343_v14 = vrot.slane %v2342_v1, 1 }
 0x421   : > { %v2344_v61 = vadd.f32 %v2343_v14, %v2342_v1  ;;  %v6350_v21 = vmul.f32 0.00390625, %v2243_v55 }
 0x423   : > { %v2346_v8 = vmul.f32 0.00390625, %v2344_v61  ;;  %v2347_v49 = vmul.f32 %v6350_v21, %v6350_v21  ;;  %v2380_v25 = vsub.f32 %v2172_v34, %v6350_v21  ;;  %v2352_v29 = vsub.f32 %v6134_v26, %v6350_v21 }
 0x424   : > { %v2349_v30 = vsub.f32 %v6124_v48, %v6350_v21  ;;  %v2351_v41 = vsub.f32 %v6131_v50, %v6350_v21  ;;  %v2350_v34 = vsub.f32 %v6128_v11, %v6350_v21  ;;  %v2353_v26 = vsub.f32 %v6137_v37, %v6350_v21 }
 0x425   : > { %v2348_v63 = vsub.f32 %v2346_v8, %v2347_v49  ;;  %v2354_v16 = vsub.f32 %v6140_v0, %v6350_v21  ;;  %v2355_v50 = vsub.f32 %v6143_v58, %v6350_v21  ;;  %v2356_v37 = vsub.f32 %v6147_v15, %v6350_v21 }
 0x426   : > { %v2357_v18 = vsub.f32 %v6151_v39, %v6350_v21  ;;  %v2358_v55 = vsub.f32 %v6155_v62, %v6350_v21  ;;  %v2359_v61 = vsub.f32 %v6159_v6, %v6350_v21  ;;  %v2360_v39 = vsub.f32 %v6163_v35, %v6350_v21 }
 0x427   : > { %v2381_v33 = vadd.f32 1e-05, %v2348_v63  ;;  %v2361_v62 = vsub.f32 %v6188_v47, %v6350_v21 }
 0x429   : > { %4886 = vrsqrt.f32 %v2381_v33  ;;  %vm2388_vm13 = vweird.f32 %v2381_v33 }
 0x42f   : > { %v4887_v38 = vpop.eup %4886 }
 0x430   : > { %v2383_v2 = vmul.f32 %v4887_v38, %v2381_v33  ;;  %vm2389_vm12 = vweird.f32 %v4887_v38 }
 0x431   : > { %vm2390_vm14 = vmor %vm2388_vm13, %vm2389_vm12 }
 0x432   : > { %v2384_v22 = vmul.f32 %v4887_v38, %v2383_v2  ;;  %v2362_v2 = vsub.f32 %v6212_v60, %v6350_v21 }
 0x434   : > { %v2385_v10 = vmul.f32 0.5, %v2384_v22 }
 0x436   : > { %v2386_v43 = vsub.f32 1.5, %v2385_v10  ;;  %v2363_v10 = vsub.f32 %v6236_v40, %v6350_v21  ;;  %v2366_v40 = vsub.f32 %v6149_v5, %v6350_v21 }
 0x438   : > { %v2387_v24 = vmul.f32 %v4887_v38, %v2386_v43 }
 0x43a   : > { %v6357_v7 = vsel %vm2390_vm14, %v4887_v38, %v2387_v24  ;;  %v2364_v24 = vsub.f32 %v6254_v45, %v6350_v21 }
 0x43b   : > { %v2423_v42 = vmul.f32 %v6357_v7, %v2380_v25  ;;  %v2395_v9 = vmul.f32 %v6357_v7, %v2352_v29  ;;  %v2392_v57 = vmul.f32 %v6357_v7, %v2349_v30  ;;  %v2394_v12 = vmul.f32 %v6357_v7, %v2351_v41 }
 0x43c   : > { %v2393_v48 = vmul.f32 %v6357_v7, %v2350_v34  ;;  %v2396_v11 = vmul.f32 %v6357_v7, %v2353_v26  ;;  %v2397_v56 = vmul.f32 %v6357_v7, %v2354_v16  ;;  %v2398_v0 = vmul.f32 %v6357_v7, %v2355_v50 }
 0x43d   : > { %v2455_v3 = vmax.f32 %v2423_v42, 0.0  ;;  %v2427_v52 = vmax.f32 %v2395_v9, 0.0  ;;  %v2426_v13 = vmax.f32 %v2394_v12, 0.0  ;;  %v2424_v1 = vmax.f32 %v2392_v57, 0.0 }
 0x43e   : > { %v2399_v58 = vmul.f32 %v6357_v7, %v2356_v37  ;;  %v2425_v14 = vmax.f32 %v2393_v48, 0.0  ;;  %v2400_v15 = vmul.f32 %v6357_v7, %v2357_v18  ;;  %v2428_v8 = vmax.f32 %v2396_v11, 0.0 }
 0x43f   : > { %2487 = vst.msk [vmem:[#allocation2 + $0x189] sm:$0xff] %vm204_vm0, %v2455_v3  ;;  %v2401_v49 = vmul.f32 %v6357_v7, %v2358_v55  ;;  %v2429_v63 = vmax.f32 %v2397_v56, 0.0  ;;  %v2402_v38 = vmul.f32 %v6357_v7, %v2359_v61  ;;  %v2430_v6 = vmax.f32 %v2398_v0, 0.0 }
 0x440   : > { %2489 = vst.msk [vmem:[#allocation2 + $0x9] sm:$0xff] %vm204_vm0, %v2427_v52  ;;  %v2403_v35 = vmul.f32 %v6357_v7, %v2360_v39  ;;  %v2431_v22 = vmax.f32 %v2399_v58, 0.0  ;;  %v2404_v47 = vmul.f32 %v6357_v7, %v2361_v62  ;;  %v2432_v43 = vmax.f32 %v2400_v15, 0.0 }
 0x441   : > { %2459 = vst.msk [vmem:[#allocation2 + $0x39] sm:$0xff] %vm204_vm0, %v2427_v52  ;;  %v2405_v60 = vmul.f32 %v6357_v7, %v2362_v2  ;;  %v2433_v25 = vmax.f32 %v2401_v49, 0.0  ;;  %v2365_v29 = vsub.f32 %v6145_v59, %v6350_v21  ;;  %v2406_v42 = vmul.f32 %v6357_v7, %v2363_v10 }
 0x442   : > { %2488 = vst.msk [vmem:[#allocation2 + $0x1] sm:$0xff] %vm204_vm0, %v2426_v13  ;;  %v2434_v9 = vmax.f32 %v2402_v38, 0.0  ;;  %v2407_v3 = vmul.f32 %v6357_v7, %v2364_v24  ;;  %v2435_v45 = vmax.f32 %v2403_v35, 0.0  ;;  %v2367_v41 = vsub.f32 %v6153_v32, %v6350_v21 }
 0x443   : > { %2458 = vst.msk [vmem:[#allocation2 + $0x31] sm:$0xff] %vm204_vm0, %v2426_v13  ;;  %v2408_v52 = vmul.f32 %v6357_v7, %v2365_v29  ;;  %v2436_v59 = vmax.f32 %v2404_v47, 0.0  ;;  %v2368_v34 = vsub.f32 %v6157_v44, %v6350_v21  ;;  %v2409_v5 = vmul.f32 %v6357_v7, %v2366_v40 }
 0x444   : > { %2456 = vst.msk [vmem:[#allocation2 + $0x19] sm:$0xff] %vm204_vm0, %v2424_v1  ;;  %v2437_v26 = vmax.f32 %v2405_v60, 0.0  ;;  %v2369_v32 = vsub.f32 %v6161_v31, %v6350_v21  ;;  %v2410_v12 = vmul.f32 %v6357_v7, %v2367_v41  ;;  %v2438_v16 = vmax.f32 %v2406_v42, 0.0 }
 0x445   : > { %2457 = vst.msk [vmem:[#allocation2 + $0x21] sm:$0xff] %vm204_vm0, %v2425_v14  ;;  %v2370_v44 = vsub.f32 %v6181_v20, %v6350_v21  ;;  %v2411_v50 = vmul.f32 %v6357_v7, %v2368_v34  ;;  %v2439_v11 = vmax.f32 %v2407_v3, 0.0  ;;  %v2371_v31 = vsub.f32 %v6205_v27, %v6350_v21 }
 0x446   : > { %2460 = vst.msk [vmem:[#allocation2 + $0x49] sm:$0xff] %vm204_vm0, %v2428_v8  ;;  %v2412_v37 = vmul.f32 %v6357_v7, %v2369_v32  ;;  %v2440_v56 = vmax.f32 %v2408_v52, 0.0  ;;  %v2372_v18 = vsub.f32 %v6229_v28, %v6350_v21  ;;  %v2441_v0 = vmax.f32 %v2409_v5, 0.0  ;;  %v2544_v51 = vld [vmem:[#allocation2 + $0x18f] sm:$0x1] }
 0x447   : > { %v2629_v33 = vld [vmem:[#allocation2 + $0x9] sm:$0xff]  ;;  %2461 = vst.msk [vmem:[#allocation2 + $0x51] sm:$0xff] %vm204_vm0, %v2429_v63  ;;  %v2413_v20 = vmul.f32 %v6357_v7, %v2370_v44  ;;  %v2373_v13 = vsub.f32 %v6251_v19, %v6350_v21  ;;  %v2414_v1 = vmul.f32 %v6357_v7, %v2371_v31  ;;  %v2442_v55 = vmax.f32 %v2410_v12, 0.0 }
 0x448   : > { %2694 = vrot.lane.b32.xlu2 %v2629_v33, %s4898_s18  ;;  %2462 = vst.msk [vmem:[#allocation2 + $0x61] sm:$0xff] %vm204_vm0, %v2430_v6  ;;  %v2374_v27 = vsub.f32 %v6268_v53, %v6350_v21  ;;  %v2415_v58 = vmul.f32 %v6357_v7, %v2372_v18  ;;  %v2443_v14 = vmax.f32 %v2411_v50, 0.0  ;;  %v2375_v61 = vsub.f32 %v6280_v46, %v6350_v21  ;;  %v6475_v49 = vld [vmem:[#allocation2 + $0x39] sm:$0xff]  ;;  %v2528_v29 = vld [vmem:[#allocation2 + $0xf] sm:$0x1] }
 0x449   : > { %v2628_v30 = vld [vmem:[#allocation2 + $0x1] sm:$0xff]  ;;  %2463 = vst.msk [vmem:[#allocation2 + $0x69] sm:$0xff] %vm204_vm0, %v2431_v22  ;;  %v2416_v19 = vmul.f32 %v6357_v7, %v2373_v13  ;;  %v2444_v15 = vmax.f32 %v2412_v37, 0.0  ;;  %v2376_v53 = vsub.f32 %v6292_v54, %v6350_v21  ;;  %v2445_v39 = vmax.f32 %v2413_v20, 0.0 }
 0x44a   : > { %2692 = vrot.lane.b32.xlu1 %v2628_v30, %s4898_s18  ;;  %2464 = vst.msk [vmem:[#allocation2 + $0x79] sm:$0xff] %vm204_vm0, %v2432_v43  ;;  %v6439_v48 = vld [vmem:[#allocation2 + $0x31] sm:$0xff]  ;;  %v2417_v8 = vmul.f32 %v6357_v7, %v2374_v27  ;;  %v2377_v46 = vsub.f32 %v6304_v23, %v6350_v21  ;;  %v2418_v63 = vmul.f32 %v6357_v7, %v2375_v61  ;;  %v2446_v62 = vmax.f32 %v2414_v1, 0.0  ;;  %v2565_v40 = vld [vmem:[#allocation2 + $0x8] sm:$0xff]  ;;  %v2530_v30 = vld [vmem:[#allocation2 + $0x3f] sm:$0x1] }
 0x44b   : > { %v6430_v57 = vld [vmem:[#allocation2 + $0x19] sm:$0xff]  ;;  %2465 = vst.msk [vmem:[#allocation2 + $0x81] sm:$0xff] %vm204_vm0, %v2433_v25  ;;  %v2378_v54 = vsub.f32 %v6316_v36, %v6350_v21  ;;  %v2419_v38 = vmul.f32 %v6357_v7, %v2376_v53  ;;  %v2447_v6 = vmax.f32 %v2415_v58, 0.0  ;;  %v2379_v23 = vsub.f32 %v6330_v4, %v6350_v21  ;;  %v2494_v41 = vld [vmem:[#allocation2 + $0x32] sm:$0x1] }
 0x44c   : > { %2696 = vrot.lane.b32.xlu0 %v6430_v57, %s4898_s18  ;;  %2466 = vst.msk [vmem:[#allocation2 + $0x91] sm:$0xff] %vm204_vm0, %v2434_v9  ;;  %v6463_v28 = vld [vmem:[#allocation2 + $0x21] sm:$0xff]  ;;  %v2420_v2 = vmul.f32 %v6357_v7, %v2377_v46  ;;  %v2448_v35 = vmax.f32 %v2416_v19, 0.0  ;;  %v2449_v10 = vmax.f32 %v2417_v8, 0.0  ;;  %v2450_v47 = vmax.f32 %v2418_v63, 0.0  ;;  %v6587_v27 = vld [vmem:[#allocation2 + $0x38] sm:$0xff] }
 0x44d   : > { %2467 = vst.msk [vmem:[#allocation2 + $0x99] sm:$0xff] %vm204_vm0, %v2435_v45  ;;  %v2421_v22 = vmul.f32 %v6357_v7, %v2378_v54  ;;  %v2422_v36 = vmul.f32 %v6357_v7, %v2379_v23  ;;  %v2451_v43 = vmax.f32 %v2419_v38, 0.0  ;;  %v6500_v24 = vld [vmem:[#allocation2 + $0x49] sm:$0xff]  ;;  %v2529_v9 = vld [vmem:[#allocation2 + $0x27] sm:$0x1] }
 0x44e   : > { %2468 = vst.msk [vmem:[#allocation2 + $0xa9] sm:$0xff] %vm204_vm0, %v2436_v59  ;;  %v6483_v33 = vld [vmem:[#allocation2 + $0x51] sm:$0xff]  ;;  %v2452_v4 = vmax.f32 %v2420_v2, 0.0  ;;  %v2492_v32 = vld [vmem:[#allocation2 + $0x2] sm:$0x1] }
 0x44f   : > { %2469 = vst.msk [vmem:[#allocation2 + $0xb1] sm:$0xff] %vm204_vm0, %v2437_v26  ;;  %v2453_v21 = vmax.f32 %v2421_v22, 0.0  ;;  %v6506_v60 = vld [vmem:[#allocation2 + $0x61] sm:$0xff]  ;;  %v2454_v7 = vmax.f32 %v2422_v36, 0.0  ;;  %v2531_v52 = vld [vmem:[#allocation2 + $0x57] sm:$0x1] }
 0x450   : > { %2700 = vrot.lane.b32.xlu2 %v6439_v48, %s4898_s18  ;;  %2470 = vst.msk [vmem:[#allocation2 + $0xc1] sm:$0xff] %vm204_vm0, %v2438_v16  ;;  %v6520_v42 = vld [vmem:[#allocation2 + $0x69] sm:$0xff]  ;;  %v2493_v44 = vld [vmem:[#allocation2 + $0x1a] sm:$0x1]  ;;  %v6567_v18 = vld [vmem:[#allocation2 + $0x20] sm:$0xff] }
 0x451   : > { %2471 = vst.msk [vmem:[#allocation2 + $0xc9] sm:$0xff] %vm204_vm0, %v2439_v11  ;;  %v6511_v25 = vld [vmem:[#allocation2 + $0x79] sm:$0xff]  ;;  %v2532_v59 = vld [vmem:[#allocation2 + $0x6f] sm:$0x1]  ;;  %v6538_v34 = vld [vmem:[#allocation2 + $0x50] sm:$0xff] }
 0x452   : > { %2472 = vst.msk [vmem:[#allocation2 + $0xd9] sm:$0xff] %vm204_vm0, %v2440_v56  ;;  %2698 = vrot.lane.b32.xlu1 %v6463_v28, %s4898_s18  ;;  %v6525_v3 = vld [vmem:[#allocation2 + $0x81] sm:$0xff]  ;;  %v2497_v12 = vld [vmem:[#allocation2 + $0x7a] sm:$0x1]  ;;  %v2495_v19 = vld [vmem:[#allocation2 + $0x4a] sm:$0x1] }
 0x453   : > { %2473 = vst.msk [vmem:[#allocation2 + $0xe1] sm:$0xff] %vm204_vm0, %v2441_v0  ;;  %v2533_v5 = vld [vmem:[#allocation2 + $0x87] sm:$0x1]  ;;  %v6541_v26 = vld [vmem:[#allocation2 + $0x91] sm:$0xff]  ;;  %v6616_v54 = vld [vmem:[#allocation2 + $0x68] sm:$0xff] }
 0x454   : > { %2474 = vst.msk [vmem:[#allocation2 + $0xf1] sm:$0xff] %vm204_vm0, %v2442_v55  ;;  %2702 = vrot.lane.b32.xlu0 %v6475_v49, %s4898_s18  ;;  %v6530_v45 = vld [vmem:[#allocation2 + $0x99] sm:$0xff] }
 0x455   : > { %2475 = vst.msk [vmem:[#allocation2 + $0xf9] sm:$0xff] %vm204_vm0, %v2443_v14  ;;  %v6548_v16 = vld [vmem:[#allocation2 + $0xa9] sm:$0xff]  ;;  %v2534_v11 = vld [vmem:[#allocation2 + $0x9f] sm:$0x1]  ;;  %v6621_v38 = vld [vmem:[#allocation2 + $0x80] sm:$0xff] }
 0x456   : > { %2476 = vst.msk [vmem:[#allocation2 + $0x109] sm:$0xff] %vm204_vm0, %v2444_v15  ;;  %v2535_v37 = vld [vmem:[#allocation2 + $0xb7] sm:$0x1]  ;;  %v6564_v56 = vld [vmem:[#allocation2 + $0x98] sm:$0xff]  ;;  %v2496_v15 = vld [vmem:[#allocation2 + $0x62] sm:$0x1] }
 0x457   : > { %2477 = vst.msk [vmem:[#allocation2 + $0x111] sm:$0xff] %vm204_vm0, %v2445_v39  ;;  %v6553_v50 = vld [vmem:[#allocation2 + $0xc1] sm:$0xff]  ;;  %v6569_v20 = vld [vmem:[#allocation2 + $0xb1] sm:$0xff] }
 0x458   : > { %2706 = vrot.lane.b32.xlu2 %v6483_v33, %s4898_s18  ;;  %2478 = vst.msk [vmem:[#allocation2 + $0x121] sm:$0xff] %vm204_vm0, %v2446_v62  ;;  %v6576_v0 = vld [vmem:[#allocation2 + $0xc9] sm:$0xff]  ;;  %v2500_v61 = vld [vmem:[#allocation2 + $0xc2] sm:$0x1] }
 0x459   : > { %2479 = vst.msk [vmem:[#allocation2 + $0x129] sm:$0xff] %vm204_vm0, %v2447_v6  ;;  %v2536_v14 = vld [vmem:[#allocation2 + $0xcf] sm:$0x1]  ;;  %v6600_v53 = vld [vmem:[#allocation2 + $0xd9] sm:$0xff] }
 0x45a   : > { %2480 = vst.msk [vmem:[#allocation2 + $0x139] sm:$0xff] %vm204_vm0, %v2448_v35  ;;  %2704 = vrot.lane.b32.xlu1 %v6500_v24, %s4898_s18  ;;  %v6582_v1 = vld [vmem:[#allocation2 + $0xe1] sm:$0xff] }
 0x45b   : > { %2481 = vst.msk [vmem:[#allocation2 + $0x141] sm:$0xff] %vm204_vm0, %v2449_v10  ;;  %v2537_v8 = vld [vmem:[#allocation2 + $0xe7] sm:$0x1]  ;;  %v6606_v46 = vld [vmem:[#allocation2 + $0xf1] sm:$0xff] }
 0x45c   : > { %2482 = vst.msk [vmem:[#allocation2 + $0x151] sm:$0xff] %vm204_vm0, %v2450_v47  ;;  %2708 = vrot.lane.b32.xlu0 %v6506_v60, %s4898_s18  ;;  %v2538_v39 = vld [vmem:[#allocation2 + $0xff] sm:$0x1]  ;;  %v6609_v63 = vld [vmem:[#allocation2 + $0xe0] sm:$0xff]  ;;  %v2498_v47 = vld [vmem:[#allocation2 + $0x92] sm:$0x1] }
 0x45d   : > { %2483 = vst.msk [vmem:[#allocation2 + $0x159] sm:$0xff] %vm204_vm0, %v2451_v43  ;;  %v6613_v62 = vld [vmem:[#allocation2 + $0x109] sm:$0xff]  ;;  %v6631_v23 = vld [vmem:[#allocation2 + $0xf9] sm:$0xff] }
 0x45e   : > { %2484 = vst.msk [vmem:[#allocation2 + $0x169] sm:$0xff] %vm204_vm0, %v2452_v4  ;;  %v2539_v35 = vld [vmem:[#allocation2 + $0x117] sm:$0x1]  ;;  %v2503_v10 = vld [vmem:[#allocation2 + $0x10a] sm:$0x1] }
 0x45f   : > { %2485 = vst.msk [vmem:[#allocation2 + $0x171] sm:$0xff] %vm204_vm0, %v2453_v21  ;;  %v6643_v36 = vld [vmem:[#allocation2 + $0x111] sm:$0xff] }
 0x460   : > { %2712 = vrot.lane.b32.xlu2 %v6511_v25, %s4898_s18  ;;  %2486 = vst.msk [vmem:[#allocation2 + $0x181] sm:$0xff] %vm204_vm0, %v2454_v7  ;;  %v6649_v43 = vld [vmem:[#allocation2 + $0x129] sm:$0xff] }
 0x461   : > { %2490 = vst.msk [vmem:[#allocation2 + $0x199] sm:$0xff] %vm204_vm0, %v2452_v4  ;;  %v2499_v4 = vld [vmem:[#allocation2 + $0xaa] sm:$0x1] }
 0x462   : > { %2491 = vst.msk [vmem:[#allocation2 + $0x1a1] sm:$0xff] %vm204_vm0, %v2453_v21  ;;  %2710 = vrot.lane.b32.xlu1 %v6520_v42, %s4898_s18  ;;  %v2540_v21 = vld [vmem:[#allocation2 + $0x12f] sm:$0x1]  ;;  %v2541_v7 = vld [vmem:[#allocation2 + $0x147] sm:$0x1] }
 0x463   : > { %2546 = vst.msk [vmem:[#allocation2 + $0x11] sm:$0x1] %vm260_vm1, %v2528_v29  ;;  %v6657_v29 = vld [vmem:[#allocation2 + $0x128] sm:$0xff] }
 0x464   : > { %2714 = vrot.lane.b32.xlu0 %v6525_v3, %s4898_s18  ;;  %2547 = vst.msk [vmem:[#allocation2 + $0x29] sm:$0x1] %vm260_vm1, %v2529_v9  ;;  %v6660_v9 = vld [vmem:[#allocation2 + $0xb0] sm:$0xff] }
 0x465   : > { %2597 = vst.msk [vmem:[#allocation3 + $0x8] sm:$0xff] %vm204_vm0, %v2565_v40  ;;  %v6662_v40 = vld [vmem:[#allocation2 + $0x121] sm:$0xff] }
 0x466   : > { %2548 = vst.msk [vmem:[#allocation2 + $0x41] sm:$0x1] %vm260_vm1, %v2530_v30  ;;  %v6665_v30 = vld [vmem:[#allocation2 + $0xc8] sm:$0xff] }
 0x467   : > { %2512 = vst.msk [vmem:[#allocation2 + $0x30] sm:$0x1] %vm260_vm1, %v2494_v41  ;;  %v6671_v41 = vld [vmem:[#allocation2 + $0x139] sm:$0xff] }
 0x468   : > { %2718 = vrot.lane.b32.xlu2 %v6530_v45, %s4898_s18  ;;  %2549 = vst.msk [vmem:[#allocation2 + $0x59] sm:$0x1] %vm260_vm1, %v2531_v52  ;;  %v6677_v52 = vld [vmem:[#allocation2 + $0x151] sm:$0xff] }
 0x469   : > { %2550 = vst.msk [vmem:[#allocation2 + $0x71] sm:$0x1] %vm260_vm1, %v2532_v59 }
 0x46a   : > { %2716 = vrot.lane.b32.xlu1 %v6541_v26, %s4898_s18  ;;  %2603 = vst.msk [vmem:[#allocation3 + $0x38] sm:$0xff] %vm204_vm0, %v6538_v34 }
 0x46b   : > { %2551 = vst.msk [vmem:[#allocation2 + $0x89] sm:$0x1] %vm260_vm1, %v2533_v5 }
 0x46c   : > { %2720 = vrot.lane.b32.xlu0 %v6548_v16, %s4898_s18  ;;  %2510 = vst.msk [vmem:[#allocation2] sm:$0x1] %vm260_vm1, %v2492_v32  ;;  %v2542_v32 = vld [vmem:[#allocation2 + $0x15f] sm:$0x1] }
 0x46d   : > { %2515 = vst.msk [vmem:[#allocation2 + $0x78] sm:$0x1] %vm260_vm1, %v2497_v12 }
 0x46e   : > { %v6559_v31 = vld [vmem:[#allocation2 + $0x30] sm:$0xff]  ;;  %2511 = vst.msk [vmem:[#allocation2 + $0x18] sm:$0x1] %vm260_vm1, %v2493_v44 }
 0x46f   : > { %2600 = vst.msk [vmem:[#allocation3 + $0x20] sm:$0xff] %vm204_vm0, %v6559_v31  ;;  %v2506_v44 = vld [vmem:[#allocation2 + $0x152] sm:$0x1] }
 0x470   : > { %2724 = vrot.lane.b32.xlu2 %v6553_v50, %s4898_s18  ;;  %2552 = vst.msk [vmem:[#allocation2 + $0xa1] sm:$0x1] %vm260_vm1, %v2534_v11  ;;  %v2501_v11 = vld [vmem:[#allocation2 + $0xda] sm:$0x1] }
 0x471   : > { %2553 = vst.msk [vmem:[#allocation2 + $0xb9] sm:$0x1] %vm260_vm1, %v2535_v37  ;;  %v2502_v37 = vld [vmem:[#allocation2 + $0xf2] sm:$0x1] }
 0x472   : > { %2722 = vrot.lane.b32.xlu1 %v6569_v20, %s4898_s18  ;;  %2609 = vst.msk [vmem:[#allocation3 + $0x68] sm:$0xff] %vm204_vm0, %v6564_v56 }
 0x473   : > { %v2564_v13 = vld [vmem:[#allocation2] sm:$0xff]  ;;  %2599 = vst.msk [vmem:[#allocation3 + $0x18] sm:$0xff] %vm204_vm0, %v6567_v18 }
 0x474   : > { %2726 = vrot.lane.b32.xlu0 %v6576_v0, %s4898_s18  ;;  %2596 = vst.msk [vmem:[#allocation3] sm:$0xff] %vm204_vm0, %v2564_v13  ;;  %v6585_v55 = vld [vmem:[#allocation2 + $0x78] sm:$0xff]  ;;  %v6696_v13 = vld [vmem:[#allocation2 + $0x141] sm:$0xff] }
 0x475   : > { %2606 = vst.msk [vmem:[#allocation3 + $0x50] sm:$0xff] %vm204_vm0, %v6585_v55  ;;  %v6593_v58 = vld [vmem:[#allocation2 + $0x18] sm:$0xff] }
 0x476   : > { %2598 = vst.msk [vmem:[#allocation3 + $0x10] sm:$0xff] %vm204_vm0, %v6593_v58 }
 0x477   : > { %2601 = vst.msk [vmem:[#allocation3 + $0x28] sm:$0xff] %vm204_vm0, %v6587_v27 }
 0x478   : > { %2730 = vrot.lane.b32.xlu2 %v6582_v1, %s4898_s18  ;;  %2554 = vst.msk [vmem:[#allocation2 + $0xd1] sm:$0x1] %vm260_vm1, %v2536_v14  ;;  %v2543_v14 = vld [vmem:[#allocation2 + $0x177] sm:$0x1] }
 0x479   : > { %2518 = vst.msk [vmem:[#allocation2 + $0xc0] sm:$0x1] %vm260_vm1, %v2500_v61  ;;  %v6702_v61 = vld [vmem:[#allocation2 + $0x170] sm:$0xff] }
 0x47a   : > { %2728 = vrot.lane.b32.xlu1 %v6600_v53, %s4898_s18  ;;  %2513 = vst.msk [vmem:[#allocation2 + $0x48] sm:$0x1] %vm260_vm1, %v2495_v19  ;;  %v6704_v19 = vld [vmem:[#allocation2 + $0x159] sm:$0xff] }
 0x47b   : > { %2514 = vst.msk [vmem:[#allocation2 + $0x60] sm:$0x1] %vm260_vm1, %v2496_v15  ;;  %v6707_v15 = vld [vmem:[#allocation2 + $0xf8] sm:$0xff] }
 0x47c   : > { %2732 = vrot.lane.b32.xlu0 %v6606_v46, %s4898_s18  ;;  %2555 = vst.msk [vmem:[#allocation2 + $0xe9] sm:$0x1] %vm260_vm1, %v2537_v8  ;;  %v6711_v8 = vld [vmem:[#allocation2 + $0x171] sm:$0xff] }
 0x47d   : > { %2556 = vst.msk [vmem:[#allocation2 + $0x101] sm:$0x1] %vm260_vm1, %v2538_v39  ;;  %v6714_v39 = vld [vmem:[#allocation2 + $0x110] sm:$0xff] }
 0x47e   : > { %2615 = vst.msk [vmem:[#allocation3 + $0x98] sm:$0xff] %vm204_vm0, %v6609_v63 }
 0x47f   : > { %2605 = vst.msk [vmem:[#allocation3 + $0x48] sm:$0xff] %vm204_vm0, %v6616_v54 }
 0x480   : > { %2736 = vrot.lane.b32.xlu2 %v6613_v62, %s4898_s18  ;;  %v6627_v6 = vld [vmem:[#allocation2 + $0xc0] sm:$0xff]  ;;  %2607 = vst.msk [vmem:[#allocation3 + $0x58] sm:$0xff] %vm204_vm0, %v6621_v38 }
 0x481   : > { %2612 = vst.msk [vmem:[#allocation3 + $0x80] sm:$0xff] %vm204_vm0, %v6627_v6  ;;  %v6635_v2 = vld [vmem:[#allocation2 + $0x48] sm:$0xff] }
 0x482   : > { %2734 = vrot.lane.b32.xlu1 %v6631_v23, %s4898_s18  ;;  %2602 = vst.msk [vmem:[#allocation3 + $0x30] sm:$0xff] %vm204_vm0, %v6635_v2  ;;  %v6641_v22 = vld [vmem:[#allocation2 + $0x60] sm:$0xff] }
 0x483   : > { %2604 = vst.msk [vmem:[#allocation3 + $0x40] sm:$0xff] %vm204_vm0, %v6641_v22 }
 0x484   : > { %2738 = vrot.lane.b32.xlu0 %v6643_v36, %s4898_s18  ;;  %2557 = vst.msk [vmem:[#allocation2 + $0x119] sm:$0x1] %vm260_vm1, %v2539_v35  ;;  %v2504_v35 = vld [vmem:[#allocation2 + $0x122] sm:$0x1] }
 0x485   : > { %2521 = vst.msk [vmem:[#allocation2 + $0x108] sm:$0x1] %vm260_vm1, %v2503_v10 }
 0x486   : > { %2516 = vst.msk [vmem:[#allocation2 + $0x90] sm:$0x1] %vm260_vm1, %v2498_v47  ;;  %v6727_v47 = vld [vmem:[#allocation2 + $0x169] sm:$0xff] }
 0x487   : > { %2517 = vst.msk [vmem:[#allocation2 + $0xa8] sm:$0x1] %vm260_vm1, %v2499_v4 }
 0x488   : > { %2742 = vrot.lane.b32.xlu2 %v6649_v43, %s4898_s18  ;;  %2558 = vst.msk [vmem:[#allocation2 + $0x131] sm:$0x1] %vm260_vm1, %v2540_v21  ;;  %v2505_v21 = vld [vmem:[#allocation2 + $0x13a] sm:$0x1] }
 0x489   : > { %2559 = vst.msk [vmem:[#allocation2 + $0x149] sm:$0x1] %vm260_vm1, %v2541_v7 }
 0x48a   : > { %2740 = vrot.lane.b32.xlu1 %v6662_v40, %s4898_s18  ;;  %2621 = vst.msk [vmem:[#allocation3 + $0xc8] sm:$0xff] %vm204_vm0, %v6657_v29 }
 0x48b   : > { %2611 = vst.msk [vmem:[#allocation3 + $0x78] sm:$0xff] %vm204_vm0, %v6660_v9 }
 0x48c   : > { %2744 = vrot.lane.b32.xlu0 %v6671_v41, %s4898_s18  ;;  %7940 = vst [vmem:[#allocation34_spill] sm:$0xff] %v6677_v52  ;;  %v6679_v59 = vld [vmem:[#allocation2 + $0x108] sm:$0xff] }
 0x48d   : > { %2613 = vst.msk [vmem:[#allocation3 + $0x88] sm:$0xff] %vm204_vm0, %v6665_v30  ;;  %v6687_v5 = vld [vmem:[#allocation2 + $0x90] sm:$0xff] }
 0x48e   : > { %2618 = vst.msk [vmem:[#allocation3 + $0xb0] sm:$0xff] %vm204_vm0, %v6679_v59  ;;  %v6691_v12 = vld [vmem:[#allocation2 + $0xa8] sm:$0xff] }
 0x48f   : > { %2608 = vst.msk [vmem:[#allocation3 + $0x60] sm:$0xff] %vm204_vm0, %v6687_v5 }
 0x490   : > { %2748 = vrot.lane.b32.xlu2 %v6677_v52, %s4898_s18  ;;  %2610 = vst.msk [vmem:[#allocation3 + $0x70] sm:$0xff] %vm204_vm0, %v6691_v12 }
 0x491   : > { %2560 = vst.msk [vmem:[#allocation2 + $0x161] sm:$0x1] %vm260_vm1, %v2542_v32  ;;  %v6739_v32 = vld [vmem:[#allocation2 + $0x140] sm:$0xff] }
 0x492   : > { %2524 = vst.msk [vmem:[#allocation2 + $0x150] sm:$0x1] %vm260_vm1, %v2506_v44  ;;  %2746 = vrot.lane.b32.xlu1 %v6696_v13, %s4898_s18  ;;  %v2820_v44 = vld [vmem:[#allocation2 + $0x2] sm:$0xff] }
 0x493   : > { %2519 = vst.msk [vmem:[#allocation2 + $0xd8] sm:$0x1] %vm260_vm1, %v2501_v11  ;;  %v6743_v11 = vld [vmem:[#allocation2 + $0x158] sm:$0xff] }
 0x494   : > { %7941 = vst [vmem:[#allocation36_spill] sm:$0xff] %v6704_v19  ;;  %2750 = vrot.lane.b32.xlu0 %v6704_v19, %s4898_s18 }
 0x495   : > { %2520 = vst.msk [vmem:[#allocation2 + $0xf0] sm:$0x1] %vm260_vm1, %v2502_v37  ;;  %v6746_v37 = vld [vmem:[#allocation2 + $0x1a] sm:$0xff] }
 0x496   : > { %7942 = vst [vmem:[#allocation35_spill] sm:$0xff] %v6711_v8 }
 0x497   : > { %2561 = vst.msk [vmem:[#allocation2 + $0x179] sm:$0x1] %vm260_vm1, %v2543_v14  ;;  %v2507_v14 = vld [vmem:[#allocation2 + $0x16a] sm:$0x1] }
 0x498   : > { %2754 = vrot.lane.b32.xlu2 %v6711_v8, %s4898_s18  ;;  %2627 = vst.msk [vmem:[#allocation3 + $0xf8] sm:$0xff] %vm204_vm0, %v6702_v61  ;;  %v6763_v8 = vld [vmem:[#allocation2 + $0x22] sm:$0xff] }
 0x499   : > { %2617 = vst.msk [vmem:[#allocation3 + $0xa8] sm:$0xff] %vm204_vm0, %v6707_v15  ;;  %v6724_v10 = vld [vmem:[#allocation2 + $0x150] sm:$0xff] }
 0x49a   : > { %2619 = vst.msk [vmem:[#allocation3 + $0xb8] sm:$0xff] %vm204_vm0, %v6714_v39  ;;  %v6731_v4 = vld [vmem:[#allocation2 + $0xd8] sm:$0xff]  ;;  %2752 = vrot.lane.b32.xlu1 %v6727_v47, %s4898_s18 }
 0x49b   : > { %2522 = vst.msk [vmem:[#allocation2 + $0x120] sm:$0x1] %vm260_vm1, %v2504_v35 }
 0x49c   : > { %7943 = vst [vmem:[#allocation37_spill] sm:$0xff] %v6727_v47  ;;  %v6737_v7 = vld [vmem:[#allocation2 + $0xf0] sm:$0xff]  ;;  %2884 = vrot.lane.b32.xlu0 %v2820_v44, %s4899_s19  ;;  %v2508_v44 = vld [vmem:[#allocation2 + $0x182] sm:$0x1] }
 0x49d   : > { %2624 = vst.msk [vmem:[#allocation3 + $0xe0] sm:$0xff] %vm204_vm0, %v6724_v10  ;;  %v2829_v47 = vld [vmem:[#allocation2 + $0x6a] sm:$0xff] }
 0x49e   : > { %2614 = vst.msk [vmem:[#allocation3 + $0x90] sm:$0xff] %vm204_vm0, %v6731_v4 }
 0x49f   : > { %2616 = vst.msk [vmem:[#allocation3 + $0xa0] sm:$0xff] %vm204_vm0, %v6737_v7 }
 0x4a0   : > { %7944 = vst [vmem:[#allocation38_spill] sm:$0xff] %v6746_v37  ;;  %2888 = vrot.lane.b32.xlu2 %v6746_v37, %s4899_s19  ;;  %v2509_v37 = vld [vmem:[#allocation2 + $0x19a] sm:$0x1] }
 0x4a1   : > { %2523 = vst.msk [vmem:[#allocation2 + $0x138] sm:$0x1] %vm260_vm1, %v2505_v21  ;;  %v2821_v21 = vld [vmem:[#allocation2 + $0xa] sm:$0xff] }
 0x4a2   : > { %2623 = vst.msk [vmem:[#allocation3 + $0xd8] sm:$0xff] %vm204_vm0, %v6739_v32  ;;  %v2695_v35 = vpop.permute.xlu2 %2694  ;;  %v6755_v17 = vld [vmem:[#allocation2 + $0x120] sm:$0xff]  ;;  %2886 = vrot.lane.b32.xlu1 %v2821_v21, %s4899_s19 }
 0x4a3   : > { %2625 = vst.msk [vmem:[#allocation3 + $0xe8] sm:$0xff] %vm204_vm0, %v6743_v11 }
 0x4a4   : > { %2525 = vst.msk [vmem:[#allocation2 + $0x168] sm:$0x1] %vm260_vm1, %v2507_v14  ;;  %v2545_v14 = vld [vmem:[#allocation2 + $0x1a7] sm:$0x1]  ;;  %2890 = vrot.lane.b32.xlu0 %v6763_v8, %s4899_s19 }
 0x4a5   : > { %2789 = vst.msk [vmem:[#allocation3 + $0x8] sm:$0xff] %vm539_vm2, %v2695_v35  ;;  %v6770_v35 = vld [vmem:[#allocation2 + $0x3a] sm:$0xff] }
 0x4a6   : > { %2620 = vst.msk [vmem:[#allocation3 + $0xc0] sm:$0xff] %vm204_vm0, %v6755_v17 }
 0x4a7   : > { %2526 = vst.msk [vmem:[#allocation2 + $0x180] sm:$0x1] %vm260_vm1, %v2508_v44 }
 0x4a8   : > { %7945 = vst [vmem:[#allocation39_spill] sm:$0xff] %v6763_v8  ;;  %v6765_v19 = vld [vmem:[#allocation2 + $0x138] sm:$0xff]  ;;  %2894 = vrot.lane.b32.xlu2 %v6770_v35, %s4899_s19  ;;  %v2826_v8 = vld [vmem:[#allocation2 + $0x4a] sm:$0xff] }
 0x4a9   : > { %2562 = vst.msk [vmem:[#allocation2 + $0x191] sm:$0x1] %vm260_vm1, %v2544_v51  ;;  %v6783_v51 = vld [vmem:[#allocation2 + $0x32] sm:$0xff] }
 0x4aa   : > { %7946 = vst [vmem:[#allocation42_spill] sm:$0xff] %v6770_v35  ;;  %v2701_v21 = vpop.permute.xlu2 %2700  ;;  %2892 = vrot.lane.b32.xlu1 %v6783_v51, %s4899_s19  ;;  %v2828_v35 = vld [vmem:[#allocation2 + $0x62] sm:$0xff] }
 0x4ab   : > { %2622 = vst.msk [vmem:[#allocation3 + $0xd0] sm:$0xff] %vm204_vm0, %v6765_v19  ;;  %v6777_v44 = vld [vmem:[#allocation2 + $0x168] sm:$0xff] }
 0x4ac   : > { %2527 = vst.msk [vmem:[#allocation2 + $0x198] sm:$0x1] %vm260_vm1, %v2509_v37  ;;  %2896 = vrot.lane.b32.xlu0 %v2826_v8, %s4899_s19  ;;  %v2832_v8 = vld [vmem:[#allocation2 + $0x92] sm:$0xff] }
 0x4ad   : > { %2563 = vst.msk [vmem:[#allocation2 + $0x1a9] sm:$0x1] %vm260_vm1, %v2545_v14  ;;  %v2827_v14 = vld [vmem:[#allocation2 + $0x52] sm:$0xff] }
 0x4ae   : > { %2626 = vst.msk [vmem:[#allocation3 + $0xf0] sm:$0xff] %vm204_vm0, %v6777_v44 }
 0x4af   : > { %2792 = vst.msk [vmem:[#allocation3 + $0x20] sm:$0xff] %vm539_vm2, %v2701_v21  ;;  %v2831_v21 = vld [vmem:[#allocation2 + $0x82] sm:$0xff] }
 0x4b0   : > { %7947 = vst [vmem:[#allocation43_spill] sm:$0xff] %v6783_v51  ;;  %2900 = vrot.lane.b32.xlu2 %v2828_v35, %s4899_s19  ;;  %v2830_v51 = vld [vmem:[#allocation2 + $0x7a] sm:$0xff] }
 0x4b2   : > { %v2707_v37 = vpop.permute.xlu2 %2706  ;;  %2898 = vrot.lane.b32.xlu1 %v2827_v14, %s4899_s19 }
 0x4b3   : > { %2795 = vst.msk [vmem:[#allocation3 + $0x38] sm:$0xff] %vm539_vm2, %v2707_v37  ;;  %v2834_v37 = vld [vmem:[#allocation2 + $0xaa] sm:$0xff] }
 0x4b4   : > { %2902 = vrot.lane.b32.xlu0 %v2829_v47, %s4899_s19 }
 0x4b8   : > { %2906 = vrot.lane.b32.xlu2 %v2831_v21, %s4899_s19  ;;  %v2833_v21 = vld [vmem:[#allocation2 + $0x9a] sm:$0xff] }
 0x4ba   : > { %v2713_v52 = vpop.permute.xlu2 %2712  ;;  %2904 = vrot.lane.b32.xlu1 %v2830_v51, %s4899_s19 }
 0x4bb   : > { %2798 = vst.msk [vmem:[#allocation3 + $0x50] sm:$0xff] %vm539_vm2, %v2713_v52  ;;  %v2835_v52 = vld [vmem:[#allocation2 + $0xb2] sm:$0xff] }
 0x4bc   : > { %2908 = vrot.lane.b32.xlu0 %v2832_v8, %s4899_s19  ;;  %v2693_v35 = vpop.permute.xlu1 %2692  ;;  %v2837_v8 = vld [vmem:[#allocation2 + $0xca] sm:$0xff] }
 0x4bd   : > { %2788 = vst.msk [vmem:[#allocation3] sm:$0xff] %vm539_vm2, %v2693_v35 }
 0x4be   : > { %v2697_v14 = vpop.permute.xlu0 %2696 }
 0x4bf   : > { %2790 = vst.msk [vmem:[#allocation3 + $0x10] sm:$0xff] %vm539_vm2, %v2697_v14  ;;  %v2836_v14 = vld [vmem:[#allocation2 + $0xc2] sm:$0xff] }
 0x4c0   : > { %2912 = vrot.lane.b32.xlu2 %v2834_v37, %s4899_s19 }
 0x4c2   : > { %v2719_v47 = vpop.permute.xlu2 %2718  ;;  %2910 = vrot.lane.b32.xlu1 %v2833_v21, %s4899_s19 }
 0x4c3   : > { %2801 = vst.msk [vmem:[#allocation3 + $0x68] sm:$0xff] %vm539_vm2, %v2719_v47  ;;  %v6807_v47 = vld [vmem:[#allocation2 + $0xda] sm:$0xff] }
 0x4c4   : > { %2914 = vrot.lane.b32.xlu0 %v2835_v52, %s4899_s19  ;;  %v2699_v51 = vpop.permute.xlu1 %2698  ;;  %7948 = vst [vmem:[#allocation44_spill] sm:$0xff] %v6807_v47  ;;  %v6811_v52 = vld [vmem:[#allocation2 + $0xf2] sm:$0xff] }
 0x4c5   : > { %2791 = vst.msk [vmem:[#allocation3 + $0x18] sm:$0xff] %vm539_vm2, %v2699_v51 }
 0x4c6   : > { %v2703_v35 = vpop.permute.xlu0 %2702  ;;  %7949 = vst [vmem:[#allocation45_spill] sm:$0xff] %v6811_v52 }
 0x4c7   : > { %2793 = vst.msk [vmem:[#allocation3 + $0x28] sm:$0xff] %vm539_vm2, %v2703_v35  ;;  %v6818_v35 = vld [vmem:[#allocation2 + $0xe2] sm:$0xff] }
 0x4c8   : > { %2918 = vrot.lane.b32.xlu2 %v2837_v8, %s4899_s19  ;;  %7950 = vst [vmem:[#allocation46_spill] sm:$0xff] %v6818_v35 }
 0x4ca   : > { %v2725_v37 = vpop.permute.xlu2 %2724  ;;  %2916 = vrot.lane.b32.xlu1 %v2836_v14, %s4899_s19 }
 0x4cb   : > { %2804 = vst.msk [vmem:[#allocation3 + $0x80] sm:$0xff] %vm539_vm2, %v2725_v37  ;;  %v6822_v37 = vld [vmem:[#allocation2 + $0xfa] sm:$0xff] }
 0x4cc   : > { %2920 = vrot.lane.b32.xlu0 %v6807_v47, %s4899_s19  ;;  %v2705_v21 = vpop.permute.xlu1 %2704  ;;  %7951 = vst [vmem:[#allocation47_spill] sm:$0xff] %v6822_v37  ;;  %v2846_v47 = vld [vmem:[#allocation2 + $0x13a] sm:$0xff] }
 0x4cd   : > { %2794 = vst.msk [vmem:[#allocation3 + $0x30] sm:$0xff] %vm539_vm2, %v2705_v21  ;;  %v2843_v21 = vld [vmem:[#allocation2 + $0x112] sm:$0xff] }
 0x4ce   : > { %v2709_v51 = vpop.permute.xlu0 %2708 }
 0x4cf   : > { %2796 = vst.msk [vmem:[#allocation3 + $0x40] sm:$0xff] %vm539_vm2, %v2709_v51 }
 0x4d0   : > { %2924 = vrot.lane.b32.xlu2 %v6811_v52, %s4899_s19  ;;  %v6830_v52 = vld [vmem:[#allocation2 + $0x10a] sm:$0xff] }
 0x4d1   : > { %7952 = vst [vmem:[#allocation48_spill] sm:$0xff] %v6830_v52 }
 0x4d2   : > { %v2731_v8 = vpop.permute.xlu2 %2730  ;;  %2922 = vrot.lane.b32.xlu1 %v6818_v35, %s4899_s19  ;;  %v2844_v35 = vld [vmem:[#allocation2 + $0x122] sm:$0xff] }
 0x4d3   : > { %2807 = vst.msk [vmem:[#allocation3 + $0x98] sm:$0xff] %vm539_vm2, %v2731_v8 }
 0x4d4   : > { %2926 = vrot.lane.b32.xlu0 %v6822_v37, %s4899_s19  ;;  %v2711_v14 = vpop.permute.xlu1 %2710 }
 0x4d5   : > { %2797 = vst.msk [vmem:[#allocation3 + $0x48] sm:$0xff] %vm539_vm2, %v2711_v14 }
 0x4d6   : > { %v2715_v51 = vpop.permute.xlu0 %2714 }
 0x4d7   : > { %2799 = vst.msk [vmem:[#allocation3 + $0x58] sm:$0xff] %vm539_vm2, %v2715_v51  ;;  %v2845_v51 = vld [vmem:[#allocation2 + $0x12a] sm:$0xff] }
 0x4d8   : > { %2930 = vrot.lane.b32.xlu2 %v2843_v21, %s4899_s19 }
 0x4da   : > { %v2737_v8 = vpop.permute.xlu2 %2736  ;;  %2928 = vrot.lane.b32.xlu1 %v6830_v52, %s4899_s19 }
 0x4db   : > { %2810 = vst.msk [vmem:[#allocation3 + $0xb0] sm:$0xff] %vm539_vm2, %v2737_v8  ;;  %v2847_v8 = vld [vmem:[#allocation2 + $0x142] sm:$0xff] }
 0x4dc   : > { %2932 = vrot.lane.b32.xlu0 %v2844_v35, %s4899_s19  ;;  %v2717_v37 = vpop.permute.xlu1 %2716  ;;  %v2849_v35 = vld [vmem:[#allocation2 + $0x15a] sm:$0xff] }
 0x4dd   : > { %2800 = vst.msk [vmem:[#allocation3 + $0x60] sm:$0xff] %vm539_vm2, %v2717_v37 }
 0x4de   : > { %v2721_v14 = vpop.permute.xlu0 %2720 }
 0x4df   : > { %2802 = vst.msk [vmem:[#allocation3 + $0x70] sm:$0xff] %vm539_vm2, %v2721_v14  ;;  %v2848_v14 = vld [vmem:[#allocation2 + $0x152] sm:$0xff] }
 0x4e0   : > { %2936 = vrot.lane.b32.xlu2 %v2846_v47, %s4899_s19 }
 0x4e2   : > { %v2743_v21 = vpop.permute.xlu2 %2742  ;;  %2934 = vrot.lane.b32.xlu1 %v2845_v51, %s4899_s19 }
 0x4e3   : > { %2813 = vst.msk [vmem:[#allocation3 + $0xc8] sm:$0xff] %vm539_vm2, %v2743_v21  ;;  %v2850_v21 = vld [vmem:[#allocation2 + $0x16a] sm:$0xff] }
 0x4e4   : > { %2938 = vrot.lane.b32.xlu0 %v2847_v8, %s4899_s19  ;;  %v2723_v52 = vpop.permute.xlu1 %2722 }
 0x4e5   : > { %2803 = vst.msk [vmem:[#allocation3 + $0x78] sm:$0xff] %vm539_vm2, %v2723_v52 }
 0x4e6   : > { %v2727_v37 = vpop.permute.xlu0 %2726 }
 0x4e7   : > { %2805 = vst.msk [vmem:[#allocation3 + $0x88] sm:$0xff] %vm539_vm2, %v2727_v37 }
 0x4e8   : > { %2942 = vrot.lane.b32.xlu2 %v2849_v35, %s4899_s19  ;;  %v2851_v35 = vld [vmem:[#allocation2 + $0x172] sm:$0xff] }
 0x4ea   : > { %v2749_v47 = vpop.permute.xlu2 %2748  ;;  %2940 = vrot.lane.b32.xlu1 %v2848_v14, %s4899_s19 }
 0x4eb   : > { %2816 = vst.msk [vmem:[#allocation3 + $0xe0] sm:$0xff] %vm539_vm2, %v2749_v47 }
 0x4ec   : > { %2944 = vrot.lane.b32.xlu0 %v2850_v21, %s4899_s19  ;;  %v2729_v51 = vpop.permute.xlu1 %2728 }
 0x4ed   : > { %2806 = vst.msk [vmem:[#allocation3 + $0x90] sm:$0xff] %vm539_vm2, %v2729_v51 }
 0x4ee   : > { %v2733_v52 = vpop.permute.xlu0 %2732 }
 0x4ef   : > { %2808 = vst.msk [vmem:[#allocation3 + $0xa0] sm:$0xff] %vm539_vm2, %v2733_v52 }
 0x4f0   : > { %3076 = vrot.lane.b32.xlu2 %v6593_v58, %s4900_s20 }
 0x4f2   : > { %v2755_v8 = vpop.permute.xlu2 %2754  ;;  %2946 = vrot.lane.b32.xlu1 %v2851_v35, %s4899_s19 }
 0x4f3   : > { %2819 = vst.msk [vmem:[#allocation3 + $0xf8] sm:$0xff] %vm539_vm2, %v2755_v8 }
 0x4f4   : > { %3078 = vrot.lane.b32.xlu0 %v6567_v18, %s4900_s20  ;;  %v2735_v37 = vpop.permute.xlu1 %2734 }
 0x4f5   : > { %2809 = vst.msk [vmem:[#allocation3 + $0xa8] sm:$0xff] %vm539_vm2, %v2735_v37 }
 0x4f6   : > { %v2739_v47 = vpop.permute.xlu0 %2738 }
 0x4f7   : > { %2811 = vst.msk [vmem:[#allocation3 + $0xb8] sm:$0xff] %vm539_vm2, %v2739_v47 }
 0x4f8   : > { %3082 = vrot.lane.b32.xlu2 %v6587_v27, %s4900_s20 }
 0x4fa   : > { %v2889_v58 = vpop.permute.xlu2 %2888  ;;  %3080 = vrot.lane.b32.xlu1 %v6559_v31, %s4900_s20 }
 0x4fb   : > { %2982 = vst.msk [vmem:[#allocation3 + $0x10] sm:$0xff] %vm732_vm3, %v2889_v58 }
 0x4fc   : > { %3084 = vrot.lane.b32.xlu0 %v6635_v2, %s4900_s20  ;;  %v2741_v14 = vpop.permute.xlu1 %2740 }
 0x4fd   : > { %2812 = vst.msk [vmem:[#allocation3 + $0xc0] sm:$0xff] %vm539_vm2, %v2741_v14 }
 0x4fe   : > { %v2745_v18 = vpop.permute.xlu0 %2744 }
 0x4ff   : > { %2814 = vst.msk [vmem:[#allocation3 + $0xd0] sm:$0xff] %vm539_vm2, %v2745_v18 }
 0x500   : > { %3088 = vrot.lane.b32.xlu2 %v6641_v22, %s4900_s20 }
 0x502   : > { %v2895_v21 = vpop.permute.xlu2 %2894  ;;  %3086 = vrot.lane.b32.xlu1 %v6538_v34, %s4900_s20 }
 0x503   : > { %2985 = vst.msk [vmem:[#allocation3 + $0x28] sm:$0xff] %vm732_vm3, %v2895_v21 }
 0x504   : > { %3090 = vrot.lane.b32.xlu0 %v6616_v54, %s4900_s20  ;;  %v2747_v51 = vpop.permute.xlu1 %2746 }
 0x505   : > { %2815 = vst.msk [vmem:[#allocation3 + $0xd8] sm:$0xff] %vm539_vm2, %v2747_v51 }
 0x506   : > { %v2751_v52 = vpop.permute.xlu0 %2750 }
 0x507   : > { %2817 = vst.msk [vmem:[#allocation3 + $0xe8] sm:$0xff] %vm539_vm2, %v2751_v52  ;;  %v3043_v52 = vld [vmem:[#allocation2 + $0x188] sm:$0xff] }
 0x508   : > { %3094 = vrot.lane.b32.xlu2 %v6621_v38, %s4900_s20 }
 0x50a   : > { %v2901_v8 = vpop.permute.xlu2 %2900  ;;  %3092 = vrot.lane.b32.xlu1 %v6585_v55, %s4900_s20 }
 0x50b   : > { %2988 = vst.msk [vmem:[#allocation3 + $0x40] sm:$0xff] %vm732_vm3, %v2901_v8 }
 0x50c   : > { %3096 = vrot.lane.b32.xlu0 %v6687_v5, %s4900_s20  ;;  %v2753_v35 = vpop.permute.xlu1 %2752 }
 0x50d   : > { %2818 = vst.msk [vmem:[#allocation3 + $0xf0] sm:$0xff] %vm539_vm2, %v2753_v35 }
 0x50e   : > { %v2885_v37 = vpop.permute.xlu0 %2884 }
 0x50f   : > { %2980 = vst.msk [vmem:[#allocation3] sm:$0xff] %vm732_vm3, %v2885_v37 }
 0x510   : > { %3100 = vrot.lane.b32.xlu2 %v6691_v12, %s4900_s20 }
 0x512   : > { %v2907_v38 = vpop.permute.xlu2 %2906  ;;  %3098 = vrot.lane.b32.xlu1 %v6564_v56, %s4900_s20 }
 0x513   : > { %2991 = vst.msk [vmem:[#allocation3 + $0x58] sm:$0xff] %vm732_vm3, %v2907_v38 }
 0x514   : > { %3102 = vrot.lane.b32.xlu0 %v6660_v9, %s4900_s20  ;;  %v2887_v55 = vpop.permute.xlu1 %2886 }
 0x515   : > { %2981 = vst.msk [vmem:[#allocation3 + $0x8] sm:$0xff] %vm732_vm3, %v2887_v55  ;;  %v7955_v55 = vld [vmem:[#allocation36_spill] sm:$0xff] }
 0x516   : > { %v2891_v5 = vpop.permute.xlu0 %2890 }
 0x517   : > { %2983 = vst.msk [vmem:[#allocation3 + $0x18] sm:$0xff] %vm732_vm3, %v2891_v5 }
 0x518   : > { %3106 = vrot.lane.b32.xlu2 %v6665_v30, %s4900_s20 }
 0x51a   : > { %v2913_v12 = vpop.permute.xlu2 %2912  ;;  %3104 = vrot.lane.b32.xlu1 %v6627_v6, %s4900_s20 }
 0x51b   : > { %2994 = vst.msk [vmem:[#allocation3 + $0x70] sm:$0xff] %vm732_vm3, %v2913_v12  ;;  %v3235_v12 = vld [vmem:[#allocation2 + $0x189] sm:$0xff] }
 0x51c   : > { %3108 = vrot.lane.b32.xlu0 %v6731_v4, %s4900_s20  ;;  %v2893_v56 = vpop.permute.xlu1 %2892 }
 0x51d   : > { %2984 = vst.msk [vmem:[#allocation3 + $0x20] sm:$0xff] %vm732_vm3, %v2893_v56 }
 0x51e   : > { %v2897_v9 = vpop.permute.xlu0 %2896 }
 0x51f   : > { %2986 = vst.msk [vmem:[#allocation3 + $0x30] sm:$0xff] %vm732_vm3, %v2897_v9 }
 0x520   : > { %3112 = vrot.lane.b32.xlu2 %v6737_v7, %s4900_s20 }
 0x522   : > { %v2919_v30 = vpop.permute.xlu2 %2918  ;;  %3110 = vrot.lane.b32.xlu1 %v6609_v63, %s4900_s20 }
 0x523   : > { %2997 = vst.msk [vmem:[#allocation3 + $0x88] sm:$0xff] %vm732_vm3, %v2919_v30  ;;  %v3234_v30 = vld [vmem:[#allocation2 + $0x181] sm:$0xff] }
 0x524   : > { %3114 = vrot.lane.b32.xlu0 %v6707_v15, %s4900_s20  ;;  %v2899_v6 = vpop.permute.xlu1 %2898 }
 0x525   : > { %2987 = vst.msk [vmem:[#allocation3 + $0x38] sm:$0xff] %vm732_vm3, %v2899_v6  ;;  %v7957_v6 = vld [vmem:[#allocation38_spill] sm:$0xff] }
 0x526   : > { %v2903_v4 = vpop.permute.xlu0 %2902 }
 0x527   : > { %2989 = vst.msk [vmem:[#allocation3 + $0x48] sm:$0xff] %vm732_vm3, %v2903_v4 }
 0x528   : > { %3118 = vrot.lane.b32.xlu2 %v6714_v39, %s4900_s20 }
 0x52a   : > { %v2925_v47 = vpop.permute.xlu2 %2924  ;;  %3116 = vrot.lane.b32.xlu1 %v6679_v59, %s4900_s20 }
 0x52b   : > { %3000 = vst.msk [vmem:[#allocation3 + $0xa0] sm:$0xff] %vm732_vm3, %v2925_v47  ;;  %v7958_v47 = vld [vmem:[#allocation43_spill] sm:$0xff] }
 0x52c   : > { %3120 = vrot.lane.b32.xlu0 %v6755_v17, %s4900_s20  ;;  %v2905_v63 = vpop.permute.xlu1 %2904 }
 0x52d   : > { %2990 = vst.msk [vmem:[#allocation3 + $0x50] sm:$0xff] %vm732_vm3, %v2905_v63 }
 0x52e   : > { %v2909_v58 = vpop.permute.xlu0 %2908 }
 0x52f   : > { %2992 = vst.msk [vmem:[#allocation3 + $0x60] sm:$0xff] %vm732_vm3, %v2909_v58 }
 0x530   : > { %3124 = vrot.lane.b32.xlu2 %v6765_v19, %s4900_s20 }
 0x532   : > { %v2931_v14 = vpop.permute.xlu2 %2930  ;;  %3122 = vrot.lane.b32.xlu1 %v6657_v29, %s4900_s20 }
 0x533   : > { %3003 = vst.msk [vmem:[#allocation3 + $0xb8] sm:$0xff] %vm732_vm3, %v2931_v14  ;;  %v7959_v14 = vld [vmem:[#allocation39_spill] sm:$0xff] }
 0x534   : > { %3126 = vrot.lane.b32.xlu0 %v6739_v32, %s4900_s20  ;;  %v2911_v18 = vpop.permute.xlu1 %2910  ;;  %v3042_v32 = vld [vmem:[#allocation2 + $0x180] sm:$0xff] }
 0x535   : > { %2993 = vst.msk [vmem:[#allocation3 + $0x68] sm:$0xff] %vm732_vm3, %v2911_v18  ;;  %v7960_v18 = vld [vmem:[#allocation42_spill] sm:$0xff] }
 0x536   : > { %v2915_v21 = vpop.permute.xlu0 %2914 }
 0x537   : > { %2995 = vst.msk [vmem:[#allocation3 + $0x78] sm:$0xff] %vm732_vm3, %v2915_v21 }
 0x538   : > { %3130 = vrot.lane.b32.xlu2 %v6743_v11, %s4900_s20 }
 0x53a   : > { %v2937_v19 = vpop.permute.xlu2 %2936  ;;  %3128 = vrot.lane.b32.xlu1 %v6724_v10, %s4900_s20 }
 0x53b   : > { %3006 = vst.msk [vmem:[#allocation3 + $0xd0] sm:$0xff] %vm732_vm3, %v2937_v19  ;;  %v3780_v19 = vld [vmem:[#allocation2 + $0x31] sm:$0xff] }
 0x53c   : > { %3132 = vrot.lane.b32.xlu0 %v6777_v44, %s4900_s20  ;;  %v2917_v29 = vpop.permute.xlu1 %2916 }
 0x53d   : > { %2996 = vst.msk [vmem:[#allocation3 + $0x80] sm:$0xff] %vm732_vm3, %v2917_v29 }
 0x53e   : > { %v2921_v51 = vpop.permute.xlu0 %2920 }
 0x53f   : > { %2998 = vst.msk [vmem:[#allocation3 + $0x90] sm:$0xff] %vm732_vm3, %v2921_v51 }
 0x540   : > { %3136 = vrot.lane.b32.xlu2 %v3042_v32, %s4900_s20 }
 0x542   : > { %v2943_v11 = vpop.permute.xlu2 %2942  ;;  %3134 = vrot.lane.b32.xlu1 %v6702_v61, %s4900_s20 }
 0x543   : > { %3009 = vst.msk [vmem:[#allocation3 + $0xe8] sm:$0xff] %vm732_vm3, %v2943_v11  ;;  %v3781_v11 = vld [vmem:[#allocation2 + $0x39] sm:$0xff] }
 0x544   : > { %3138 = vrot.lane.b32.xlu0 %v3043_v52, %s4900_s20  ;;  %v2923_v10 = vpop.permute.xlu1 %2922 }
 0x545   : > { %2999 = vst.msk [vmem:[#allocation3 + $0x98] sm:$0xff] %vm732_vm3, %v2923_v10 }
 0x546   : > { %v2927_v44 = vpop.permute.xlu0 %2926 }
 0x547   : > { %3001 = vst.msk [vmem:[#allocation3 + $0xa8] sm:$0xff] %vm732_vm3, %v2927_v44  ;;  %v3782_v44 = vld [vmem:[#allocation2 + $0x49] sm:$0xff] }
 0x548   : > { %3270 = vrot.lane.b32.xlu2 %v6463_v28, %s4901_s21 }
 0x54a   : > { %v3077_v8 = vpop.permute.xlu2 %3076  ;;  %3268 = vrot.lane.b32.xlu1 %v6430_v57, %s4901_s21 }
 0x54b   : > { %3172 = vst.msk [vmem:[#allocation3] sm:$0xff] %vm925_vm4, %v3077_v8 }
 0x54c   : > { %3272 = vrot.lane.b32.xlu0 %v6439_v48, %s4901_s21  ;;  %v2929_v61 = vpop.permute.xlu1 %2928 }
 0x54d   : > { %3002 = vst.msk [vmem:[#allocation3 + $0xb0] sm:$0xff] %vm732_vm3, %v2929_v61 }
 0x54e   : > { %v2933_v35 = vpop.permute.xlu0 %2932 }
 0x54f   : > { %3004 = vst.msk [vmem:[#allocation3 + $0xc0] sm:$0xff] %vm732_vm3, %v2933_v35  ;;  %v3974_v35 = vld [vmem:[#allocation2 + $0x4a] sm:$0xff] }
 0x550   : > { %3276 = vrot.lane.b32.xlu2 %v6500_v24, %s4901_s21 }
 0x552   : > { %v3083_v28 = vpop.permute.xlu2 %3082  ;;  %3274 = vrot.lane.b32.xlu1 %v6475_v49, %s4901_s21 }
 0x553   : > { %3175 = vst.msk [vmem:[#allocation3 + $0x18] sm:$0xff] %vm925_vm4, %v3083_v28  ;;  %v7961_v28 = vld [vmem:[#allocation44_spill] sm:$0xff] }
 0x554   : > { %3278 = vrot.lane.b32.xlu0 %v6483_v33, %s4901_s21  ;;  %v2935_v57 = vpop.permute.xlu1 %2934 }
 0x555   : > { %3005 = vst.msk [vmem:[#allocation3 + $0xc8] sm:$0xff] %vm732_vm3, %v2935_v57 }
 0x556   : > { %v2939_v48 = vpop.permute.xlu0 %2938 }
 0x557   : > { %3007 = vst.msk [vmem:[#allocation3 + $0xd8] sm:$0xff] %vm732_vm3, %v2939_v48 }
 0x558   : > { %3282 = vrot.lane.b32.xlu2 %v6520_v42, %s4901_s21 }
 0x55a   : > { %v3089_v24 = vpop.permute.xlu2 %3088  ;;  %3280 = vrot.lane.b32.xlu1 %v6506_v60, %s4901_s21 }
 0x55b   : > { %3178 = vst.msk [vmem:[#allocation3 + $0x30] sm:$0xff] %vm925_vm4, %v3089_v24  ;;  %v3783_v24 = vld [vmem:[#allocation2 + $0x51] sm:$0xff] }
 0x55c   : > { %3284 = vrot.lane.b32.xlu0 %v6511_v25, %s4901_s21  ;;  %v2941_v49 = vpop.permute.xlu1 %2940 }
 0x55d   : > { %3008 = vst.msk [vmem:[#allocation3 + $0xe0] sm:$0xff] %vm732_vm3, %v2941_v49  ;;  %v3975_v49 = vld [vmem:[#allocation2 + $0x52] sm:$0xff] }
 0x55e   : > { %v2945_v33 = vpop.permute.xlu0 %2944 }
 0x55f   : > { %3010 = vst.msk [vmem:[#allocation3 + $0xf0] sm:$0xff] %vm732_vm3, %v2945_v33 }
 0x560   : > { %3288 = vrot.lane.b32.xlu2 %v6541_v26, %s4901_s21 }
 0x562   : > { %v3095_v42 = vpop.permute.xlu2 %3094  ;;  %3286 = vrot.lane.b32.xlu1 %v6525_v3, %s4901_s21 }
 0x563   : > { %3181 = vst.msk [vmem:[#allocation3 + $0x48] sm:$0xff] %vm925_vm4, %v3095_v42 }
 0x564   : > { %3290 = vrot.lane.b32.xlu0 %v6530_v45, %s4901_s21  ;;  %v2947_v60 = vpop.permute.xlu1 %2946 }
 0x565   : > { %3011 = vst.msk [vmem:[#allocation3 + $0xf8] sm:$0xff] %vm732_vm3, %v2947_v60  ;;  %v3796_v60 = vld [vmem:[#allocation2 + $0xf1] sm:$0xff] }
 0x566   : > { %v3079_v25 = vpop.permute.xlu0 %3078 }
 0x567   : > { %3173 = vst.msk [vmem:[#allocation3 + $0x8] sm:$0xff] %vm925_vm4, %v3079_v25 }
 0x568   : > { %3294 = vrot.lane.b32.xlu2 %v6569_v20, %s4901_s21 }
 0x56a   : > { %v3101_v26 = vpop.permute.xlu2 %3100  ;;  %3292 = vrot.lane.b32.xlu1 %v6548_v16, %s4901_s21 }
 0x56b   : > { %3184 = vst.msk [vmem:[#allocation3 + $0x60] sm:$0xff] %vm925_vm4, %v3101_v26 }
 0x56c   : > { %3296 = vrot.lane.b32.xlu0 %v6553_v50, %s4901_s21  ;;  %v3081_v3 = vpop.permute.xlu1 %3080 }
 0x56d   : > { %3174 = vst.msk [vmem:[#allocation3 + $0x10] sm:$0xff] %vm925_vm4, %v3081_v3  ;;  %v7962_v3 = vld [vmem:[#allocation45_spill] sm:$0xff] }
 0x56e   : > { %v3085_v45 = vpop.permute.xlu0 %3084 }
 0x56f   : > { %3176 = vst.msk [vmem:[#allocation3 + $0x20] sm:$0xff] %vm925_vm4, %v3085_v45  ;;  %v3784_v45 = vld [vmem:[#allocation2 + $0x61] sm:$0xff] }
 0x570   : > { %3300 = vrot.lane.b32.xlu2 %v6600_v53, %s4901_s21 }
 0x572   : > { %v3107_v20 = vpop.permute.xlu2 %3106  ;;  %3298 = vrot.lane.b32.xlu1 %v6576_v0, %s4901_s21 }
 0x573   : > { %3187 = vst.msk [vmem:[#allocation3 + $0x78] sm:$0xff] %vm925_vm4, %v3107_v20 }
 0x574   : > { %3302 = vrot.lane.b32.xlu0 %v6582_v1, %s4901_s21  ;;  %v3087_v16 = vpop.permute.xlu1 %3086 }
 0x575   : > { %3177 = vst.msk [vmem:[#allocation3 + $0x28] sm:$0xff] %vm925_vm4, %v3087_v16 }
 0x576   : > { %v3091_v50 = vpop.permute.xlu0 %3090 }
 0x577   : > { %3179 = vst.msk [vmem:[#allocation3 + $0x38] sm:$0xff] %vm925_vm4, %v3091_v50  ;;  %v7963_v50 = vld [vmem:[#allocation46_spill] sm:$0xff] }
 0x578   : > { %3306 = vrot.lane.b32.xlu2 %v6631_v23, %s4901_s21 }
 0x57a   : > { %v3113_v53 = vpop.permute.xlu2 %3112  ;;  %3304 = vrot.lane.b32.xlu1 %v6606_v46, %s4901_s21 }
 0x57b   : > { %3190 = vst.msk [vmem:[#allocation3 + $0x90] sm:$0xff] %vm925_vm4, %v3113_v53 }
 0x57c   : > { %3308 = vrot.lane.b32.xlu0 %v6613_v62, %s4901_s21  ;;  %v3093_v0 = vpop.permute.xlu1 %3092 }
 0x57d   : > { %3180 = vst.msk [vmem:[#allocation3 + $0x40] sm:$0xff] %vm925_vm4, %v3093_v0 }
 0x57e   : > { %v3097_v1 = vpop.permute.xlu0 %3096 }
 0x57f   : > { %3182 = vst.msk [vmem:[#allocation3 + $0x50] sm:$0xff] %vm925_vm4, %v3097_v1 }
 0x580   : > { %3312 = vrot.lane.b32.xlu2 %v6662_v40, %s4901_s21 }
 0x582   : > { %v3119_v23 = vpop.permute.xlu2 %3118  ;;  %3310 = vrot.lane.b32.xlu1 %v6643_v36, %s4901_s21  ;;  %v7953_v36 = vld [vmem:[#allocation34_spill] sm:$0xff] }
 0x583   : > { %3193 = vst.msk [vmem:[#allocation3 + $0xa8] sm:$0xff] %vm925_vm4, %v3119_v23  ;;  %v3976_v23 = vld [vmem:[#allocation2 + $0x62] sm:$0xff] }
 0x584   : > { %3314 = vrot.lane.b32.xlu0 %v6649_v43, %s4901_s21  ;;  %v3099_v46 = vpop.permute.xlu1 %3098  ;;  %v7954_v43 = vld [vmem:[#allocation37_spill] sm:$0xff] }
 0x585   : > { %3183 = vst.msk [vmem:[#allocation3 + $0x58] sm:$0xff] %vm925_vm4, %v3099_v46  ;;  %v7964_v46 = vld [vmem:[#allocation47_spill] sm:$0xff] }
 0x586   : > { %v3103_v62 = vpop.permute.xlu0 %3102 }
 0x587   : > { %3185 = vst.msk [vmem:[#allocation3 + $0x68] sm:$0xff] %vm925_vm4, %v3103_v62 }
 0x588   : > { %3318 = vrot.lane.b32.xlu2 %v6696_v13, %s4901_s21 }
 0x58a   : > { %v3125_v40 = vpop.permute.xlu2 %3124  ;;  %3316 = vrot.lane.b32.xlu1 %v6671_v41, %s4901_s21  ;;  %v7956_v41 = vld [vmem:[#allocation35_spill] sm:$0xff] }
 0x58b   : > { %3196 = vst.msk [vmem:[#allocation3 + $0xc0] sm:$0xff] %vm925_vm4, %v3125_v40 }
 0x58c   : > { %3320 = vrot.lane.b32.xlu0 %v7953_v36, %s4901_s21  ;;  %v3105_v37 = vpop.permute.xlu1 %3104 }
 0x58d   : > { %3186 = vst.msk [vmem:[#allocation3 + $0x70] sm:$0xff] %vm925_vm4, %v3105_v37 }
 0x58e   : > { %v3109_v38 = vpop.permute.xlu0 %3108 }
 0x58f   : > { %3188 = vst.msk [vmem:[#allocation3 + $0x80] sm:$0xff] %vm925_vm4, %v3109_v38  ;;  %v3977_v38 = vld [vmem:[#allocation2 + $0x6a] sm:$0xff] }
 0x590   : > { %3324 = vrot.lane.b32.xlu2 %v7954_v43, %s4901_s21  ;;  %v3785_v43 = vld [vmem:[#allocation2 + $0x69] sm:$0xff] }
 0x592   : > { %v3131_v13 = vpop.permute.xlu2 %3130  ;;  %3322 = vrot.lane.b32.xlu1 %v7955_v55, %s4901_s21  ;;  %v7965_v55 = vld [vmem:[#allocation48_spill] sm:$0xff] }
 0x593   : > { %3199 = vst.msk [vmem:[#allocation3 + $0xd8] sm:$0xff] %vm925_vm4, %v3131_v13 }
 0x594   : > { %3326 = vrot.lane.b32.xlu0 %v7956_v41, %s4901_s21  ;;  %v3111_v5 = vpop.permute.xlu1 %3110 }
 0x595   : > { %3189 = vst.msk [vmem:[#allocation3 + $0x88] sm:$0xff] %vm925_vm4, %v3111_v5  ;;  %v3798_v5 = vld [vmem:[#allocation2 + $0x109] sm:$0xff] }
 0x596   : > { %v3115_v56 = vpop.permute.xlu0 %3114 }
 0x597   : > { %3191 = vst.msk [vmem:[#allocation3 + $0x98] sm:$0xff] %vm925_vm4, %v3115_v56  ;;  %v3415_v56 = vld [vmem:[#allocation2 + $0xfa] sm:$0xff] }
 0x598   : > { %3330 = vrot.lane.b32.xlu2 %v3235_v12, %s4901_s21 }
 0x59a   : > { %v3137_v9 = vpop.permute.xlu2 %3136  ;;  %3328 = vrot.lane.b32.xlu1 %v3234_v30, %s4901_s21 }
 0x59b   : > { %3202 = vst.msk [vmem:[#allocation3 + $0xf0] sm:$0xff] %vm925_vm4, %v3137_v9 }
 0x59c   : > { %3460 = vrot.lane.b32.xlu0 %v7957_v6, %s4902_s22  ;;  %v3117_v4 = vpop.permute.xlu1 %3116  ;;  %v4200_v6 = vld [vmem:[%s7840_s2 + $0x20] sm:$0xf] }
 0x59d   : > { %3192 = vst.msk [vmem:[#allocation3 + $0xa0] sm:$0xff] %vm925_vm4, %v3117_v4  ;;  %v4199_v4 = vld [vmem:[%s7840_s2 + $0x18] sm:$0xff]  ;;  %4823 = vmatpush.msk.msra.mxu1 %vm2058_vm9, %v4200_v6  ;;  %4865 = vmatpush.msk.msra.mxu3 %vm2058_vm9, %v4200_v6 }
 0x59e   : > { %v3121_v63 = vpop.permute.xlu0 %3120 }
 0x59f   : > { %3194 = vst.msk [vmem:[#allocation3 + $0xb0] sm:$0xff] %vm925_vm4, %v3121_v63  ;;  %v4198_v63 = vld [vmem:[%s7840_s2 + $0x10] sm:$0xff]  ;;  %4312 = vmatpush.msra.mxu1 %v4199_v4  ;;  %4866 = vmatpush.msra.mxu3 %v4199_v4 }
 0x5a0   : > { %3464 = vrot.lane.b32.xlu2 %v7958_v47, %s4902_s22  ;;  %v3790_v4 = vld [vmem:[#allocation2 + $0xa9] sm:$0xff] }
 0x5a1   : > { %4313 = vmatpush.msra.mxu1 %v4198_v63  ;;  %4867 = vmatpush.msra.mxu3 %v4198_v63 }
 0x5a2   : > { %v3271_v58 = vpop.permute.xlu2 %3270  ;;  %3462 = vrot.lane.b32.xlu1 %v7959_v14, %s4902_s22 }
 0x5a3   : > { %3365 = vst.msk [vmem:[#allocation3 + $0x8] sm:$0xff] %vm1118_vm5, %v3271_v58  ;;  %v3786_v58 = vld [vmem:[#allocation2 + $0x79] sm:$0xff] }
 0x5a4   : > { %3466 = vrot.lane.b32.xlu0 %v7960_v18, %s4902_s22  ;;  %v3123_v21 = vpop.permute.xlu1 %3122 }
 0x5a5   : > { %3195 = vst.msk [vmem:[#allocation3 + $0xb8] sm:$0xff] %vm925_vm4, %v3123_v21  ;;  %v4197_v21 = vld [vmem:[%s7840_s2 + $0x8] sm:$0xff] }
 0x5a6   : > { %v3127_v29 = vpop.permute.xlu0 %3126  ;;  %4314 = vmatpush.msra.mxu1 %v4197_v21  ;;  %4868 = vmatpush.msra.mxu3 %v4197_v21  ;;  %v3803_v21 = vld [vmem:[#allocation2 + $0x141] sm:$0xff] }
 0x5a7   : > { %3197 = vst.msk [vmem:[#allocation3 + $0xc8] sm:$0xff] %vm925_vm4, %v3127_v29 }
 0x5a8   : > { %3844 = vrot.lane.b32.xlu2 %v3780_v19, %s4904_s24 }
 0x5aa   : > { %v3277_v32 = vpop.permute.xlu2 %3276  ;;  %3652 = vrot.lane.b32.xlu1 %v6559_v31, %s4903_s23 }
 0x5ab   : > { %3368 = vst.msk [vmem:[#allocation3 + $0x20] sm:$0xff] %vm1118_vm5, %v3277_v32  ;;  %v4196_v32 = vld [vmem:[%s7840_s2] sm:$0xff] }
 0x5ac   : > { %4036 = vrot.lane.b32.xlu0 %v7958_v47, %s4905_s25  ;;  %v3129_v51 = vpop.permute.xlu1 %3128  ;;  %v3594_v47 = vld [vmem:[#allocation2 + $0x78] sm:$0xff]  ;;  %4315 = vmatpush.msra.mxu1 %v4196_v32 }
 0x5ad   : > { %3198 = vst.msk [vmem:[#allocation3 + $0xd0] sm:$0xff] %vm925_vm4, %v3129_v51  ;;  %4869 = vmatpush.msra.mxu3 %v4196_v32  ;;  %v3799_v51 = vld [vmem:[#allocation2 + $0x111] sm:$0xff] }
 0x5ae   : > { %v3133_v52 = vpop.permute.xlu0 %3132 }
 0x5af   : > { %3200 = vst.msk [vmem:[#allocation3 + $0xe0] sm:$0xff] %vm925_vm4, %v3133_v52 }
 0x5b0   : > { %3846 = vrot.lane.b32.xlu2 %v3781_v11, %s4904_s24 }
 0x5b2   : > { %v3283_v10 = vpop.permute.xlu2 %3282  ;;  %3654 = vrot.lane.b32.xlu1 %v6587_v27, %s4903_s23 }
 0x5b3   : > { %3371 = vst.msk [vmem:[#allocation3 + $0x38] sm:$0xff] %vm1118_vm5, %v3283_v10 }
 0x5b4   : > { %4038 = vrot.lane.b32.xlu0 %v7960_v18, %s4905_s25  ;;  %v3135_v31 = vpop.permute.xlu1 %3134  ;;  %v3978_v18 = vld [vmem:[#allocation2 + $0x7a] sm:$0xff] }
 0x5b5   : > { %3201 = vst.msk [vmem:[#allocation3 + $0xe8] sm:$0xff] %vm925_vm4, %v3135_v31  ;;  %v3991_v31 = vld [vmem:[#allocation2 + $0x112] sm:$0xff] }
 0x5b6   : > { %v3139_v8 = vpop.permute.xlu0 %3138 }
 0x5b7   : > { %3203 = vst.msk [vmem:[#allocation3 + $0xf8] sm:$0xff] %vm925_vm4, %v3139_v8 }
 0x5b8   : > { %3848 = vrot.lane.b32.xlu2 %v3782_v44, %s4904_s24  ;;  %v3595_v44 = vld [vmem:[#allocation2 + $0x80] sm:$0xff] }
 0x5ba   : > { %v3289_v61 = vpop.permute.xlu2 %3288  ;;  %3656 = vrot.lane.b32.xlu1 %v6635_v2, %s4903_s23 }
 0x5bb   : > { %3374 = vst.msk [vmem:[#allocation3 + $0x50] sm:$0xff] %vm1118_vm5, %v3289_v61 }
 0x5bc   : > { %4040 = vrot.lane.b32.xlu0 %v3974_v35, %s4905_s25  ;;  %v3269_v27 = vpop.permute.xlu1 %3268 }
 0x5bd   : > { %3364 = vst.msk [vmem:[#allocation3] sm:$0xff] %vm1118_vm5, %v3269_v27  ;;  %v3416_v27 = vld [vmem:[#allocation2 + $0x10a] sm:$0xff] }
 0x5be   : > { %v3273_v57 = vpop.permute.xlu0 %3272 }
 0x5bf   : > { %3366 = vst.msk [vmem:[#allocation3 + $0x10] sm:$0xff] %vm1118_vm5, %v3273_v57  ;;  %v3800_v57 = vld [vmem:[#allocation2 + $0x121] sm:$0xff] }
 0x5c0   : > { %3492 = vrot.lane.b32.xlu2 %v7961_v28, %s4902_s22 }
 0x5c2   : > { %v3295_v48 = vpop.permute.xlu2 %3294  ;;  %3658 = vrot.lane.b32.xlu1 %v6538_v34, %s4903_s23 }
 0x5c3   : > { %3377 = vst.msk [vmem:[#allocation3 + $0x68] sm:$0xff] %vm1118_vm5, %v3295_v48 }
 0x5c4   : > { %3850 = vrot.lane.b32.xlu0 %v3783_v24, %s4904_s24  ;;  %v3275_v2 = vpop.permute.xlu1 %3274 }
 0x5c5   : > { %3367 = vst.msk [vmem:[#allocation3 + $0x18] sm:$0xff] %vm1118_vm5, %v3275_v2  ;;  %v3979_v2 = vld [vmem:[#allocation2 + $0x82] sm:$0xff] }
 0x5c6   : > { %v3279_v33 = vpop.permute.xlu0 %3278 }
 0x5c7   : > { %3369 = vst.msk [vmem:[#allocation3 + $0x28] sm:$0xff] %vm1118_vm5, %v3279_v33 }
 0x5c8   : > { %4042 = vrot.lane.b32.xlu2 %v3975_v49, %s4905_s25 }
 0x5ca   : > { %v3301_v42 = vpop.permute.xlu2 %3300  ;;  %3684 = vrot.lane.b32.xlu1 %v6737_v7, %s4903_s23 }
 0x5cb   : > { %3380 = vst.msk [vmem:[#allocation3 + $0x80] sm:$0xff] %vm1118_vm5, %v3301_v42 }
 0x5cc   : > { %3876 = vrot.lane.b32.xlu0 %v3796_v60, %s4904_s24  ;;  %v3281_v34 = vpop.permute.xlu1 %3280 }
 0x5cd   : > { %3370 = vst.msk [vmem:[#allocation3 + $0x30] sm:$0xff] %vm1118_vm5, %v3281_v34 }
 0x5ce   : > { %v3285_v25 = vpop.permute.xlu0 %3284 }
 0x5cf   : > { %3372 = vst.msk [vmem:[#allocation3 + $0x40] sm:$0xff] %vm1118_vm5, %v3285_v25 }
 0x5d0   : > { %3468 = vrot.lane.b32.xlu2 %v3974_v35, %s4902_s22 }
 0x5d2   : > { %v3307_v26 = vpop.permute.xlu2 %3306  ;;  %4068 = vrot.lane.b32.xlu1 %v7962_v3, %s4905_s25 }
 0x5d3   : > { %3383 = vst.msk [vmem:[#allocation3 + $0x98] sm:$0xff] %vm1118_vm5, %v3307_v26  ;;  %v3609_v26 = vld [vmem:[#allocation2 + $0x128] sm:$0xff] }
 0x5d4   : > { %3660 = vrot.lane.b32.xlu0 %v6641_v22, %s4903_s23  ;;  %v3287_v7 = vpop.permute.xlu1 %3286  ;;  %v3797_v22 = vld [vmem:[#allocation2 + $0xf9] sm:$0xff] }
 0x5d5   : > { %3373 = vst.msk [vmem:[#allocation3 + $0x48] sm:$0xff] %vm1118_vm5, %v3287_v7 }
 0x5d6   : > { %v3291_v20 = vpop.permute.xlu0 %3290 }
 0x5d7   : > { %3375 = vst.msk [vmem:[#allocation3 + $0x58] sm:$0xff] %vm1118_vm5, %v3291_v20  ;;  %v3788_v20 = vld [vmem:[#allocation2 + $0x91] sm:$0xff] }
 0x5d8   : > { %3852 = vrot.lane.b32.xlu2 %v3784_v45, %s4904_s24 }
 0x5da   : > { %v3313_v16 = vpop.permute.xlu2 %3312  ;;  %3494 = vrot.lane.b32.xlu1 %v7963_v50, %s4902_s22 }
 0x5db   : > { %3386 = vst.msk [vmem:[#allocation3 + $0xb0] sm:$0xff] %vm1118_vm5, %v3313_v16  ;;  %v3980_v16 = vld [vmem:[#allocation2 + $0x92] sm:$0xff] }
 0x5dc   : > { %3686 = vrot.lane.b32.xlu0 %v6707_v15, %s4903_s23  ;;  %v3293_v53 = vpop.permute.xlu1 %3292 }
 0x5dd   : > { %3376 = vst.msk [vmem:[#allocation3 + $0x60] sm:$0xff] %vm1118_vm5, %v3293_v53  ;;  %v3993_v53 = vld [vmem:[#allocation2 + $0x12a] sm:$0xff] }
 0x5de   : > { %v3297_v0 = vpop.permute.xlu0 %3296 }
 0x5df   : > { %3378 = vst.msk [vmem:[#allocation3 + $0x70] sm:$0xff] %vm1118_vm5, %v3297_v0 }
 0x5e0   : > { %3878 = vrot.lane.b32.xlu2 %v3797_v22, %s4904_s24 }
 0x5e2   : > { %v3319_v1 = vpop.permute.xlu2 %3318  ;;  %4044 = vrot.lane.b32.xlu1 %v3976_v23, %s4905_s25 }
 0x5e3   : > { %3389 = vst.msk [vmem:[#allocation3 + $0xc8] sm:$0xff] %vm1118_vm5, %v3319_v1 }
 0x5e4   : > { %4070 = vrot.lane.b32.xlu0 %v7964_v46, %s4905_s25  ;;  %v3299_v62 = vpop.permute.xlu1 %3298 }
 0x5e5   : > { %3379 = vst.msk [vmem:[#allocation3 + $0x78] sm:$0xff] %vm1118_vm5, %v3299_v62 }
 0x5e6   : > { %v3303_v15 = vpop.permute.xlu0 %3302 }
 0x5e7   : > { %3381 = vst.msk [vmem:[#allocation3 + $0x88] sm:$0xff] %vm1118_vm5, %v3303_v15 }
 0x5e8   : > { %3662 = vrot.lane.b32.xlu2 %v6616_v54, %s4903_s23 }
 0x5ea   : > { %v3325_v40 = vpop.permute.xlu2 %3324  ;;  %3470 = vrot.lane.b32.xlu1 %v3975_v49, %s4902_s22  ;;  %v3992_v49 = vld [vmem:[#allocation2 + $0x122] sm:$0xff] }
 0x5eb   : > { %3392 = vst.msk [vmem:[#allocation3 + $0xe0] sm:$0xff] %vm1118_vm5, %v3325_v40 }
 0x5ec   : > { %3496 = vrot.lane.b32.xlu0 %v7962_v3, %s4902_s22  ;;  %v3305_v36 = vpop.permute.xlu1 %3304 }
 0x5ed   : > { %3382 = vst.msk [vmem:[#allocation3 + $0x90] sm:$0xff] %vm1118_vm5, %v3305_v36  ;;  %v3597_v36 = vld [vmem:[#allocation2 + $0x98] sm:$0xff] }
 0x5ee   : > { %v3309_v37 = vpop.permute.xlu0 %3308 }
 0x5ef   : > { %3384 = vst.msk [vmem:[#allocation3 + $0xa0] sm:$0xff] %vm1118_vm5, %v3309_v37  ;;  %v3789_v37 = vld [vmem:[#allocation2 + $0x99] sm:$0xff] }
 0x5f0   : > { %3688 = vrot.lane.b32.xlu2 %v6679_v59, %s4903_s23 }
 0x5f2   : > { %v3331_v54 = vpop.permute.xlu2 %3330  ;;  %3854 = vrot.lane.b32.xlu1 %v3785_v43, %s4904_s24  ;;  %v3981_v43 = vld [vmem:[#allocation2 + $0x9a] sm:$0xff] }
 0x5f3   : > { %3395 = vst.msk [vmem:[#allocation3 + $0xf8] sm:$0xff] %vm1118_vm5, %v3331_v54 }
 0x5f4   : > { %4046 = vrot.lane.b32.xlu0 %v3977_v38, %s4905_s25  ;;  %v3311_v13 = vpop.permute.xlu1 %3310 }
 0x5f5   : > { %3385 = vst.msk [vmem:[#allocation3 + $0xa8] sm:$0xff] %vm1118_vm5, %v3311_v13 }
 0x5f6   : > { %v3315_v41 = vpop.permute.xlu0 %3314 }
 0x5f7   : > { %3387 = vst.msk [vmem:[#allocation3 + $0xb8] sm:$0xff] %vm1118_vm5, %v3315_v41  ;;  %v3802_v41 = vld [vmem:[#allocation2 + $0x139] sm:$0xff] }
 0x5f8   : > { %4072 = vrot.lane.b32.xlu2 %v7965_v55, %s4905_s25  ;;  %v3610_v55 = vld [vmem:[#allocation2 + $0x138] sm:$0xff] }
 0x5fa   : > { %v3465_v59 = vpop.permute.xlu2 %3464  ;;  %3880 = vrot.lane.b32.xlu1 %v3798_v5, %s4904_s24 }
 0x5fb   : > { %3558 = vst.msk [vmem:[#allocation3 + $0x10] sm:$0xff] %vm1311_vm6, %v3465_v59 }
 0x5fc   : > { %3472 = vrot.lane.b32.xlu0 %v3976_v23, %s4902_s22  ;;  %v3317_v12 = vpop.permute.xlu1 %3316  ;;  %v3801_v23 = vld [vmem:[#allocation2 + $0x129] sm:$0xff] }
 0x5fd   : > { %3388 = vst.msk [vmem:[#allocation3 + $0xc0] sm:$0xff] %vm1118_vm5, %v3317_v12 }
 0x5fe   : > { %v3321_v9 = vpop.permute.xlu0 %3320 }
 0x5ff   : > { %3390 = vst.msk [vmem:[#allocation3 + $0xd0] sm:$0xff] %vm1118_vm5, %v3321_v9  ;;  %v3994_v9 = vld [vmem:[#allocation2 + $0x13a] sm:$0xff] }
 0x600   : > { %3498 = vrot.lane.b32.xlu2 %v3415_v56, %s4902_s22 }
 0x602   : > { %v3845_v30 = vpop.permute.xlu2 %3844  ;;  %3664 = vrot.lane.b32.xlu1 %v3594_v47, %s4903_s23 }
 0x604   : > { %3856 = vrot.lane.b32.xlu0 %v3786_v58, %s4904_s24  ;;  %v3323_v14 = vpop.permute.xlu1 %3322  ;;  %v3611_v58 = vld [vmem:[#allocation2 + $0x140] sm:$0xff] }
 0x605   : > { %3391 = vst.msk [vmem:[#allocation3 + $0xd8] sm:$0xff] %vm1118_vm5, %v3323_v14 }
 0x606   : > { %v3327_v19 = vpop.permute.xlu0 %3326 }
 0x607   : > { %3393 = vst.msk [vmem:[#allocation3 + $0xe8] sm:$0xff] %vm1118_vm5, %v3327_v19 }
 0x608   : > { %4048 = vrot.lane.b32.xlu2 %v3978_v18, %s4905_s25 }
 0x60a   : > { %v3847_v29 = vpop.permute.xlu2 %3846  ;;  %3690 = vrot.lane.b32.xlu1 %v6714_v39, %s4903_s23  ;;  %v3787_v39 = vld [vmem:[#allocation2 + $0x81] sm:$0xff] }
 0x60c   : > { %3882 = vrot.lane.b32.xlu0 %v3799_v51, %s4904_s24  ;;  %v3329_v11 = vpop.permute.xlu1 %3328  ;;  %v3982_v51 = vld [vmem:[#allocation2 + $0xaa] sm:$0xff] }
 0x60d   : > { %3394 = vst.msk [vmem:[#allocation3 + $0xf0] sm:$0xff] %vm1118_vm5, %v3329_v11  ;;  %v3995_v11 = vld [vmem:[#allocation2 + $0x142] sm:$0xff] }
 0x60e   : > { %v3461_v52 = vpop.permute.xlu0 %3460 }
 0x60f   : > { %3556 = vst.msk [vmem:[#allocation3] sm:$0xff] %vm1311_vm6, %v3461_v52 }
 0x610   : > { %3474 = vrot.lane.b32.xlu2 %v3977_v38, %s4902_s22 }
 0x612   : > { %v3849_v10 = vpop.permute.xlu2 %3848  ;;  %4074 = vrot.lane.b32.xlu1 %v3991_v31, %s4905_s25 }
 0x614   : > { %3666 = vrot.lane.b32.xlu0 %v3595_v44, %s4903_s23  ;;  %v3463_v8 = vpop.permute.xlu1 %3462 }
 0x615   : > { %3557 = vst.msk [vmem:[#allocation3 + $0x8] sm:$0xff] %vm1311_vm6, %v3463_v8 }
 0x616   : > { %v3467_v61 = vpop.permute.xlu0 %3466 }
 0x617   : > { %3559 = vst.msk [vmem:[#allocation3 + $0x18] sm:$0xff] %vm1311_vm6, %v3467_v61 }
 0x618   : > { %3858 = vrot.lane.b32.xlu2 %v3787_v39, %s4904_s24  ;;  %v3612_v39 = vld [vmem:[#allocation2 + $0x150] sm:$0xff] }
 0x61a   : > { %v3493_v35 = vpop.permute.xlu2 %3492  ;;  %3500 = vrot.lane.b32.xlu1 %v3416_v27, %s4902_s22 }
 0x61b   : > { %3572 = vst.msk [vmem:[#allocation3 + $0x80] sm:$0xff] %vm1311_vm6, %v3493_v35 }
 0x61c   : > { %3692 = vrot.lane.b32.xlu0 %v6755_v17, %s4903_s23  ;;  %v3653_v28 = vpop.permute.xlu1 %3652  ;;  %v3596_v17 = vld [vmem:[#allocation2 + $0x90] sm:$0xff] }
 0x61d   : > { %3748 = vst.msk [vmem:[#allocation3] sm:$0xff] %vm1505_vm7, %v3653_v28  ;;  %v3791_v28 = vld [vmem:[#allocation2 + $0xb1] sm:$0xff] }
 0x61e   : > { %3940 = vst.msk [vmem:[#allocation3] sm:$0xff] %vm1698_vm8, %v3845_v30  ;;  %v4037_v48 = vpop.permute.xlu0 %4036  ;;  %v3598_v30 = vld [vmem:[#allocation2 + $0xa8] sm:$0xff] }
 0x61f   : > { %4132 = vst.msk [vmem:[#allocation3] sm:$0xff] %vm1891_vm10, %v4037_v48 }
 0x620   : > { %3884 = vrot.lane.b32.xlu2 %v3800_v57, %s4904_s24  ;;  %v3983_v57 = vld [vmem:[#allocation2 + $0xb2] sm:$0xff] }
 0x622   : > { %v4043_v24 = vpop.permute.xlu2 %4042  ;;  %4050 = vrot.lane.b32.xlu1 %v3979_v2, %s4905_s25 }
 0x624   : > { %4076 = vrot.lane.b32.xlu0 %v3992_v49, %s4905_s25  ;;  %v3655_v33 = vpop.permute.xlu1 %3654 }
 0x625   : > { %3749 = vst.msk [vmem:[#allocation3 + $0x8] sm:$0xff] %vm1505_vm7, %v3655_v33 }
 0x626   : > { %3941 = vst.msk [vmem:[#allocation3 + $0x8] sm:$0xff] %vm1698_vm8, %v3847_v29  ;;  %v4039_v42 = vpop.permute.xlu0 %4038  ;;  %v4164_v60 = vld [vmem:[#allocation3] sm:$0xff] }
 0x627   : > { %4133 = vst.msk [vmem:[#allocation3 + $0x8] sm:$0xff] %vm1891_vm10, %v4039_v42  ;;  %4824 = vmatmul.msk.f32.vlgmr.msra.gmra.mxu1 %vm1961_vm11, %v4164_v60 }
 0x628   : > { %3668 = vrot.lane.b32.xlu2 %v3596_v17, %s4903_s23  ;;  %v3804_v17 = vld [vmem:[#allocation2 + $0x151] sm:$0xff] }
 0x62a   : > { %v3469_v34 = vpop.permute.xlu2 %3468  ;;  %3476 = vrot.lane.b32.xlu1 %v3978_v18, %s4902_s22 }
 0x62b   : > { %3560 = vst.msk [vmem:[#allocation3 + $0x20] sm:$0xff] %vm1311_vm6, %v3469_v34 }
 0x62c   : > { %3502 = vrot.lane.b32.xlu0 %v3991_v31, %s4902_s22  ;;  %v3657_v25 = vpop.permute.xlu1 %3656 }
 0x62d   : > { %3750 = vst.msk [vmem:[#allocation3 + $0x10] sm:$0xff] %vm1505_vm7, %v3657_v25 }
 0x62e   : > { %3942 = vst.msk [vmem:[#allocation3 + $0x10] sm:$0xff] %vm1698_vm8, %v3849_v10  ;;  %v4041_v3 = vpop.permute.xlu0 %4040  ;;  %v4165_v7 = vld [vmem:[#allocation3 + $0x8] sm:$0xff]  ;;  %v3599_v10 = vld [vmem:[#allocation2 + $0xb0] sm:$0xff] }
 0x62f   : > { %4134 = vst.msk [vmem:[#allocation3 + $0x10] sm:$0xff] %vm1891_vm10, %v4041_v3  ;;  %4825 = vmatmul.msk.f32.gmra.mxu1 %vm1961_vm11, %v4165_v7  ;;  %v3792_v3 = vld [vmem:[#allocation2 + $0xc1] sm:$0xff] }
 0x630   : > { %3694 = vrot.lane.b32.xlu2 %v3609_v26, %s4903_s23  ;;  %v3600_v26 = vld [vmem:[#allocation2 + $0xc0] sm:$0xff] }
 0x632   : > { %v3853_v45 = vpop.permute.xlu2 %3852  ;;  %3860 = vrot.lane.b32.xlu1 %v3788_v20, %s4904_s24 }
 0x634   : > { %4052 = vrot.lane.b32.xlu0 %v3980_v16, %s4905_s25  ;;  %v3659_v50 = vpop.permute.xlu1 %3658 }
 0x635   : > { %3751 = vst.msk [vmem:[#allocation3 + $0x18] sm:$0xff] %vm1505_vm7, %v3659_v50  ;;  %v3613_v50 = vld [vmem:[#allocation2 + $0x158] sm:$0xff] }
 0x636   : > { %v3851_v22 = vpop.permute.xlu0 %3850  ;;  %v4166_v0 = vld [vmem:[#allocation3 + $0x10] sm:$0xff] }
 0x637   : > { %3943 = vst.msk [vmem:[#allocation3 + $0x18] sm:$0xff] %vm1698_vm8, %v3851_v22  ;;  %4826 = vmatmul.msk.f32.gmra.mxu1 %vm1961_vm11, %v4166_v0 }
 0x638   : > { %4078 = vrot.lane.b32.xlu2 %v3993_v53, %s4905_s25  ;;  %4135 = vst.msk [vmem:[#allocation3 + $0x18] sm:$0xff] %vm1891_vm10, %v4043_v24  ;;  %v3996_v24 = vld [vmem:[#allocation2 + $0x152] sm:$0xff] }
 0x63a   : > { %v3879_v1 = vpop.permute.xlu2 %3878  ;;  %3886 = vrot.lane.b32.xlu1 %v3801_v23, %s4904_s24 }
 0x63c   : > { %3478 = vrot.lane.b32.xlu0 %v3979_v2, %s4902_s22  ;;  %v3685_v46 = vpop.permute.xlu1 %3684 }
 0x63d   : > { %3764 = vst.msk [vmem:[#allocation3 + $0x80] sm:$0xff] %vm1505_vm7, %v3685_v46  ;;  %v3997_v46 = vld [vmem:[#allocation2 + $0x15a] sm:$0xff] }
 0x63e   : > { %v3877_v62 = vpop.permute.xlu0 %3876 }
 0x63f   : > { %3956 = vst.msk [vmem:[#allocation3 + $0x80] sm:$0xff] %vm1698_vm8, %v3877_v62  ;;  %v4167_v15 = vld [vmem:[#allocation3 + $0x18] sm:$0xff] }
 0x640   : > { %3504 = vrot.lane.b32.xlu2 %v3992_v49, %s4902_s22  ;;  %4827 = vmatmul.msk.f32.gmra.mxu1 %vm1961_vm11, %v4167_v15  ;;  %v3601_v62 = vld [vmem:[#allocation2 + $0xc8] sm:$0xff] }
 0x642   : > { %v3663_v40 = vpop.permute.xlu2 %3662  ;;  %3670 = vrot.lane.b32.xlu1 %v3597_v36, %s4903_s23 }
 0x644   : > { %3862 = vrot.lane.b32.xlu0 %v3789_v37, %s4904_s24  ;;  %v4069_v54 = vpop.permute.xlu1 %4068 }
 0x645   : > { %4148 = vst.msk [vmem:[#allocation3 + $0x80] sm:$0xff] %vm1891_vm10, %v4069_v54  ;;  %v3614_v54 = vld [vmem:[#allocation2 + $0x168] sm:$0xff] }
 0x646   : > { %v3661_v38 = vpop.permute.xlu0 %3660 }
 0x647   : > { %3752 = vst.msk [vmem:[#allocation3 + $0x20] sm:$0xff] %vm1505_vm7, %v3661_v38 }
 0x648   : > { %4054 = vrot.lane.b32.xlu2 %v3981_v43, %s4905_s25  ;;  %3944 = vst.msk [vmem:[#allocation3 + $0x20] sm:$0xff] %vm1698_vm8, %v3853_v45  ;;  %v3984_v45 = vld [vmem:[#allocation2 + $0xc2] sm:$0xff] }
 0x64a   : > { %v3689_v13 = vpop.permute.xlu2 %3688  ;;  %3696 = vrot.lane.b32.xlu1 %v3610_v55, %s4903_s23 }
 0x64c   : > { %3888 = vrot.lane.b32.xlu0 %v3802_v41, %s4904_s24  ;;  %v3495_v59 = vpop.permute.xlu1 %3494  ;;  %v4180_v5 = vld [vmem:[#allocation3 + $0x80] sm:$0xff] }
 0x64d   : > { %3573 = vst.msk [vmem:[#allocation3 + $0x88] sm:$0xff] %vm1311_vm6, %v3495_v59  ;;  %4840 = vmatmul.msk.f32.vlgmr.msra.gmra.mxu3 %vm1961_vm11, %v4180_v5  ;;  %v3985_v5 = vld [vmem:[#allocation2 + $0xca] sm:$0xff] }
 0x64e   : > { %v3687_v12 = vpop.permute.xlu0 %3686 }
 0x64f   : > { %3765 = vst.msk [vmem:[#allocation3 + $0x88] sm:$0xff] %vm1505_vm7, %v3687_v12  ;;  %v3998_v12 = vld [vmem:[#allocation2 + $0x16a] sm:$0xff] }
 0x650   : > { %3480 = vrot.lane.b32.xlu2 %v3980_v16, %s4902_s22  ;;  %3957 = vst.msk [vmem:[#allocation3 + $0x88] sm:$0xff] %vm1698_vm8, %v3879_v1 }
 0x652   : > { %v4073_v56 = vpop.permute.xlu2 %4072  ;;  %4080 = vrot.lane.b32.xlu1 %v3994_v9, %s4905_s25 }
 0x654   : > { %3672 = vrot.lane.b32.xlu0 %v3598_v30, %s4903_s23  ;;  %v4045_v6 = vpop.permute.xlu1 %4044 }
 0x655   : > { %4136 = vst.msk [vmem:[#allocation3 + $0x20] sm:$0xff] %vm1891_vm10, %v4045_v6 }
 0x656   : > { %v4071_v47 = vpop.permute.xlu0 %4070 }
 0x657   : > { %4149 = vst.msk [vmem:[#allocation3 + $0x88] sm:$0xff] %vm1891_vm10, %v4071_v47  ;;  %v3615_v47 = vld [vmem:[#allocation2 + $0x170] sm:$0xff] }
 0x658   : > { %3864 = vrot.lane.b32.xlu2 %v3790_v4, %s4904_s24 }
 0x65a   : > { %v3499_v63 = vpop.permute.xlu2 %3498  ;;  %3506 = vrot.lane.b32.xlu1 %v3993_v53, %s4902_s22  ;;  %v3805_v53 = vld [vmem:[#allocation2 + $0x159] sm:$0xff] }
 0x65b   : > { %3575 = vst.msk [vmem:[#allocation3 + $0x98] sm:$0xff] %vm1311_vm6, %v3499_v63 }
 0x65c   : > { %3698 = vrot.lane.b32.xlu0 %v3611_v58, %s4903_s23  ;;  %v3471_v14 = vpop.permute.xlu1 %3470  ;;  %v4168_v18 = vld [vmem:[#allocation3 + $0x20] sm:$0xff] }
 0x65d   : > { %3561 = vst.msk [vmem:[#allocation3 + $0x28] sm:$0xff] %vm1311_vm6, %v3471_v14  ;;  %4828 = vmatmul.msk.f32.gmra.mxu1 %vm1961_vm11, %v4168_v18  ;;  %v3794_v18 = vld [vmem:[#allocation2 + $0xd9] sm:$0xff] }
 0x65e   : > { %3753 = vst.msk [vmem:[#allocation3 + $0x28] sm:$0xff] %vm1505_vm7, %v3663_v40  ;;  %v3497_v19 = vpop.permute.xlu0 %3496  ;;  %v4181_v29 = vld [vmem:[#allocation3 + $0x88] sm:$0xff]  ;;  %v3793_v40 = vld [vmem:[#allocation2 + $0xc9] sm:$0xff] }
 0x65f   : > { %3574 = vst.msk [vmem:[#allocation3 + $0x90] sm:$0xff] %vm1311_vm6, %v3497_v19  ;;  %4841 = vmatmul.msk.f32.gmra.mxu3 %vm1961_vm11, %v4181_v29  ;;  %v3999_v29 = vld [vmem:[#allocation2 + $0x172] sm:$0xff] }
 0x660   : > { %3890 = vrot.lane.b32.xlu2 %v3803_v21, %s4904_s24  ;;  %3766 = vst.msk [vmem:[#allocation3 + $0x90] sm:$0xff] %vm1505_vm7, %v3689_v13  ;;  %v3806_v13 = vld [vmem:[#allocation2 + $0x169] sm:$0xff]  ;;  %v3986_v21 = vld [vmem:[#allocation2 + $0xda] sm:$0xff] }
 0x662   : > { %v4049_v32 = vpop.permute.xlu2 %4048  ;;  %4056 = vrot.lane.b32.xlu1 %v3982_v51, %s4905_s25 }
 0x664   : > { %4082 = vrot.lane.b32.xlu0 %v3995_v11, %s4905_s25  ;;  %v3855_v52 = vpop.permute.xlu1 %3854 }
 0x665   : > { %3945 = vst.msk [vmem:[#allocation3 + $0x28] sm:$0xff] %vm1698_vm8, %v3855_v52  ;;  %v3807_v52 = vld [vmem:[#allocation2 + $0x171] sm:$0xff] }
 0x666   : > { %v4047_v31 = vpop.permute.xlu0 %4046 }
 0x667   : > { %4137 = vst.msk [vmem:[#allocation3 + $0x28] sm:$0xff] %vm1891_vm10, %v4047_v31 }
 0x668   : > { %3674 = vrot.lane.b32.xlu2 %v3599_v10, %s4903_s23 }
 0x66a   : > { %v3475_v44 = vpop.permute.xlu2 %3474  ;;  %3482 = vrot.lane.b32.xlu1 %v3981_v43, %s4902_s22 }
 0x66b   : > { %3563 = vst.msk [vmem:[#allocation3 + $0x38] sm:$0xff] %vm1311_vm6, %v3475_v44 }
 0x66c   : > { %3508 = vrot.lane.b32.xlu0 %v3994_v9, %s4902_s22  ;;  %v3881_v8 = vpop.permute.xlu1 %3880  ;;  %v3602_v9 = vld [vmem:[#allocation2 + $0xd8] sm:$0xff] }
 0x66d   : > { %3958 = vst.msk [vmem:[#allocation3 + $0x90] sm:$0xff] %vm1698_vm8, %v3881_v8 }
 0x66e   : > { %4150 = vst.msk [vmem:[#allocation3 + $0x90] sm:$0xff] %vm1891_vm10, %v4073_v56  ;;  %v3473_v61 = vpop.permute.xlu0 %3472  ;;  %v4169_v35 = vld [vmem:[#allocation3 + $0x28] sm:$0xff] }
 0x66f   : > { %3562 = vst.msk [vmem:[#allocation3 + $0x30] sm:$0xff] %vm1311_vm6, %v3473_v61  ;;  %4829 = vmatmul.msk.f32.gmra.mxu1 %vm1961_vm11, %v4169_v35  ;;  %v3795_v61 = vld [vmem:[#allocation2 + $0xe1] sm:$0xff] }
 0x670   : > { %3700 = vrot.lane.b32.xlu2 %v3612_v39, %s4903_s23  ;;  %v3603_v39 = vld [vmem:[#allocation2 + $0xe0] sm:$0xff] }
 0x672   : > { %v3859_v27 = vpop.permute.xlu2 %3858  ;;  %3866 = vrot.lane.b32.xlu1 %v3791_v28, %s4904_s24 }
 0x674   : > { %4058 = vrot.lane.b32.xlu0 %v3983_v57, %s4905_s25  ;;  %v3665_v48 = vpop.permute.xlu1 %3664 }
 0x675   : > { %3754 = vst.msk [vmem:[#allocation3 + $0x30] sm:$0xff] %vm1505_vm7, %v3665_v48  ;;  %v4182_v2 = vld [vmem:[#allocation3 + $0x90] sm:$0xff] }
 0x676   : > { %v3857_v49 = vpop.permute.xlu0 %3856  ;;  %4842 = vmatmul.msk.f32.gmra.mxu3 %vm1961_vm11, %v4182_v2  ;;  %v3616_v48 = vld [vmem:[#allocation2 + $0x180] sm:$0xff] }
 0x677   : > { %3946 = vst.msk [vmem:[#allocation3 + $0x30] sm:$0xff] %vm1698_vm8, %v3857_v49 }
 0x678   : > { %4084 = vrot.lane.b32.xlu2 %v3996_v24, %s4905_s25  ;;  %4138 = vst.msk [vmem:[#allocation3 + $0x30] sm:$0xff] %vm1891_vm10, %v4049_v32 }
 0x67a   : > { %v3885_v33 = vpop.permute.xlu2 %3884  ;;  %3892 = vrot.lane.b32.xlu1 %v3804_v17, %s4904_s24 }
 0x67c   : > { %3484 = vrot.lane.b32.xlu0 %v3982_v51, %s4902_s22  ;;  %v3691_v42 = vpop.permute.xlu1 %3690 }
 0x67d   : > { %3767 = vst.msk [vmem:[#allocation3 + $0x98] sm:$0xff] %vm1505_vm7, %v3691_v42  ;;  %v4000_v42 = vld [vmem:[#allocation2 + $0x182] sm:$0xff] }
 0x67e   : > { %v3883_v60 = vpop.permute.xlu0 %3882 }
 0x67f   : > { %3959 = vst.msk [vmem:[#allocation3 + $0x98] sm:$0xff] %vm1698_vm8, %v3883_v60  ;;  %v4170_v34 = vld [vmem:[#allocation3 + $0x30] sm:$0xff]  ;;  %v3617_v60 = vld [vmem:[#allocation2 + $0x188] sm:$0xff] }
 0x680   : > { %3510 = vrot.lane.b32.xlu2 %v3995_v11, %s4902_s22  ;;  %4830 = vmatmul.msk.f32.gmra.mxu1 %vm1961_vm11, %v4170_v34 }
 0x682   : > { %v3669_v25 = vpop.permute.xlu2 %3668  ;;  %3676 = vrot.lane.b32.xlu1 %v3600_v26, %s4903_s23 }
 0x684   : > { %3868 = vrot.lane.b32.xlu0 %v3792_v3, %s4904_s24  ;;  %v4075_v7 = vpop.permute.xlu1 %4074 }
 0x685   : > { %4151 = vst.msk [vmem:[#allocation3 + $0x98] sm:$0xff] %vm1891_vm10, %v4075_v7  ;;  %v3809_v7 = vld [vmem:[#allocation2 + $0x189] sm:$0xff] }
 0x686   : > { %v3667_v20 = vpop.permute.xlu0 %3666 }
 0x687   : > { %3755 = vst.msk [vmem:[#allocation3 + $0x38] sm:$0xff] %vm1505_vm7, %v3667_v20 }
 0x688   : > { %4060 = vrot.lane.b32.xlu2 %v3984_v45, %s4905_s25  ;;  %3947 = vst.msk [vmem:[#allocation3 + $0x38] sm:$0xff] %vm1698_vm8, %v3859_v27  ;;  %v3987_v27 = vld [vmem:[#allocation2 + $0xe2] sm:$0xff] }
 0x68a   : > { %v3695_v16 = vpop.permute.xlu2 %3694  ;;  %3702 = vrot.lane.b32.xlu1 %v3613_v50, %s4903_s23 }
 0x68c   : > { %3894 = vrot.lane.b32.xlu0 %v3805_v53, %s4904_s24  ;;  %v3501_v22 = vpop.permute.xlu1 %3500  ;;  %v4183_v0 = vld [vmem:[#allocation3 + $0x98] sm:$0xff] }
 0x68d   : > { %3576 = vst.msk [vmem:[#allocation3 + $0xa0] sm:$0xff] %vm1311_vm6, %v3501_v22  ;;  %4843 = vmatmul.msk.f32.gmra.mxu3 %vm1961_vm11, %v4183_v0  ;;  %v3618_v0 = vld [vmem:[#allocation2 + $0x198] sm:$0xff] }
 0x68e   : > { %v3693_v1 = vpop.permute.xlu0 %3692 }
 0x68f   : > { %3768 = vst.msk [vmem:[#allocation3 + $0xa0] sm:$0xff] %vm1505_vm7, %v3693_v1  ;;  %v4002_v1 = vld [vmem:[#allocation2 + $0x19a] sm:$0xff] }
 0x690   : > { %3486 = vrot.lane.b32.xlu2 %v3983_v57, %s4902_s22  ;;  %3960 = vst.msk [vmem:[#allocation3 + $0xa0] sm:$0xff] %vm1698_vm8, %v3885_v33 }
 0x692   : > { %v4079_v23 = vpop.permute.xlu2 %4078  ;;  %4086 = vrot.lane.b32.xlu1 %v3997_v46, %s4905_s25 }
 0x694   : > { %3678 = vrot.lane.b32.xlu0 %v3601_v62, %s4903_s23  ;;  %v4051_v15 = vpop.permute.xlu1 %4050 }
 0x695   : > { %4139 = vst.msk [vmem:[#allocation3 + $0x38] sm:$0xff] %vm1891_vm10, %v4051_v15 }
 0x696   : > { %v4077_v36 = vpop.permute.xlu0 %4076 }
 0x697   : > { %4152 = vst.msk [vmem:[#allocation3 + $0xa0] sm:$0xff] %vm1891_vm10, %v4077_v36 }
 0x698   : > { %3870 = vrot.lane.b32.xlu2 %v3793_v40, %s4904_s24  ;;  %v3811_v40 = vld [vmem:[#allocation2 + $0x1a1] sm:$0xff] }
 0x69a   : > { %v3505_v37 = vpop.permute.xlu2 %3504  ;;  %3512 = vrot.lane.b32.xlu1 %v3996_v24, %s4902_s22  ;;  %v3808_v24 = vld [vmem:[#allocation2 + $0x181] sm:$0xff] }
 0x69b   : > { %3578 = vst.msk [vmem:[#allocation3 + $0xb0] sm:$0xff] %vm1311_vm6, %v3505_v37 }
 0x69c   : > { %3704 = vrot.lane.b32.xlu0 %v3614_v54, %s4903_s23  ;;  %v3477_v43 = vpop.permute.xlu1 %3476  ;;  %v4171_v38 = vld [vmem:[#allocation3 + $0x38] sm:$0xff] }
 0x69d   : > { %3564 = vst.msk [vmem:[#allocation3 + $0x40] sm:$0xff] %vm1311_vm6, %v3477_v43  ;;  %4831 = vmatmul.msk.f32.gmra.mxu1 %vm1961_vm11, %v4171_v38  ;;  %v4003_v38 = vld [vmem:[#allocation2 + $0x1a2] sm:$0xff] }
 0x69e   : > { %3756 = vst.msk [vmem:[#allocation3 + $0x40] sm:$0xff] %vm1505_vm7, %v3669_v25  ;;  %v3503_v55 = vpop.permute.xlu0 %3502  ;;  %v4184_v41 = vld [vmem:[#allocation3 + $0xa0] sm:$0xff] }
 0x69f   : > { %3577 = vst.msk [vmem:[#allocation3 + $0xa8] sm:$0xff] %vm1311_vm6, %v3503_v55  ;;  %4844 = vmatmul.msk.f32.gmra.mxu3 %vm1961_vm11, %v4184_v41  ;;  %v4001_v25 = vld [vmem:[#allocation2 + $0x18a] sm:$0xff] }
 0x6a0   : > { %3896 = vrot.lane.b32.xlu2 %v3806_v13, %s4904_s24  ;;  %3769 = vst.msk [vmem:[#allocation3 + $0xa8] sm:$0xff] %vm1505_vm7, %v3695_v16  ;;  %v3810_v16 = vld [vmem:[#allocation2 + $0x199] sm:$0xff] }
 0x6a2   : > { %v4055_v59 = vpop.permute.xlu2 %4054  ;;  %4062 = vrot.lane.b32.xlu1 %v3985_v5, %s4905_s25 }
 0x6a4   : > { %4088 = vrot.lane.b32.xlu0 %v3998_v12, %s4905_s25  ;;  %v3861_v56 = vpop.permute.xlu1 %3860 }
 0x6a5   : > { %3948 = vst.msk [vmem:[#allocation3 + $0x40] sm:$0xff] %vm1698_vm8, %v3861_v56 }
 0x6a6   : > { %v4053_v30 = vpop.permute.xlu0 %4052 }
 0x6a7   : > { %4140 = vst.msk [vmem:[#allocation3 + $0x40] sm:$0xff] %vm1891_vm10, %v4053_v30 }
 0x6a8   : > { %3680 = vrot.lane.b32.xlu2 %v3602_v9, %s4903_s23 }
 0x6aa   : > { %v3481_v6 = vpop.permute.xlu2 %3480  ;;  %3488 = vrot.lane.b32.xlu1 %v3984_v45, %s4902_s22 }
 0x6ab   : > { %3566 = vst.msk [vmem:[#allocation3 + $0x50] sm:$0xff] %vm1311_vm6, %v3481_v6 }
 0x6ac   : > { %3514 = vrot.lane.b32.xlu0 %v3997_v46, %s4902_s22  ;;  %v3887_v4 = vpop.permute.xlu1 %3886  ;;  %v3619_v46 = vld [vmem:[#allocation2 + $0x1a0] sm:$0xff] }
 0x6ad   : > { %3961 = vst.msk [vmem:[#allocation3 + $0xa8] sm:$0xff] %vm1698_vm8, %v3887_v4 }
 0x6ae   : > { %4153 = vst.msk [vmem:[#allocation3 + $0xa8] sm:$0xff] %vm1891_vm10, %v4079_v23  ;;  %v3479_v63 = vpop.permute.xlu0 %3478  ;;  %v4172_v58 = vld [vmem:[#allocation3 + $0x40] sm:$0xff] }
 0x6af   : > { %3565 = vst.msk [vmem:[#allocation3 + $0x48] sm:$0xff] %vm1311_vm6, %v3479_v63  ;;  %4832 = vmatmul.msk.f32.gmra.mxu1 %vm1961_vm11, %v4172_v58 }
 0x6b0   : > { %3706 = vrot.lane.b32.xlu2 %v3615_v47, %s4903_s23 }
 0x6b2   : > { %v3865_v14 = vpop.permute.xlu2 %3864  ;;  %3872 = vrot.lane.b32.xlu1 %v3794_v18, %s4904_s24 }
 0x6b4   : > { %4064 = vrot.lane.b32.xlu0 %v3986_v21, %s4905_s25  ;;  %v3671_v19 = vpop.permute.xlu1 %3670 }
 0x6b5   : > { %3757 = vst.msk [vmem:[#allocation3 + $0x48] sm:$0xff] %vm1505_vm7, %v3671_v19  ;;  %v4185_v32 = vld [vmem:[#allocation3 + $0xa8] sm:$0xff] }
 0x6b6   : > { %v3863_v51 = vpop.permute.xlu0 %3862  ;;  %4845 = vmatmul.msk.f32.gmra.mxu3 %vm1961_vm11, %v4185_v32 }
 0x6b7   : > { %3949 = vst.msk [vmem:[#allocation3 + $0x48] sm:$0xff] %vm1698_vm8, %v3863_v51 }
 0x6b8   : > { %4090 = vrot.lane.b32.xlu2 %v3999_v29, %s4905_s25  ;;  %4141 = vst.msk [vmem:[#allocation3 + $0x48] sm:$0xff] %vm1891_vm10, %v4055_v59 }
 0x6ba   : > { %v3891_v11 = vpop.permute.xlu2 %3890  ;;  %3898 = vrot.lane.b32.xlu1 %v3807_v52, %s4904_s24 }
 0x6bc   : > { %3490 = vrot.lane.b32.xlu0 %v3985_v5, %s4902_s22  ;;  %v3697_v10 = vpop.permute.xlu1 %3696 }
 0x6bd   : > { %3770 = vst.msk [vmem:[#allocation3 + $0xb0] sm:$0xff] %vm1505_vm7, %v3697_v10 }
 0x6be   : > { %v3889_v31 = vpop.permute.xlu0 %3888 }
 0x6bf   : > { %3962 = vst.msk [vmem:[#allocation3 + $0xb0] sm:$0xff] %vm1698_vm8, %v3889_v31  ;;  %v4173_v44 = vld [vmem:[#allocation3 + $0x48] sm:$0xff] }
 0x6c0   : > { %3516 = vrot.lane.b32.xlu2 %v3998_v12, %s4902_s22  ;;  %4833 = vmatmul.msk.f32.gmra.mxu1 %vm1961_vm11, %v4173_v44 }
 0x6c2   : > { %v3675_v8 = vpop.permute.xlu2 %3674  ;;  %3682 = vrot.lane.b32.xlu1 %v3603_v39, %s4903_s23 }
 0x6c4   : > { %3874 = vrot.lane.b32.xlu0 %v3795_v61, %s4904_s24  ;;  %v4081_v35 = vpop.permute.xlu1 %4080 }
 0x6c5   : > { %4154 = vst.msk [vmem:[#allocation3 + $0xb0] sm:$0xff] %vm1891_vm10, %v4081_v35 }
 0x6c6   : > { %v3673_v28 = vpop.permute.xlu0 %3672 }
 0x6c7   : > { %3758 = vst.msk [vmem:[#allocation3 + $0x50] sm:$0xff] %vm1505_vm7, %v3673_v28 }
 0x6c8   : > { %4066 = vrot.lane.b32.xlu2 %v3987_v27, %s4905_s25  ;;  %3950 = vst.msk [vmem:[#allocation3 + $0x50] sm:$0xff] %vm1698_vm8, %v3865_v14 }
 0x6ca   : > { %v3701_v57 = vpop.permute.xlu2 %3700  ;;  %3708 = vrot.lane.b32.xlu1 %v3616_v48, %s4903_s23 }
 0x6cc   : > { %3900 = vrot.lane.b32.xlu0 %v3808_v24, %s4904_s24  ;;  %v3507_v2 = vpop.permute.xlu1 %3506  ;;  %v4186_v49 = vld [vmem:[#allocation3 + $0xb0] sm:$0xff]  ;;  %v7388_v24 = vpop.f32.mrf.mxu1 }
 0x6cd   : > { %3579 = vst.msk [vmem:[#allocation3 + $0xb8] sm:$0xff] %vm1311_vm6, %v3507_v2  ;;  %4846 = vmatmul.msk.f32.gmra.mxu3 %vm1961_vm11, %v4186_v49 }
 0x6ce   : > { %v3699_v33 = vpop.permute.xlu0 %3698 }
 0x6cf   : > { %3771 = vst.msk [vmem:[#allocation3 + $0xb8] sm:$0xff] %vm1505_vm7, %v3699_v33 }
 0x6d0   : > { %3518 = vrot.lane.b32.xlu2 %v3999_v29, %s4902_s22  ;;  %3963 = vst.msk [vmem:[#allocation3 + $0xb8] sm:$0xff] %vm1698_vm8, %v3891_v11 }
 0x6d2   : > { %v4085_v17 = vpop.permute.xlu2 %4084  ;;  %4092 = vrot.lane.b32.xlu1 %v4000_v42, %s4905_s25 }
 0x6d4   : > { %3710 = vrot.lane.b32.xlu0 %v3617_v60, %s4903_s23  ;;  %v4057_v34 = vpop.permute.xlu1 %4056 }
 0x6d5   : > { %4142 = vst.msk [vmem:[#allocation3 + $0x50] sm:$0xff] %vm1891_vm10, %v4057_v34 }
 0x6d6   : > { %v4083_v26 = vpop.permute.xlu0 %4082 }
 0x6d7   : > { %4155 = vst.msk [vmem:[#allocation3 + $0xb8] sm:$0xff] %vm1891_vm10, %v4083_v26 }
 0x6d8   : > { %4094 = vrot.lane.b32.xlu2 %v4001_v25, %s4905_s25 }
 0x6da   : > { %v3511_v3 = vpop.permute.xlu2 %3510  ;;  %3902 = vrot.lane.b32.xlu1 %v3809_v7, %s4904_s24 }
 0x6db   : > { %3581 = vst.msk [vmem:[#allocation3 + $0xc8] sm:$0xff] %vm1311_vm6, %v3511_v3 }
 0x6dc   : > { %3520 = vrot.lane.b32.xlu0 %v4000_v42, %s4902_s22  ;;  %v3483_v45 = vpop.permute.xlu1 %3482  ;;  %v4174_v20 = vld [vmem:[#allocation3 + $0x50] sm:$0xff] }
 0x6dd   : > { %3567 = vst.msk [vmem:[#allocation3 + $0x58] sm:$0xff] %vm1311_vm6, %v3483_v45  ;;  %4834 = vmatmul.msk.f32.gmra.mxu1 %vm1961_vm11, %v4174_v20 }
 0x6de   : > { %3759 = vst.msk [vmem:[#allocation3 + $0x58] sm:$0xff] %vm1505_vm7, %v3675_v8  ;;  %v3509_v50 = vpop.permute.xlu0 %3508  ;;  %v4187_v53 = vld [vmem:[#allocation3 + $0xb8] sm:$0xff] }
 0x6df   : > { %3580 = vst.msk [vmem:[#allocation3 + $0xc0] sm:$0xff] %vm1311_vm6, %v3509_v50  ;;  %4847 = vmatmul.msk.f32.gmra.mxu3 %vm1961_vm11, %v4187_v53 }
 0x6e0   : > { %3904 = vrot.lane.b32.xlu2 %v3810_v16, %s4904_s24  ;;  %3772 = vst.msk [vmem:[#allocation3 + $0xc0] sm:$0xff] %vm1505_vm7, %v3701_v57 }
 0x6e2   : > { %v4061_v22 = vpop.permute.xlu2 %4060  ;;  %3712 = vrot.lane.b32.xlu1 %v3618_v0, %s4903_s23 }
 0x6e4   : > { %4096 = vrot.lane.b32.xlu0 %v4002_v1, %s4905_s25  ;;  %v3867_v23 = vpop.permute.xlu1 %3866 }
 0x6e5   : > { %3951 = vst.msk [vmem:[#allocation3 + $0x58] sm:$0xff] %vm1698_vm8, %v3867_v23 }
 0x6e6   : > { %v4059_v62 = vpop.permute.xlu0 %4058 }
 0x6e7   : > { %4143 = vst.msk [vmem:[#allocation3 + $0x58] sm:$0xff] %vm1891_vm10, %v4059_v62 }
 0x6e8   : > { %3714 = vrot.lane.b32.xlu2 %v3619_v46, %s4903_s23 }
 0x6ea   : > { %v3487_v15 = vpop.permute.xlu2 %3486  ;;  %3522 = vrot.lane.b32.xlu1 %v4001_v25, %s4902_s22 }
 0x6eb   : > { %3569 = vst.msk [vmem:[#allocation3 + $0x68] sm:$0xff] %vm1311_vm6, %v3487_v15  ;;  %v7418_v15 = vpop.f32.mrf.mxu3 }
 0x6ec   : > { %3906 = vrot.lane.b32.xlu0 %v3811_v40, %s4904_s24  ;;  %v3893_v36 = vpop.permute.xlu1 %3892  ;;  %s7660_s24 = scalar_lea.vmem %s7841_s3, %s4858_s14 }
 0x6ed   : > { %3964 = vst.msk [vmem:[#allocation3 + $0xc0] sm:$0xff] %vm1698_vm8, %v3893_v36 }
 0x6ee   : > { %4156 = vst.msk [vmem:[#allocation3 + $0xc0] sm:$0xff] %vm1891_vm10, %v4085_v17  ;;  %v3485_v37 = vpop.permute.xlu0 %3484  ;;  %v4175_v54 = vld [vmem:[#allocation3 + $0x58] sm:$0xff]  ;;  %v7394_v17 = vpop.f32.mrf.mxu1 }
 0x6ef   : > { %3568 = vst.msk [vmem:[#allocation3 + $0x60] sm:$0xff] %vm1311_vm6, %v3485_v37  ;;  %4835 = vmatmul.msk.f32.gmra.mxu1 %vm1961_vm11, %v4175_v54 }
 0x6f2   : > { %v3871_v43 = vpop.permute.xlu2 %3870  ;;  %4098 = vrot.lane.b32.xlu1 %v4003_v38, %s4905_s25 }
 0x6f3   : > { %v7422_v36 = vpop.f32.mrf.mxu3 }
 0x6f4   : > { %v3677_v13 = vpop.permute.xlu1 %3676 }
 0x6f5   : > { %3760 = vst.msk [vmem:[#allocation3 + $0x60] sm:$0xff] %vm1505_vm7, %v3677_v13  ;;  %v4188_v55 = vld [vmem:[#allocation3 + $0xc0] sm:$0xff] }
 0x6f6   : > { %v3869_v41 = vpop.permute.xlu0 %3868  ;;  %4848 = vmatmul.msk.f32.gmra.mxu3 %vm1961_vm11, %v4188_v55  ;;  %v7400_v26 = vpop.f32.mrf.mxu1 }
 0x6f7   : > { %3952 = vst.msk [vmem:[#allocation3 + $0x60] sm:$0xff] %vm1698_vm8, %v3869_v41 }
 0x6f8   : > { %4144 = vst.msk [vmem:[#allocation3 + $0x60] sm:$0xff] %vm1891_vm10, %v4061_v22 }
 0x6fa   : > { %v3897_v59 = vpop.permute.xlu2 %3896 }
 0x6fb   : > { %v7426_v54 = vpop.f32.mrf.mxu3 }
 0x6fc   : > { %v3703_v5 = vpop.permute.xlu1 %3702 }
 0x6fd   : > { %3773 = vst.msk [vmem:[#allocation3 + $0xc8] sm:$0xff] %vm1505_vm7, %v3703_v5 }
 0x6fe   : > { %v3895_v12 = vpop.permute.xlu0 %3894  ;;  %v7406_v50 = vpop.f32.mrf.mxu1 }
 0x6ff   : > { %3965 = vst.msk [vmem:[#allocation3 + $0xc8] sm:$0xff] %vm1698_vm8, %v3895_v12  ;;  %v4176_v56 = vld [vmem:[#allocation3 + $0x60] sm:$0xff]  ;;  %v4483_v12 = vmul.f32 %v7394_v17, %v7394_v17 }
 0x700   : > { %4836 = vmatmul.msk.f32.gmra.mxu1 %vm1961_vm11, %v4176_v56  ;;  %v4482_v56 = vmul.f32 %v7388_v24, %v7388_v24 }
 0x702   : > { %v3681_v9 = vpop.permute.xlu2 %3680 }
 0x704   : > { %v4087_v30 = vpop.permute.xlu1 %4086 }
 0x705   : > { %4157 = vst.msk [vmem:[#allocation3 + $0xc8] sm:$0xff] %vm1891_vm10, %v4087_v30  ;;  %v4484_v30 = vmul.f32 %v7400_v26, %v7400_v26 }
 0x706   : > { %v3679_v6 = vpop.permute.xlu0 %3678  ;;  %v7412_v23 = vpop.f32.mrf.mxu1 }
 0x707   : > { %3761 = vst.msk [vmem:[#allocation3 + $0x68] sm:$0xff] %vm1505_vm7, %v3679_v6  ;;  %v4413_v6 = vsel %vm204_vm0, %v7388_v24, 0.0 }
 0x708   : > { %3953 = vst.msk [vmem:[#allocation3 + $0x68] sm:$0xff] %vm1698_vm8, %v3871_v43 }
 0x70a   : > { %v3707_v4 = vpop.permute.xlu2 %3706 }
 0x70c   : > { %v3513_v47 = vpop.permute.xlu1 %3512  ;;  %v4189_v63 = vld [vmem:[#allocation3 + $0xc8] sm:$0xff] }
 0x70d   : > { %3582 = vst.msk [vmem:[#allocation3 + $0xd0] sm:$0xff] %vm1311_vm6, %v3513_v47  ;;  %4849 = vmatmul.msk.f32.gmra.mxu3 %vm1961_vm11, %v4189_v63  ;;  %v4416_v47 = vsel %vm204_vm0, %v7400_v26, 0.0  ;;  %v4485_v63 = vmul.f32 %v7406_v50, %v7406_v50 }
 0x70e   : > { %v3705_v58 = vpop.permute.xlu0 %3704  ;;  %v7415_v62 = vpop.f32.mrf.mxu1 }
 0x70f   : > { %3774 = vst.msk [vmem:[#allocation3 + $0xd0] sm:$0xff] %vm1505_vm7, %v3705_v58 }
 0x710   : > { %3966 = vst.msk [vmem:[#allocation3 + $0xd0] sm:$0xff] %vm1698_vm8, %v3897_v59  ;;  %v7430_v38 = vpop.f32.mrf.mxu3 }
 0x712   : > { %v4091_v14 = vpop.permute.xlu2 %4090 }
 0x714   : > { %v4063_v18 = vpop.permute.xlu1 %4062 }
 0x715   : > { %4145 = vst.msk [vmem:[#allocation3 + $0x68] sm:$0xff] %vm1891_vm10, %v4063_v18  ;;  %v4517_v18 = vsel %vm204_vm0, %v4484_v30, 0.0 }
 0x716   : > { %v4089_v21 = vpop.permute.xlu0 %4088  ;;  %v7420_v40 = vpop.f32.mrf.mxu1 }
 0x717   : > { %4158 = vst.msk [vmem:[#allocation3 + $0xd0] sm:$0xff] %vm1891_vm10, %v4089_v21  ;;  %v4418_v21 = vsel %vm204_vm0, %v7406_v50, 0.0 }
 0x71a   : > { %v3517_v19 = vpop.permute.xlu2 %3516 }
 0x71b   : > { %3584 = vst.msk [vmem:[#allocation3 + $0xe0] sm:$0xff] %vm1311_vm6, %v3517_v19  ;;  %v4486_v19 = vmul.f32 %v7412_v23, %v7412_v23 }
 0x71c   : > { %v3489_v29 = vpop.permute.xlu1 %3488  ;;  %v4177_v32 = vld [vmem:[#allocation3 + $0x68] sm:$0xff] }
 0x71d   : > { %3570 = vst.msk [vmem:[#allocation3 + $0x70] sm:$0xff] %vm1311_vm6, %v3489_v29  ;;  %4837 = vmatmul.msk.f32.gmra.mxu1 %vm1961_vm11, %v4177_v32 }
 0x71e   : > { %3762 = vst.msk [vmem:[#allocation3 + $0x70] sm:$0xff] %vm1505_vm7, %v3681_v9  ;;  %v3515_v51 = vpop.permute.xlu0 %3514  ;;  %v4190_v11 = vld [vmem:[#allocation3 + $0xd0] sm:$0xff]  ;;  %v7424_v37 = vpop.f32.mrf.mxu1  ;;  %v4414_v9 = vsel %vm204_vm0, %v7394_v17, 0.0 }
 0x71f   : > { %3583 = vst.msk [vmem:[#allocation3 + $0xd8] sm:$0xff] %vm1311_vm6, %v3515_v51  ;;  %4850 = vmatmul.msk.f32.gmra.mxu3 %vm1961_vm11, %v4190_v11  ;;  %v4415_v58 = vadd.f32 %v4414_v9, %v4413_v6 }
 0x720   : > { %3775 = vst.msk [vmem:[#allocation3 + $0xd8] sm:$0xff] %vm1505_vm7, %v3707_v4  ;;  %v4515_v4 = vsel %vm204_vm0, %v4483_v12, 0.0 }
 0x721   : > { %v4417_v51 = vadd.f32 %v4416_v47, %v4415_v58 }
 0x722   : > { %v4067_v52 = vpop.permute.xlu2 %4066  ;;  %v7434_v55 = vpop.f32.mrf.mxu3 }
 0x724   : > { %v3873_v10 = vpop.permute.xlu1 %3872 }
 0x725   : > { %3954 = vst.msk [vmem:[#allocation3 + $0x70] sm:$0xff] %vm1698_vm8, %v3873_v10  ;;  %v4420_v10 = vsel %vm204_vm0, %v7412_v23, 0.0 }
 0x726   : > { %v4065_v31 = vpop.permute.xlu0 %4064 }
 0x727   : > { %4146 = vst.msk [vmem:[#allocation3 + $0x70] sm:$0xff] %vm1891_vm10, %v4065_v31  ;;  %v4487_v31 = vmul.f32 %v7415_v62, %v7415_v62 }
 0x72a   : > { %v3519_v44 = vpop.permute.xlu2 %3518 }
 0x72b   : > { %3585 = vst.msk [vmem:[#allocation3 + $0xe8] sm:$0xff] %vm1311_vm6, %v3519_v44 }
 0x72c   : > { %v3899_v8 = vpop.permute.xlu1 %3898  ;;  %v7428_v43 = vpop.f32.mrf.mxu1 }
 0x72d   : > { %3967 = vst.msk [vmem:[#allocation3 + $0xd8] sm:$0xff] %vm1698_vm8, %v3899_v8  ;;  %v4419_v8 = vadd.f32 %v4418_v21, %v4417_v51 }
 0x72e   : > { %4159 = vst.msk [vmem:[#allocation3 + $0xd8] sm:$0xff] %vm1891_vm10, %v4091_v14  ;;  %v3491_v39 = vpop.permute.xlu0 %3490  ;;  %v4178_v61 = vld [vmem:[#allocation3 + $0x70] sm:$0xff]  ;;  %v4514_v14 = vsel %vm204_vm0, %v4482_v56, 0.0 }
 0x72f   : > { %3571 = vst.msk [vmem:[#allocation3 + $0x78] sm:$0xff] %vm1311_vm6, %v3491_v39  ;;  %4838 = vmatmul.msk.f32.gmra.mxu1 %vm1961_vm11, %v4178_v61  ;;  %v4516_v32 = vadd.f32 %v4515_v4, %v4514_v14  ;;  %v4521_v39 = vsel %vm204_vm0, %v4486_v19, 0.0  ;;  %v4422_v61 = vsel %vm204_vm0, %v7415_v62, 0.0 }
 0x731   : > { %v4518_v44 = vadd.f32 %v4517_v18, %v4516_v32 }
 0x732   : > { %v4095_v42 = vpop.permute.xlu2 %4094 }
 0x734   : > { %v3683_v35 = vpop.permute.xlu1 %3682 }
 0x735   : > { %3763 = vst.msk [vmem:[#allocation3 + $0x78] sm:$0xff] %vm1505_vm7, %v3683_v35  ;;  %v4191_v27 = vld [vmem:[#allocation3 + $0xd8] sm:$0xff]  ;;  %v4488_v35 = vmul.f32 %v7420_v40, %v7420_v40 }
 0x736   : > { %v3875_v28 = vpop.permute.xlu0 %3874  ;;  %4851 = vmatmul.msk.f32.gmra.mxu3 %vm1961_vm11, %v4191_v27 }
 0x737   : > { %3955 = vst.msk [vmem:[#allocation3 + $0x78] sm:$0xff] %vm1698_vm8, %v3875_v28  ;;  %v4421_v28 = vadd.f32 %v4420_v10, %v4419_v8 }
 0x738   : > { %4147 = vst.msk [vmem:[#allocation3 + $0x78] sm:$0xff] %vm1891_vm10, %v4067_v52  ;;  %v4519_v52 = vsel %vm204_vm0, %v4485_v63, 0.0 }
 0x739   : > { %v7438_v59 = vpop.f32.mrf.mxu3  ;;  %v4520_v27 = vadd.f32 %v4519_v52, %v4518_v44 }
 0x73a   : > { %v3905_v3 = vpop.permute.xlu2 %3904 }
 0x73c   : > { %v3709_v57 = vpop.permute.xlu1 %3708 }
 0x73d   : > { %3776 = vst.msk [vmem:[#allocation3 + $0xe0] sm:$0xff] %vm1505_vm7, %v3709_v57  ;;  %v7432_v13 = vpop.f32.mrf.mxu1  ;;  %v4523_v57 = vsel %vm204_vm0, %v4487_v31, 0.0 }
 0x73e   : > { %v3901_v48 = vpop.permute.xlu0 %3900 }
 0x73f   : > { %3968 = vst.msk [vmem:[#allocation3 + $0xe0] sm:$0xff] %vm1698_vm8, %v3901_v48  ;;  %v4179_v2 = vld [vmem:[#allocation3 + $0x78] sm:$0xff]  ;;  %v4424_v48 = vsel %vm204_vm0, %v7420_v40, 0.0 }
 0x740   : > { %4839 = vmatmul.msk.f32.gmra.mxu1 %vm1961_vm11, %v4179_v2  ;;  %v4489_v2 = vmul.f32 %v7424_v37, %v7424_v37 }
 0x742   : > { %v3715_v53 = vpop.permute.xlu2 %3714 }
 0x744   : > { %v4093_v49 = vpop.permute.xlu1 %4092 }
 0x745   : > { %4160 = vst.msk [vmem:[#allocation3 + $0xe0] sm:$0xff] %vm1891_vm10, %v4093_v49  ;;  %v4522_v49 = vadd.f32 %v4521_v39, %v4520_v27 }
 0x746   : > { %v3711_v33 = vpop.permute.xlu0 %3710 }
 0x747   : > { %3777 = vst.msk [vmem:[#allocation3 + $0xe8] sm:$0xff] %vm1505_vm7, %v3711_v33  ;;  %v4423_v33 = vadd.f32 %v4422_v61, %v4421_v28 }
 0x74c   : > { %v3903_v60 = vpop.permute.xlu1 %3902  ;;  %v4192_v34 = vld [vmem:[#allocation3 + $0xe0] sm:$0xff] }
 0x74d   : > { %3969 = vst.msk [vmem:[#allocation3 + $0xe8] sm:$0xff] %vm1698_vm8, %v3903_v60  ;;  %4852 = vmatmul.msk.f32.gmra.mxu3 %vm1961_vm11, %v4192_v34  ;;  %v4426_v60 = vsel %vm204_vm0, %v7424_v37, 0.0  ;;  %v4490_v34 = vmul.f32 %v7428_v43, %v7428_v43 }
 0x74e   : > { %4161 = vst.msk [vmem:[#allocation3 + $0xe8] sm:$0xff] %vm1891_vm10, %v4095_v42  ;;  %v3521_v25 = vpop.permute.xlu0 %3520  ;;  %v4525_v42 = vsel %vm204_vm0, %v4488_v35, 0.0 }
 0x74f   : > { %3586 = vst.msk [vmem:[#allocation3 + $0xf0] sm:$0xff] %vm1311_vm6, %v3521_v25 }
 0x750   : > { %v7463_v29 = vpop.f32.mrf.mxu3 }
 0x754   : > { %v3713_v7 = vpop.permute.xlu1 %3712 }
 0x755   : > { %3778 = vst.msk [vmem:[#allocation3 + $0xf0] sm:$0xff] %vm1505_vm7, %v3713_v7  ;;  %v4193_v45 = vld [vmem:[#allocation3 + $0xe8] sm:$0xff]  ;;  %v4425_v7 = vadd.f32 %v4424_v48, %v4423_v33 }
 0x756   : > { %3970 = vst.msk [vmem:[#allocation3 + $0xf0] sm:$0xff] %vm1698_vm8, %v3905_v3  ;;  %v4097_v20 = vpop.permute.xlu0 %4096  ;;  %4853 = vmatmul.msk.f32.gmra.mxu3 %vm1961_vm11, %v4193_v45  ;;  %v4524_v3 = vadd.f32 %v4523_v57, %v4522_v49 }
 0x757   : > { %4162 = vst.msk [vmem:[#allocation3 + $0xf0] sm:$0xff] %vm1891_vm10, %v4097_v20  ;;  %v4527_v20 = vsel %vm204_vm0, %v4489_v2, 0.0 }
 0x75a   : > { %v7436_v41 = vpop.f32.mrf.mxu1 }
 0x75b   : > { %v4492_v12 = vmul.f32 %v7436_v41, %v7436_v41  ;;  %v4432_v6 = vsel %vm204_vm0, %v7436_v41, 0.0 }
 0x75c   : > { %v3523_v16 = vpop.permute.xlu1 %3522 }
 0x75d   : > { %3587 = vst.msk [vmem:[#allocation3 + $0xf8] sm:$0xff] %vm1311_vm6, %v3523_v16  ;;  %v4428_v16 = vsel %vm204_vm0, %v7428_v43, 0.0  ;;  %v4533_v58 = vsel %vm204_vm0, %v4492_v12, 0.0 }
 0x75e   : > { %3779 = vst.msk [vmem:[#allocation3 + $0xf8] sm:$0xff] %vm1505_vm7, %v3715_v53  ;;  %v3907_v22 = vpop.permute.xlu0 %3906  ;;  %v4194_v0 = vld [vmem:[#allocation3 + $0xf0] sm:$0xff]  ;;  %v4491_v53 = vmul.f32 %v7432_v13, %v7432_v13 }
 0x75f   : > { %3971 = vst.msk [vmem:[#allocation3 + $0xf8] sm:$0xff] %vm1698_vm8, %v3907_v22  ;;  %4854 = vmatmul.msk.f32.gmra.mxu3 %vm1961_vm11, %v4194_v0  ;;  %v4526_v22 = vadd.f32 %v4525_v42, %v4524_v3  ;;  %v4427_v0 = vadd.f32 %v4426_v60, %v4425_v7  ;;  %v4498_v7 = vmul.f32 %v7418_v15, %v7418_v15 }
 0x760   : > { %v4531_v30 = vsel %vm204_vm0, %v4491_v53, 0.0 }
 0x761   : > { %v4528_v56 = vadd.f32 %v4527_v20, %v4526_v22  ;;  %v4429_v9 = vadd.f32 %v4428_v16, %v4427_v0  ;;  %v4444_v0 = vsel %vm204_vm0, %v7418_v15, 0.0 }
 0x762   : > { %v7487_v25 = vpop.f32.mrf.mxu3 }
 0x764   : > { %v4099_v1 = vpop.permute.xlu1 %4098 }
 0x765   : > { %4163 = vst.msk [vmem:[#allocation3 + $0xf8] sm:$0xff] %vm1891_vm10, %v4099_v1  ;;  %v4529_v1 = vsel %vm204_vm0, %v4490_v34, 0.0 }
 0x766   : > { %v4530_v47 = vadd.f32 %v4529_v1, %v4528_v56  ;;  %v4499_v1 = vmul.f32 %v7422_v36, %v7422_v36 }
 0x768   : > { %v4532_v19 = vadd.f32 %v4531_v30, %v4530_v47  ;;  %v4446_v30 = vsel %vm204_vm0, %v7422_v36, 0.0 }
 0x76a   : > { %v4534_v44 = vadd.f32 %v4533_v58, %v4532_v19  ;;  %v4448_v58 = vsel %vm204_vm0, %v7426_v54, 0.0 }
 0x76c   : > { %v4195_v46 = vld [vmem:[#allocation3 + $0xf8] sm:$0xff]  ;;  %v7440_v5 = vpop.f32.mrf.mxu1 }
 0x76d   : > { %4855 = vmatmul.msk.f32.gmra.mxu3 %vm1961_vm11, %v4195_v46  ;;  %v4430_v46 = vsel %vm204_vm0, %v7432_v13, 0.0  ;;  %v4493_v4 = vmul.f32 %v7440_v5, %v7440_v5  ;;  %v4434_v14 = vsel %vm204_vm0, %v7440_v5, 0.0 }
 0x76e   : > { %v4431_v63 = vadd.f32 %v4430_v46, %v4429_v9  ;;  %v4545_v9 = vsel %vm204_vm0, %v4498_v7, 0.0 }
 0x76f   : > { %v4535_v52 = vsel %vm204_vm0, %v4493_v4, 0.0 }
 0x770   : > { %v4433_v32 = vadd.f32 %v4432_v6, %v4431_v63  ;;  %v4536_v27 = vadd.f32 %v4535_v52, %v4534_v44  ;;  %v4500_v6 = vmul.f32 %v7426_v54, %v7426_v54  ;;  %v4547_v63 = vsel %vm204_vm0, %v4499_v1, 0.0 }
 0x772   : > { %v4435_v8 = vadd.f32 %v4434_v14, %v4433_v32  ;;  %v4501_v14 = vmul.f32 %v7430_v38, %v7430_v38  ;;  %v4549_v52 = vsel %vm204_vm0, %v4500_v6, 0.0 }
 0x779   : > { %v7509_v18 = vpop.f32.mrf.mxu3 }
 0x77a   : > { %v4460_v6 = vsel %vm204_vm0, %v7509_v18, 0.0 }
 0x77d   : > { %v7465_v11 = vpop.f32.mrf.mxu1 }
 0x77e   : > { %v4494_v21 = vmul.f32 %v7465_v11, %v7465_v11  ;;  %v4436_v10 = vsel %vm204_vm0, %v7465_v11, 0.0 }
 0x77f   : > { %v4437_v28 = vadd.f32 %v4436_v10, %v4435_v8  ;;  %v4450_v10 = vsel %vm204_vm0, %v7430_v38, 0.0 }
 0x780   : > { %v4537_v39 = vsel %vm204_vm0, %v4494_v21, 0.0 }
 0x781   : > { %v4538_v2 = vadd.f32 %v4537_v39, %v4536_v27  ;;  %v4551_v39 = vsel %vm204_vm0, %v4501_v14, 0.0 }
 0x790   : > { %v7528_v33 = vpop.f32.mrf.mxu3 }
 0x791   : > { %v4462_v14 = vsel %vm204_vm0, %v7528_v33, 0.0 }
 0x79a   : > { %v7489_v45 = vpop.f32.mrf.mxu1 }
 0x79b   : > { %v4495_v31 = vmul.f32 %v7489_v45, %v7489_v45  ;;  %v4438_v61 = vsel %vm204_vm0, %v7489_v45, 0.0 }
 0x79c   : > { %v4439_v49 = vadd.f32 %v4438_v61, %v4437_v28  ;;  %v4452_v61 = vsel %vm204_vm0, %v7434_v55, 0.0 }
 0x79d   : > { %v4539_v57 = vsel %vm204_vm0, %v4495_v31, 0.0  ;;  %v4502_v31 = vmul.f32 %v7434_v55, %v7434_v55 }
 0x79e   : > { %v4540_v60 = vadd.f32 %v4539_v57, %v4538_v2  ;;  %v4503_v57 = vmul.f32 %v7438_v59, %v7438_v59 }
 0x79f   : > { %v4553_v28 = vsel %vm204_vm0, %v4502_v31, 0.0 }
 0x7a2   : > { %v7554_v21 = vpop.f32.mrf.mxu3 }
 0x7ac   : > { %v7513_v51 = vpop.f32.mrf.mxu1 }
 0x7ad   : > { %v4496_v35 = vmul.f32 %v7513_v51, %v7513_v51  ;;  %v4440_v48 = vsel %vm204_vm0, %v7513_v51, 0.0 }
 0x7ae   : > { %v4441_v34 = vadd.f32 %v4440_v48, %v4439_v49  ;;  %v4454_v49 = vsel %vm204_vm0, %v7438_v59, 0.0 }
 0x7af   : > { %v4541_v42 = vsel %vm204_vm0, %v4496_v35, 0.0 }
 0x7b0   : > { %v4542_v53 = vadd.f32 %v4541_v42, %v4540_v60  ;;  %v4555_v60 = vsel %vm204_vm0, %v4503_v57, 0.0 }
 0x7b9   : > { %v7567_v48 = vpop.f32.mrf.mxu3 }
 0x7bd   : > { %v7531_v3 = vpop.f32.mrf.mxu1 }
 0x7be   : > { %v4442_v20 = vsel %vm204_vm0, %v7531_v3, 0.0  ;;  %v4497_v16 = vmul.f32 %v7531_v3, %v7531_v3 }
 0x7bf   : > { %v4443_v22 = vadd.f32 %v4442_v20, %v4441_v34  ;;  %v4504_v34 = vmul.f32 %v7463_v29, %v7463_v29  ;;  %v4456_v20 = vsel %vm204_vm0, %v7463_v29, 0.0 }
 0x7c0   : > { %v4543_v46 = vsel %vm204_vm0, %v4497_v16, 0.0 }
 0x7c1   : > { %v4445_v12 = vadd.f32 %v4444_v0, %v4443_v22  ;;  %v4544_v56 = vadd.f32 %v4543_v46, %v4542_v53  ;;  %v4557_v53 = vsel %vm204_vm0, %v4504_v34, 0.0  ;;  %v4505_v22 = vmul.f32 %v7487_v25, %v7487_v25 }
 0x7c2   : > { %v4458_v46 = vsel %vm204_vm0, %v7487_v25, 0.0 }
 0x7c3   : > { %v4447_v4 = vadd.f32 %v4446_v30, %v4445_v12  ;;  %v4546_v47 = vadd.f32 %v4545_v9, %v4544_v56  ;;  %v4559_v56 = vsel %vm204_vm0, %v4505_v22, 0.0  ;;  %v4506_v9 = vmul.f32 %v7509_v18, %v7509_v18 }
 0x7c5   : > { %v4449_v19 = vadd.f32 %v4448_v58, %v4447_v4  ;;  %v4548_v32 = vadd.f32 %v4547_v63, %v4546_v47  ;;  %v4561_v47 = vsel %vm204_vm0, %v4506_v9, 0.0  ;;  %v4507_v63 = vmul.f32 %v7528_v33, %v7528_v33 }
 0x7c7   : > { %v4451_v44 = vadd.f32 %v4450_v10, %v4449_v19  ;;  %v4550_v8 = vadd.f32 %v4549_v52, %v4548_v32  ;;  %v4563_v52 = vsel %vm204_vm0, %v4507_v63, 0.0  ;;  %v4508_v10 = vmul.f32 %v7554_v21, %v7554_v21 }
 0x7c9   : > { %v4552_v35 = vadd.f32 %v4551_v39, %v4550_v8  ;;  %v4453_v27 = vadd.f32 %v4452_v61, %v4451_v44  ;;  %v4464_v44 = vsel %vm204_vm0, %v7554_v21, 0.0  ;;  %v4565_v39 = vsel %vm204_vm0, %v4508_v10, 0.0 }
 0x7ca   : > { %v4509_v61 = vmul.f32 %v7567_v48, %v7567_v48 }
 0x7cb   : > { %v4554_v2 = vadd.f32 %v4553_v28, %v4552_v35  ;;  %v4455_v42 = vadd.f32 %v4454_v49, %v4453_v27  ;;  %v4466_v27 = vsel %vm204_vm0, %v7567_v48, 0.0 }
 0x7cc   : > { %v4567_v57 = vsel %vm204_vm0, %v4509_v61, 0.0 }
 0x7cd   : > { %v4556_v7 = vadd.f32 %v4555_v60, %v4554_v2  ;;  %v4457_v16 = vadd.f32 %v4456_v20, %v4455_v42 }
 0x7cf   : > { %v4558_v1 = vadd.f32 %v4557_v53, %v4556_v7  ;;  %v4459_v12 = vadd.f32 %v4458_v46, %v4457_v16 }
 0x7d0   : > { %v7579_v0 = vpop.f32.mrf.mxu3 }
 0x7d1   : > { %v4560_v30 = vadd.f32 %v4559_v56, %v4558_v1  ;;  %v4461_v4 = vadd.f32 %v4460_v6, %v4459_v12  ;;  %v4510_v2 = vmul.f32 %v7579_v0, %v7579_v0  ;;  %v4468_v60 = vsel %vm204_vm0, %v7579_v0, 0.0 }
 0x7d3   : > { %v4562_v58 = vadd.f32 %v4561_v47, %v4560_v30  ;;  %v4463_v19 = vadd.f32 %v4462_v14, %v4461_v4  ;;  %v4569_v20 = vsel %vm204_vm0, %v4510_v2, 0.0 }
 0x7d5   : > { %v4564_v31 = vadd.f32 %v4563_v52, %v4562_v58  ;;  %v4465_v8 = vadd.f32 %v4464_v44, %v4463_v19 }
 0x7d7   : > { %v4566_v35 = vadd.f32 %v4565_v39, %v4564_v31  ;;  %v4467_v28 = vadd.f32 %v4466_v27, %v4465_v8 }
 0x7d9   : > { %v7593_v32 = vpop.f32.mrf.mxu3  ;;  %v4568_v49 = vadd.f32 %v4567_v57, %v4566_v35  ;;  %v4469_v7 = vadd.f32 %v4468_v60, %v4467_v28 }
 0x7da   : > { %v4511_v34 = vmul.f32 %v7593_v32, %v7593_v32  ;;  %v4470_v16 = vsel %vm204_vm0, %v7593_v32, 0.0 }
 0x7db   : > { %v4570_v22 = vadd.f32 %v4569_v20, %v4568_v49  ;;  %v4471_v12 = vadd.f32 %v4470_v16, %v4469_v7 }
 0x7dc   : > { %v4571_v1 = vsel %vm204_vm0, %v4511_v34, 0.0 }
 0x7dd   : > { %v4572_v9 = vadd.f32 %v4571_v1, %v4570_v22 }
 0x7e2   : > { %v7608_v42 = vpop.f32.mrf.mxu3 }
 0x7e3   : > { %v4512_v53 = vmul.f32 %v7608_v42, %v7608_v42  ;;  %v4472_v46 = vsel %vm204_vm0, %v7608_v42, 0.0 }
 0x7e4   : > { %v4473_v30 = vadd.f32 %v4472_v46, %v4471_v12 }
 0x7e5   : > { %v4573_v56 = vsel %vm204_vm0, %v4512_v53, 0.0 }
 0x7e6   : > { %v4574_v63 = vadd.f32 %v4573_v56, %v4572_v9 }
 0x7f0   : > { %v7623_v6 = vpop.f32.mrf.mxu3 }
 0x7f1   : > { %v4474_v4 = vsel %vm204_vm0, %v7623_v6, 0.0  ;;  %v4513_v47 = vmul.f32 %v7623_v6, %v7623_v6 }
 0x7f2   : > { %v4475_v58 = vadd.f32 %v4474_v4, %v4473_v30 }
 0x7f3   : > { %v4575_v14 = vsel %vm204_vm0, %v4513_v47, 0.0 }
 0x7f4   : > { %v4476_v19 = vrot.slane %v4475_v58, 4  ;;  %v4576_v52 = vadd.f32 %v4575_v14, %v4574_v63 }
 0x7f6   : > { %v4477_v10 = vadd.f32 %v4476_v19, %v4475_v58  ;;  %v4577_v31 = vrot.slane %v4576_v52, 4 }
 0x7f8   : > { %v4478_v44 = vrot.slane %v4477_v10, 2  ;;  %v4578_v8 = vadd.f32 %v4577_v31, %v4576_v52 }
 0x7fa   : > { %v4479_v39 = vadd.f32 %v4478_v44, %v4477_v10  ;;  %v4579_v61 = vrot.slane %v4578_v8, 2  ;;  %v7966_v10 = vld [vmem:[#allocation6_spill] sm:$0xff]  ;;  %v7967_v44 = vld [vmem:[#allocation8_spill] sm:$0xff] }
 0x7fc   : > { %v4480_v35 = vrot.slane %v4479_v39, 1  ;;  %v4580_v27 = vadd.f32 %v4579_v61, %v4578_v8 }
 0x7fe   : > { %v4481_v28 = vadd.f32 %v4480_v35, %v4479_v39  ;;  %v4581_v57 = vrot.slane %v4580_v27, 1  ;;  %v7968_v39 = vld [vmem:[#allocation4_spill] sm:$0xff] }
 0x800   : > { %v4582_v2 = vadd.f32 %v4581_v57, %v4580_v27  ;;  %v7630_v49 = vmul.f32 0.00390625, %v4481_v28  ;;  %v7969_v27 = vld [vmem:[#allocation5_spill] sm:$0xff] }
 0x802   : > { %v4584_v60 = vmul.f32 0.00390625, %v4582_v2  ;;  %v4585_v34 = vmul.f32 %v7630_v49, %v7630_v49  ;;  %v4587_v9 = vsub.f32 %v7388_v24, %v7630_v49  ;;  %v4588_v30 = vsub.f32 %v7394_v17, %v7630_v49  ;;  %v7970_v2 = vld [vmem:[#allocation7_spill] sm:$0xff] }
 0x803   : > { %v4589_v4 = vsub.f32 %v7400_v26, %v7630_v49  ;;  %v4590_v47 = vsub.f32 %v7406_v50, %v7630_v49  ;;  %v4591_v63 = vsub.f32 %v7412_v23, %v7630_v49  ;;  %v4592_v24 = vsub.f32 %v7415_v62, %v7630_v49 }
 0x804   : > { %v4586_v7 = vsub.f32 %v4584_v60, %v4585_v34  ;;  %v4593_v26 = vsub.f32 %v7420_v40, %v7630_v49  ;;  %v4594_v50 = vsub.f32 %v7424_v37, %v7630_v49  ;;  %v4595_v23 = vsub.f32 %v7428_v43, %v7630_v49 }
 0x805   : > { %v4596_v35 = vsub.f32 %v7432_v13, %v7630_v49  ;;  %v4597_v43 = vsub.f32 %v7436_v41, %v7630_v49  ;;  %v4598_v34 = vsub.f32 %v7440_v5, %v7630_v49  ;;  %v4599_v41 = vsub.f32 %v7465_v11, %v7630_v49 }
 0x806   : > { %v4619_v20 = vadd.f32 1e-05, %v4586_v7  ;;  %v7971_v7 = vld [vmem:[#allocation10_spill] sm:$0xff]  ;;  %v4600_v5 = vsub.f32 %v7489_v45, %v7630_v49  ;;  %v4601_v11 = vsub.f32 %v7513_v51, %v7630_v49  ;;  %v4602_v45 = vsub.f32 %v7531_v3, %v7630_v49 }
 0x807   : > { %v4603_v51 = vsub.f32 %v7418_v15, %v7630_v49  ;;  %v4604_v3 = vsub.f32 %v7422_v36, %v7630_v49  ;;  %v4605_v15 = vsub.f32 %v7426_v54, %v7630_v49  ;;  %v4606_v36 = vsub.f32 %v7430_v38, %v7630_v49 }
 0x808   : > { %4888 = vrsqrt.f32 %v4619_v20  ;;  %vm4626_vm1 = vweird.f32 %v4619_v20  ;;  %v4607_v54 = vsub.f32 %v7434_v55, %v7630_v49  ;;  %v4608_v38 = vsub.f32 %v7438_v59, %v7630_v49 }
 0x809   : > { %v4609_v55 = vsub.f32 %v7463_v29, %v7630_v49  ;;  %v4610_v59 = vsub.f32 %v7487_v25, %v7630_v49  ;;  %v4611_v29 = vsub.f32 %v7509_v18, %v7630_v49  ;;  %v4612_v25 = vsub.f32 %v7528_v33, %v7630_v49 }
 0x80a   : > { %v4613_v18 = vsub.f32 %v7554_v21, %v7630_v49  ;;  %v4614_v33 = vsub.f32 %v7567_v48, %v7630_v49  ;;  %v4615_v21 = vsub.f32 %v7579_v0, %v7630_v49  ;;  %v4616_v48 = vsub.f32 %v7593_v32, %v7630_v49 }
 0x80b   : > { %v4617_v0 = vsub.f32 %v7608_v42, %v7630_v49  ;;  %v4618_v32 = vsub.f32 %v7623_v6, %v7630_v49  ;;  %v7993_v6 = vld [vmem:[#allocation33_spill] sm:$0xff] }
 0x80e   : > { %v4889_v16 = vpop.eup %4888 }
 0x80f   : > { %v4621_v53 = vmul.f32 %v4889_v16, %v4619_v20  ;;  %vm4627_vm15 = vweird.f32 %v4889_v16 }
 0x810   : > { %vm4628_vm2 = vmor %vm4626_vm1, %vm4627_vm15 }
 0x811   : > { %v4622_v22 = vmul.f32 %v4889_v16, %v4621_v53  ;;  %v7972_v53 = vld [vmem:[#allocation14_spill] sm:$0xff] }
 0x813   : > { %v4623_v1 = vmul.f32 0.5, %v4622_v22 }
 0x815   : > { %v4624_v46 = vsub.f32 1.5, %v4623_v1 }
 0x817   : > { %v4625_v12 = vmul.f32 %v4889_v16, %v4624_v46  ;;  %v7973_v46 = vld [vmem:[#allocation9_spill] sm:$0xff] }
 0x819   : > { %v7634_v56 = vsel %vm4628_vm2, %v4889_v16, %v4625_v12 }
 0x81a   : > { %v4630_v58 = vmul.f32 %v7634_v56, %v4587_v9  ;;  %v4631_v14 = vmul.f32 %v7634_v56, %v4588_v30  ;;  %v4632_v19 = vmul.f32 %v7634_v56, %v4589_v4  ;;  %v4633_v17 = vmul.f32 %v7634_v56, %v4590_v47  ;;  %v7974_v30 = vld [vmem:[#allocation12_spill] sm:$0xff] }
 0x81b   : > { %v4634_v52 = vmul.f32 %v7634_v56, %v4591_v63  ;;  %v4635_v62 = vmul.f32 %v7634_v56, %v4592_v24  ;;  %v4636_v40 = vmul.f32 %v7634_v56, %v4593_v26  ;;  %v4637_v37 = vmul.f32 %v7634_v56, %v4594_v50  ;;  %v7975_v63 = vld [vmem:[#allocation17_spill] sm:$0xff]  ;;  %v7977_v26 = vld [vmem:[#allocation15_spill] sm:$0xff] }
 0x81c   : > { %v4662_v31 = vadd.f32 %v4630_v58, %v7966_v10  ;;  %v4663_v8 = vadd.f32 %v4631_v14, %v7967_v44  ;;  %v4664_v61 = vadd.f32 %v4632_v19, %v7968_v39  ;;  %v4665_v28 = vadd.f32 %v4633_v17, %v7969_v27  ;;  %v7976_v19 = vld [vmem:[#allocation11_spill] sm:$0xff]  ;;  %v7979_v10 = vld [vmem:[#allocation13_spill] sm:$0xff] }
 0x81d   : > { %v4638_v57 = vmul.f32 %v7634_v56, %v4595_v23  ;;  %v4666_v60 = vadd.f32 %v4634_v52, %v7970_v2  ;;  %v4639_v13 = vmul.f32 %v7634_v56, %v4596_v35  ;;  %v4667_v20 = vadd.f32 %v4635_v62, %v7971_v7  ;;  %v7978_v23 = vld [vmem:[#allocation20_spill] sm:$0xff]  ;;  %v7981_v35 = vld [vmem:[#allocation23_spill] sm:$0xff]  ;;  %v7983_v2 = vld [vmem:[#allocation21_spill] sm:$0xff] }
 0x81e   : > { %4694 = vst.msk [vmem:[%s7660_s24] sm:$0xff] %vm204_vm0, %v4662_v31  ;;  %v4640_v16 = vmul.f32 %v7634_v56, %v4597_v43  ;;  %v4668_v22 = vadd.f32 %v4636_v40, %v7972_v53  ;;  %v4641_v1 = vmul.f32 %v7634_v56, %v4598_v34  ;;  %v4669_v12 = vadd.f32 %v4637_v37, %v7973_v46  ;;  %v7987_v46 = vld [vmem:[#allocation29_spill] sm:$0xff] }
 0x81f   : > { %4695 = vst.msk [vmem:[%s7660_s24 + $0x8] sm:$0xff] %vm204_vm0, %v4663_v8  ;;  %v4642_v9 = vmul.f32 %v7634_v56, %v4599_v41  ;;  %v4670_v4 = vadd.f32 %v4638_v57, %v7974_v30  ;;  %v4643_v47 = vmul.f32 %v7634_v56, %v4600_v5  ;;  %v4671_v58 = vadd.f32 %v4639_v13, %v7975_v63  ;;  %v7980_v8 = vld [vmem:[#allocation18_spill] sm:$0xff]  ;;  %v7985_v41 = vld [vmem:[#allocation19_spill] sm:$0xff] }
 0x820   : > { %4696 = vst.msk [vmem:[%s7660_s24 + $0x10] sm:$0xff] %vm204_vm0, %v4664_v61  ;;  %v4644_v14 = vmul.f32 %v7634_v56, %v4601_v11  ;;  %v4672_v24 = vadd.f32 %v4640_v16, %v7976_v19  ;;  %v4645_v17 = vmul.f32 %v7634_v56, %v4602_v45  ;;  %v4673_v52 = vadd.f32 %v4641_v1, %v7977_v26  ;;  %v7984_v13 = vld [vmem:[#allocation26_spill] sm:$0xff]  ;;  %v7989_v45 = vld [vmem:[#allocation27_spill] sm:$0xff]  ;;  %v7991_v19 = vld [vmem:[#allocation25_spill] sm:$0xff] }
 0x821   : > { %4697 = vst.msk [vmem:[%s7660_s24 + $0x18] sm:$0xff] %vm204_vm0, %v4665_v28  ;;  %v4646_v50 = vmul.f32 %v7634_v56, %v4603_v51  ;;  %v4674_v62 = vadd.f32 %v4642_v9, %v7978_v23  ;;  %v4647_v40 = vmul.f32 %v7634_v56, %v4604_v3  ;;  %v4675_v31 = vadd.f32 %v4643_v47, %v7979_v10  ;;  %v7982_v28 = vld [vmem:[#allocation16_spill] sm:$0xff]  ;;  %v7988_v9 = vld [vmem:[#allocation22_spill] sm:$0xff] }
 0x822   : > { %4698 = vst.msk [vmem:[%s7660_s24 + $0x20] sm:$0xff] %vm204_vm0, %v4666_v60  ;;  %v4648_v44 = vmul.f32 %v7634_v56, %v4605_v15  ;;  %v4676_v39 = vadd.f32 %v4644_v14, %v7980_v8  ;;  %v4649_v61 = vmul.f32 %v7634_v56, %v4606_v36  ;;  %v4677_v37 = vadd.f32 %v4645_v17, %v7981_v35  ;;  %v7992_v3 = vld [vmem:[#allocation30_spill] sm:$0xff] }
 0x823   : > { %4699 = vst.msk [vmem:[%s7660_s24 + $0x28] sm:$0xff] %vm204_vm0, %v4667_v20  ;;  %v4650_v27 = vmul.f32 %v7634_v56, %v4607_v54  ;;  %v4678_v43 = vadd.f32 %v4646_v50, %v7982_v28  ;;  %v4651_v57 = vmul.f32 %v7634_v56, %v4608_v38  ;;  %v4679_v60 = vadd.f32 %v4647_v40, %v7983_v2  ;;  %v7995_v50 = vld [vmem:[#allocation32_spill] sm:$0xff]  ;;  %v7997_v40 = vld [vmem:[#allocation41_spill] sm:$0xff] }
 0x824   : > { %4700 = vst.msk [vmem:[%s7660_s24 + $0x30] sm:$0xff] %vm204_vm0, %v4668_v22  ;;  %v4652_v34 = vmul.f32 %v7634_v56, %v4609_v55  ;;  %v4680_v7 = vadd.f32 %v4648_v44, %v7984_v13  ;;  %v4653_v20 = vmul.f32 %v7634_v56, %v4610_v59  ;;  %v4681_v16 = vadd.f32 %v4649_v61, %v7985_v41  ;;  %v7986_v22 = vld [vmem:[#allocation24_spill] sm:$0xff] }
 0x825   : > { %4701 = vst.msk [vmem:[%s7660_s24 + $0x38] sm:$0xff] %vm204_vm0, %v4669_v12  ;;  %v4654_v53 = vmul.f32 %v7634_v56, %v4611_v29  ;;  %v4682_v5 = vadd.f32 %v4650_v27, %v7986_v22  ;;  %v4655_v1 = vmul.f32 %v7634_v56, %v4612_v25  ;;  %v4683_v12 = vadd.f32 %v4651_v57, %v7987_v46 }
 0x826   : > { %4702 = vst.msk [vmem:[%s7660_s24 + $0x40] sm:$0xff] %vm204_vm0, %v4670_v4  ;;  %v4656_v11 = vmul.f32 %v7634_v56, %v4613_v18  ;;  %v4684_v30 = vadd.f32 %v4652_v34, %v7988_v9  ;;  %v4657_v4 = vmul.f32 %v7634_v56, %v4614_v33  ;;  %v4685_v47 = vadd.f32 %v4653_v20, %v7989_v45 }
 0x827   : > { %4703 = vst.msk [vmem:[%s7660_s24 + $0x48] sm:$0xff] %vm204_vm0, %v4671_v58  ;;  %v4658_v63 = vmul.f32 %v7634_v56, %v4615_v21  ;;  %v7990_v58 = vld [vmem:[#allocation31_spill] sm:$0xff]  ;;  %v4659_v14 = vmul.f32 %v7634_v56, %v4616_v48  ;;  %v4660_v42 = vmul.f32 %v7634_v56, %v4617_v0  ;;  %v4661_v26 = vmul.f32 %v7634_v56, %v4618_v32 }
 0x828   : > { %4704 = vst.msk [vmem:[%s7660_s24 + $0x50] sm:$0xff] %vm204_vm0, %v4672_v24  ;;  %v4686_v51 = vadd.f32 %v4654_v53, %v7990_v58  ;;  %v4687_v24 = vadd.f32 %v4655_v1, %v7991_v19  ;;  %v4688_v17 = vadd.f32 %v4656_v11, %v7992_v3  ;;  %v4689_v49 = vadd.f32 %v4657_v4, %v7993_v6 }
 0x829   : > { %4705 = vst.msk [vmem:[%s7660_s24 + $0x58] sm:$0xff] %vm204_vm0, %v4673_v52  ;;  %v7994_v52 = vld [vmem:[#allocation28_spill] sm:$0xff]  ;;  %v4691_v23 = vadd.f32 %v4659_v14, %v7995_v50  ;;  %v4693_v10 = vadd.f32 %v4661_v26, %v7997_v40 }
 0x82a   : > { %4706 = vst.msk [vmem:[%s7660_s24 + $0x60] sm:$0xff] %vm204_vm0, %v4674_v62  ;;  %v4690_v15 = vadd.f32 %v4658_v63, %v7994_v52  ;;  %v7996_v62 = vld [vmem:[#allocation40_spill] sm:$0xff] }
 0x82b   : > { %4707 = vst.msk [vmem:[%s7660_s24 + $0x68] sm:$0xff] %vm204_vm0, %v4675_v31  ;;  %v4692_v36 = vadd.f32 %v4660_v42, %v7996_v62 }
 0x82c   : > { %4708 = vst.msk [vmem:[%s7660_s24 + $0x70] sm:$0xff] %vm204_vm0, %v4676_v39 }
 0x82d   : > { %4709 = vst.msk [vmem:[%s7660_s24 + $0x78] sm:$0xff] %vm204_vm0, %v4677_v37 }
 0x82e   : > { %4710 = vst.msk [vmem:[%s7660_s24 + $0x80] sm:$0xff] %vm204_vm0, %v4678_v43 }
 0x82f   : > { %4711 = vst.msk [vmem:[%s7660_s24 + $0x88] sm:$0xff] %vm204_vm0, %v4679_v60 }
 0x830   : > { %4712 = vst.msk [vmem:[%s7660_s24 + $0x90] sm:$0xff] %vm204_vm0, %v4680_v7 }
 0x831   : > { %4713 = vst.msk [vmem:[%s7660_s24 + $0x98] sm:$0xff] %vm204_vm0, %v4681_v16 }
 0x832   : > { %4714 = vst.msk [vmem:[%s7660_s24 + $0xa0] sm:$0xff] %vm204_vm0, %v4682_v5 }
 0x833   : > { %4715 = vst.msk [vmem:[%s7660_s24 + $0xa8] sm:$0xff] %vm204_vm0, %v4683_v12 }
 0x834   : > { %4716 = vst.msk [vmem:[%s7660_s24 + $0xb0] sm:$0xff] %vm204_vm0, %v4684_v30 }
 0x835   : > { %4717 = vst.msk [vmem:[%s7660_s24 + $0xb8] sm:$0xff] %vm204_vm0, %v4685_v47 }
 0x836   : > { %4718 = vst.msk [vmem:[%s7660_s24 + $0xc0] sm:$0xff] %vm204_vm0, %v4686_v51 }
 0x837   : > { %4719 = vst.msk [vmem:[%s7660_s24 + $0xc8] sm:$0xff] %vm204_vm0, %v4687_v24 }
 0x838   : > { %4720 = vst.msk [vmem:[%s7660_s24 + $0xd0] sm:$0xff] %vm204_vm0, %v4688_v17 }
 0x839   : > { %4721 = vst.msk [vmem:[%s7660_s24 + $0xd8] sm:$0xff] %vm204_vm0, %v4689_v49 }
 0x83a   : > { %4722 = vst.msk [vmem:[%s7660_s24 + $0xe0] sm:$0xff] %vm204_vm0, %v4690_v15 }
 0x83b   : > { %4723 = vst.msk [vmem:[%s7660_s24 + $0xe8] sm:$0xff] %vm204_vm0, %v4691_v23 }
 0x83c   : > { %4724 = vst.msk [vmem:[%s7660_s24 + $0xf0] sm:$0xff] %vm204_vm0, %v4692_v36 }
 0x83d   : > { %4725 = vst.msk [vmem:[%s7660_s24 + $0xf8] sm:$0xff] %vm204_vm0, %v4693_v10 }
 0x83e PF: > { %s13_s12 = sadd.s32 1, %s4896_s12  }
 0x83f   : > { %p10_p4 = scmp.ge.s32.totalorder %s13_s12, 4  }
 0x841   :  { %12 = sbr.rel (!%p10_p4) target bundleno = 1 (0x1), region = 65 }

</bundles_post_ra>
